<compile_context>
chip_gen: v6e
topology: v6e:2x2x1
jax: 0.10.0
libtpu: 0.0.40
codegen_flags: <defaults>
</compile_context>

<pallas_src>
import functools

import jax
import jax.numpy as jnp
from jax.experimental import pallas as pl
from jax.experimental.pallas import tpu as pltpu

GROUP_SIZE = 24                      # |S4|, the 24 rotations of the cube (axis 1 of x)
_FUSED_SLAB_BYTES_MAX = 5 << 20      # per-sample slab cap; ~4x live in VMEM (in+out, dbl-buffered)


# ----------------- tile / VMEM helpers --------------------------------------------------------

def _round_up(v, m):
    return ((v + m - 1) // m) * m


def _row_tile(R, cap):
    """Multiple-of-8 row tile <= cap; aims for >= 2 (even #) row tiles so the 'parallel' row
    axis balances across v7x's 2 TensorCores. OOB rows of the last tile are dropped on store."""
    cap = max(8, (cap // 8) * 8)
    if R < 8:
        return R                              # full-extent row block (always legal)
    n_tiles = max(2, pl.cdiv(R, cap))
    if n_tiles % 2:
        n_tiles += 1
    tr = _round_up(pl.cdiv(R, n_tiles), 8)
    return max(8, min(tr, cap))


def _lane_tile(L, cap):
    """Multiple-of-128 lane tile <= cap, or the full lane extent when it fits (always legal)."""
    cap = max(128, (cap // 128) * 128)
    if L <= cap:
        return L
    return cap


def _compiler_params(sem, need_bytes):
    """dimension_semantics + an explicit scoped-VMEM limit with headroom (v5e default is only
    16 MiB; v7x physical is 64 MiB, so clamp well below that)."""
    limit = int(min(max(2 * need_bytes, 32 << 20), 48 << 20))
    return pltpu.CompilerParams(dimension_semantics=sem, vmem_limit_bytes=limit)


# ----------------- Pallas kernels: two-pass (streaming) path -----------------------------------

def _row_sum_kernel(x_ref, o_ref, acc_ref, *, tl, L):
    # grid = (row tiles [parallel], lane tiles [arbitrary reduction])
    j = pl.program_id(1)

    if tl % 128 != 0:
        # Single full-extent ragged lane block (grid along lanes == 1): direct reduce.
        o_ref[...] = jnp.sum(x_ref[...], axis=-1, keepdims=True)
        return

    @pl.when(j == 0)
    def _():
        acc_ref[...] = jnp.zeros_like(acc_ref)

    ragged = (L % tl) != 0                        # static: only the last lane tile is partial

    def chunk(k):
        c = x_ref[:, k * 128:(k + 1) * 128]
        if ragged:
            lane = j * tl + k * 128 + jax.lax.broadcasted_iota(jnp.int32, c.shape, 1)
            c = jnp.where(lane < L, c, 0.0)
        return c

    part = chunk(0)
    for k in range(1, tl // 128):                 # VPU adds into a 128-lane partial
        part = part + chunk(k)
    acc_ref[...] += part

    @pl.when(j == pl.num_programs(1) - 1)
    def _():
        o_ref[...] = jnp.sum(acc_ref[...], axis=-1, keepdims=True)   # single XLU reduce


def row_sums(xr, *, row_cap=256, lane_cap=4096):
    """Per-row sums of xr (R, L) -> (R, 1), tiled over rows and the reduction (lane) axis."""
    R, L = xr.shape
    tr = _row_tile(R, row_cap)
    tl = _lane_tile(L, lane_cap)
    need = 2 * tr * tl * 4 + 3 * tr * 128 * 4
    kernel = functools.partial(_row_sum_kernel, tl=tl, L=L)
    return pl.pallas_call(
        kernel,
        out_shape=jax.ShapeDtypeStruct((R, 1), jnp.float32),
        grid=(pl.cdiv(R, tr), pl.cdiv(L, tl)),
        in_specs=[pl.BlockSpec((tr, tl), lambda i, j: (i, j))],
        out_specs=pl.BlockSpec((tr, 1), lambda i, j: (i, 0)),
        scratch_shapes=[pltpu.VMEM((tr, 128), jnp.float32)],
        compiler_params=_compiler_params(("parallel", "arbitrary"), need),
    )(xr)


def _scale_kernel(x_ref, s_ref, o_ref):
    o_ref[...] = x_ref[...] * s_ref[...]


def scale_rows(xr, s_rows, *, row_cap=256, lane_cap=4096):
    """out[r, :] = xr[r, :] * s_rows[r, 0], lane-dense tiled elementwise kernel."""
    R, L = xr.shape
    tr = _row_tile(R, row_cap)
    tl = _lane_tile(L, lane_cap)
    need = 4 * tr * tl * 4 + 2 * tr * 128 * 4
    return pl.pallas_call(
        _scale_kernel,
        out_shape=jax.ShapeDtypeStruct((R, L), jnp.float32),
        grid=(pl.cdiv(R, tr), pl.cdiv(L, tl)),
        in_specs=[
            pl.BlockSpec((tr, tl), lambda i, j: (i, j)),
            pl.BlockSpec((tr, 1), lambda i, j: (i, 0)),
        ],
        out_specs=pl.BlockSpec((tr, tl), lambda i, j: (i, j)),
        compiler_params=_compiler_params(("parallel", "parallel"), need),
    )(xr, s_rows)


# ----------------- Pallas kernel: fused single-pass path ---------------------------------------

def _gse_fused_kernel(x_ref, w1_ref, b1_ref, w2t_ref, b2_ref, bcast_ref, o_ref, *, inv_gs):
    # One grid step per sample n; the whole (G*C, S) slab stays resident in VMEM.
    slab = x_ref[0]                                                    # (GC, S)
    rs = jnp.sum(slab, axis=-1, keepdims=True)                         # (GC, 1) per-row sums
    bcast = bcast_ref[...]                                             # (GC, C) one-hot(c) per row
    # squeeze: mean over group + spatial dims -> (1, C)
    c_mean = jnp.sum(bcast * rs, axis=0, keepdims=True) * inv_gs       # (1, C)
    # excitation MLP C -> E -> C (pure broadcast + lane/sublane reduces; no tiny matmuls)
    h = jnp.maximum(jnp.sum(w1_ref[...] * c_mean, axis=1, keepdims=True) + b1_ref[...], 0.0)  # (E,1)
    z = jnp.sum(w2t_ref[...] * h, axis=0, keepdims=True) + b2_ref[...]                        # (1,C)
    s = 1.0 / (1.0 + jnp.exp(-z))                                      # sigmoid, (1, C)
    # excite: broadcast s back onto the (g, c) rows and scale in place
    row_scale = jnp.sum(bcast * s, axis=1, keepdims=True)              # (GC, 1)
    o_ref[0] = slab * row_scale


def _gse_fused(x, p):
    N, G, C, D, H, W = x.shape
    S = D * H * W
    GC = G * C
    E = p["fc1_w"].shape[0]

    x3 = x.reshape(N, GC, S)                          # pure reshape: no transpose, no HBM copy
    b1 = p["fc1_b"].reshape(E, 1)
    w2t = p["fc2_w"].T                                # (E, C)
    b2 = p["fc2_b"].reshape(1, C)
    bcast = jnp.tile(jnp.eye(C, dtype=jnp.float32), (G, 1))   # (GC, C): row g*C+c -> one-hot(c)

    kernel = functools.partial(_gse_fused_kernel, inv_gs=1.0 / float(G * S))
    need = 4 * GC * S * 4 + (GC * C + 4 * E * C + 4 * C) * 4 + (1 << 20)

    out = pl.pallas_call(
        kernel,
        out_shape=jax.ShapeDtypeStruct((N, GC, S), jnp.float32),
        grid=(N,),
        in_specs=[
            pl.BlockSpec((1, GC, S), lambda n: (n, 0, 0)),
            pl.BlockSpec((E, C), lambda n: (0, 0)),
            pl.BlockSpec((E, 1), lambda n: (0, 0)),
            pl.BlockSpec((E, C), lambda n: (0, 0)),
            pl.BlockSpec((1, C), lambda n: (0, 0)),
            pl.BlockSpec((GC, C), lambda n: (0, 0)),
        ],
        out_specs=pl.BlockSpec((1, GC, S), lambda n: (n, 0, 0)),
        compiler_params=_compiler_params(("parallel",), need),
    )(x3, p["fc1_w"], b1, w2t, b2, bcast)
    return out.reshape(N, G, C, D, H, W)


# ----------------- parameters & forward --------------------------------------------------------

def init_params(key, channels, ratio=0.5):
    E = int(ratio * channels)
    k1, k2, k3, k4 = jax.random.split(key, 4)
    return {
        "fc1_w": 0.3 * jax.random.normal(k1, (E, channels), jnp.float32),   # Linear(C -> E)
        "fc1_b": 0.1 * jax.random.normal(k2, (E,), jnp.float32),
        "fc2_w": 0.3 * jax.random.normal(k3, (channels, E), jnp.float32),   # Linear(E -> C)
        "fc2_b": 0.1 * jax.random.normal(k4, (channels,), jnp.float32),
    }


def _gse_two_pass(x, p):
    N, G, C, D, H, W = x.shape
    S = D * H * W
    R = N * G * C
    xr = x.reshape(R, S)                            # pure reshape: no transpose, no HBM copy

    # squeeze: GGlobalAverage = mean over (G, D, H, W) per (n, c)
    sums = row_sums(xr)                             # (R, 1)  Pallas tiled reduction
    c_se = sums.reshape(N, G, C).sum(axis=1) / (G * S)        # tiny fold over G -> (N, C)

    # excitation MLP C -> E -> C on an (N, C) tensor: tens of FLOPs -> plain-JAX glue
    h = jnp.maximum(c_se @ p["fc1_w"].T + p["fc1_b"], 0.0)
    s = jax.nn.sigmoid(h @ p["fc2_w"].T + p["fc2_b"])          # (N, C)

    # excite: out = s[n, c] * x  (Pallas broadcast-scale, lane-dense output)
    s_rows = jnp.broadcast_to(s[:, None, :], (N, G, C)).reshape(R, 1)
    out = scale_rows(xr, s_rows)                    # (R, S)
    return out.reshape(N, G, C, D, H, W)


def gse_forward(x, p, *, force_two_pass=False):
    N, G, C, D, H, W = x.shape
    slab_bytes = G * C * D * H * W * 4
    if not force_two_pass and slab_bytes <= _FUSED_SLAB_BYTES_MAX:
        return _gse_fused(x, p)       # 2x|x| HBM traffic, single dispatch
    return _gse_two_pass(x, p)        # 3x|x| HBM traffic, scales to arbitrarily large slabs


# ----------------- pure-JAX reference for verification -----------------------------------------

def ref_forward(x, p):
    N, C = x.shape[0], x.shape[2]
    c_se = jnp.mean(x, axis=(1, -3, -2, -1))                  # GGlobalAverage -> (N, C)
    h = jnp.maximum(c_se @ p["fc1_w"].T + p["fc1_b"], 0.0)
    s = jax.nn.sigmoid(h @ p["fc2_w"].T + p["fc2_b"])
    return s.reshape(N, 1, C, 1, 1, 1) * x


if __name__ == "__main__":
    key = jax.random.PRNGKey(0)
    kx, kp = jax.random.split(key)
    N, C, D, H, W = 2, 4, 16, 16, 16
    x = jax.random.normal(kx, (N, GROUP_SIZE, C, D, H, W), jnp.float32)
    params = init_params(kp, C)

    ref = jax.block_until_ready(ref_forward(x, params))

    # fused single-pass path (small per-sample slab -> resident in VMEM)
    out = jax.block_until_ready(gse_forward(x, params))
    assert out.shape == x.shape and out.dtype == jnp.float32
    err = float(jnp.max(jnp.abs(out - ref)))
    assert err < 1e-4, f"fused path max abs err {err}"

    # tiled two-pass fallback (large-shape path), exercised here for coverage
    out2 = jax.block_until_ready(gse_forward(x, params, force_two_pass=True))
    err2 = float(jnp.max(jnp.abs(out2 - ref)))
    assert err2 < 1e-4, f"two-pass path max abs err {err2}"

    print("KERNEL_OK")
</pallas_src>

<mosaic_0001>
module attributes {stable_mosaic.version = 11 : i64} {
  func.func @_gse_fused_kernel(%arg0: i32, %arg1: memref<1x96x4096xf32, #tpu.memory_space<vmem>>, %arg2: memref<2x4xf32, #tpu.memory_space<vmem>>, %arg3: memref<2x1xf32, #tpu.memory_space<vmem>>, %arg4: memref<2x4xf32, #tpu.memory_space<vmem>>, %arg5: memref<1x4xf32, #tpu.memory_space<vmem>>, %arg6: memref<96x4xf32, #tpu.memory_space<vmem>>, %arg7: memref<1x96x4096xf32, #tpu.memory_space<vmem>>) attributes {dimension_semantics = [#tpu.dimension_semantics<parallel>], iteration_bounds = array<i64: 2>, scalar_prefetch = 0 : i64, scratch_operands = 0 : i64, tpu.core_type = #tpu.core_type<tc>, window_params = [{transform_indices = @transform_0, window_bounds = array<i64: 1, 96, 4096>}, {pipeline_mode = #tpu.pipeline_mode<synchronous>, transform_indices = @transform_1, window_bounds = array<i64: 2, 4>}, {pipeline_mode = #tpu.pipeline_mode<synchronous>, transform_indices = @transform_2, window_bounds = array<i64: 2, 1>}, {pipeline_mode = #tpu.pipeline_mode<synchronous>, transform_indices = @transform_3, window_bounds = array<i64: 2, 4>}, {pipeline_mode = #tpu.pipeline_mode<synchronous>, transform_indices = @transform_4, window_bounds = array<i64: 1, 4>}, {pipeline_mode = #tpu.pipeline_mode<synchronous>, transform_indices = @transform_5, window_bounds = array<i64: 96, 4>}, {transform_indices = @transform_6, window_bounds = array<i64: 1, 96, 4096>}]} {
    %c0 = arith.constant 0 : index
    %c0_0 = arith.constant 0 : index
    %c0_1 = arith.constant 0 : index
    %0 = vector.load %arg1[%c0, %c0_0, %c0_1] : memref<1x96x4096xf32, #tpu.memory_space<vmem>>, vector<1x96x4096xf32>
    %1 = vector.shape_cast %0 : vector<1x96x4096xf32> to vector<96x4096xf32>
    %cst = arith.constant dense<0.000000e+00> : vector<96xf32>
    %2 = vector.multi_reduction <add>, %1, %cst [1] : vector<96x4096xf32> to vector<96xf32>
    %3 = vector.shape_cast %2 : vector<96xf32> to vector<96x1xf32>
    %c0_2 = arith.constant 0 : index
    %c0_3 = arith.constant 0 : index
    %4 = vector.load %arg6[%c0_2, %c0_3] : memref<96x4xf32, #tpu.memory_space<vmem>>, vector<96x4xf32>
    %5 = vector.broadcast %3 : vector<96x1xf32> to vector<96x4xf32>
    %6 = arith.mulf %4, %5 : vector<96x4xf32>
    %cst_4 = arith.constant dense<0.000000e+00> : vector<4xf32>
    %7 = vector.multi_reduction <add>, %6, %cst_4 [0] : vector<96x4xf32> to vector<4xf32>
    %8 = vector.shape_cast %7 : vector<4xf32> to vector<1x4xf32>
    %cst_5 = arith.constant 1.01725263E-5 : f32
    %9 = vector.broadcast %cst_5 : f32 to vector<1x4xf32>
    %10 = arith.mulf %8, %9 : vector<1x4xf32>
    %c0_6 = arith.constant 0 : index
    %c0_7 = arith.constant 0 : index
    %11 = vector.load %arg2[%c0_6, %c0_7] : memref<2x4xf32, #tpu.memory_space<vmem>>, vector<2x4xf32>
    %12 = vector.broadcast %10 : vector<1x4xf32> to vector<2x4xf32>
    %13 = arith.mulf %11, %12 : vector<2x4xf32>
    %cst_8 = arith.constant dense<0.000000e+00> : vector<2xf32>
    %14 = vector.multi_reduction <add>, %13, %cst_8 [1] : vector<2x4xf32> to vector<2xf32>
    %15 = vector.shape_cast %14 : vector<2xf32> to vector<2x1xf32>
    %c0_9 = arith.constant 0 : index
    %c0_10 = arith.constant 0 : index
    %16 = vector.load %arg3[%c0_9, %c0_10] : memref<2x1xf32, #tpu.memory_space<vmem>>, vector<2x1xf32>
    %17 = arith.addf %15, %16 : vector<2x1xf32>
    %cst_11 = arith.constant 0.000000e+00 : f32
    %18 = vector.broadcast %cst_11 : f32 to vector<2x1xf32>
    %19 = arith.maximumf %17, %18 : vector<2x1xf32>
    %c0_12 = arith.constant 0 : index
    %c0_13 = arith.constant 0 : index
    %20 = vector.load %arg4[%c0_12, %c0_13] : memref<2x4xf32, #tpu.memory_space<vmem>>, vector<2x4xf32>
    %21 = vector.broadcast %19 : vector<2x1xf32> to vector<2x4xf32>
    %22 = arith.mulf %20, %21 : vector<2x4xf32>
    %cst_14 = arith.constant dense<0.000000e+00> : vector<4xf32>
    %23 = vector.multi_reduction <add>, %22, %cst_14 [0] : vector<2x4xf32> to vector<4xf32>
    %24 = vector.shape_cast %23 : vector<4xf32> to vector<1x4xf32>
    %c0_15 = arith.constant 0 : index
    %c0_16 = arith.constant 0 : index
    %25 = vector.load %arg5[%c0_15, %c0_16] : memref<1x4xf32, #tpu.memory_space<vmem>>, vector<1x4xf32>
    %26 = arith.addf %24, %25 : vector<1x4xf32>
    %cst_17 = arith.constant 0.000000e+00 : f32
    %27 = vector.broadcast %cst_17 : f32 to vector<1x4xf32>
    %28 = arith.subf %27, %26 : vector<1x4xf32>
    %29 = math.exp %28 : vector<1x4xf32>
    %cst_18 = arith.constant 1.000000e+00 : f32
    %30 = vector.broadcast %cst_18 : f32 to vector<1x4xf32>
    %31 = arith.addf %30, %29 : vector<1x4xf32>
    %cst_19 = arith.constant 1.000000e+00 : f32
    %32 = vector.broadcast %cst_19 : f32 to vector<1x4xf32>
    %33 = arith.divf %32, %31 : vector<1x4xf32>
    %34 = vector.broadcast %33 : vector<1x4xf32> to vector<96x4xf32>
    %35 = arith.mulf %4, %34 : vector<96x4xf32>
    %cst_20 = arith.constant dense<0.000000e+00> : vector<96xf32>
    %36 = vector.multi_reduction <add>, %35, %cst_20 [1] : vector<96x4xf32> to vector<96xf32>
    %37 = vector.shape_cast %36 : vector<96xf32> to vector<96x1xf32>
    %38 = vector.broadcast %37 : vector<96x1xf32> to vector<96x4096xf32>
    %39 = arith.mulf %1, %38 : vector<96x4096xf32>
    %c0_21 = arith.constant 0 : index
    %c0_22 = arith.constant 0 : index
    %c0_23 = arith.constant 0 : index
    %40 = vector.load %arg7[%c0_21, %c0_22, %c0_23] : memref<1x96x4096xf32, #tpu.memory_space<vmem>>, vector<1x96x4096xf32>
    %41 = vector.shape_cast %40 : vector<1x96x4096xf32> to vector<96x4096xf32>
    %42 = vector.shape_cast %39 : vector<96x4096xf32> to vector<1x96x4096xf32>
    tpu.vector_store %arg7[%c0_21, %c0_22, %c0_23], %42 {strides = array<i32>} : memref<1x96x4096xf32, #tpu.memory_space<vmem>>, vector<1x96x4096xf32>,
    return
  }
  func.func @transform_0(%arg0: i32) -> (i32, i32, i32) {
    %c0_i32 = arith.constant 0 : i32
    %c0_i32_0 = arith.constant 0 : i32
    %c0_i32_1 = arith.constant 0 : i32
    return %arg0, %c0_i32, %c0_i32_0 : i32, i32, i32
  }
  func.func @transform_1(%arg0: i32) -> (i32, i32) {
    %c0_i32 = arith.constant 0 : i32
    %c0_i32_0 = arith.constant 0 : i32
    %c0_i32_1 = arith.constant 0 : i32
    return %c0_i32, %c0_i32_0 : i32, i32
  }
  func.func @transform_2(%arg0: i32) -> (i32, i32) {
    %c0_i32 = arith.constant 0 : i32
    %c0_i32_0 = arith.constant 0 : i32
    %c0_i32_1 = arith.constant 0 : i32
    return %c0_i32, %c0_i32_0 : i32, i32
  }
  func.func @transform_3(%arg0: i32) -> (i32, i32) {
    %c0_i32 = arith.constant 0 : i32
    %c0_i32_0 = arith.constant 0 : i32
    %c0_i32_1 = arith.constant 0 : i32
    return %c0_i32, %c0_i32_0 : i32, i32
  }
  func.func @transform_4(%arg0: i32) -> (i32, i32) {
    %c0_i32 = arith.constant 0 : i32
    %c0_i32_0 = arith.constant 0 : i32
    %c0_i32_1 = arith.constant 0 : i32
    return %c0_i32, %c0_i32_0 : i32, i32
  }
  func.func @transform_5(%arg0: i32) -> (i32, i32) {
    %c0_i32 = arith.constant 0 : i32
    %c0_i32_0 = arith.constant 0 : i32
    %c0_i32_1 = arith.constant 0 : i32
    return %c0_i32, %c0_i32_0 : i32, i32
  }
  func.func @transform_6(%arg0: i32) -> (i32, i32, i32) {
    %c0_i32 = arith.constant 0 : i32
    %c0_i32_0 = arith.constant 0 : i32
    %c0_i32_1 = arith.constant 0 : i32
    return %arg0, %c0_i32, %c0_i32_0 : i32, i32, i32
  }
}

</mosaic_0001>

<bundles_post_ra>
// kernel: tpu_custom_call.1
= control target key start
LH: loop header
LB: loop body
LE: loop exit
PB: predicated region body
PF: predicated region fallthrough
CT: control target
= control target key end

     0   :  { %11 = vsyncpa [#allocation3], 0  ;;  %s4719_s0 = inlined_call_operand.hbm [shape: f32[2,96,4096], index: 0, kind: input, shape index: {}]   ;;  %s4720_s1 = inlined_call_operand.hbm [shape: f32[2,4], index: 1, kind: input, shape index: {}]   ;;  %s4721_s2 = inlined_call_operand.vmem [shape: f32[2,1], index: 2, kind: input, shape index: {}]   ;;  %s4722_s3 = inlined_call_operand.hbm [shape: f32[2,4], index: 3, kind: input, shape index: {}]   ;;  %s4723_s4 = inlined_call_operand.hbm [shape: f32[1,4], index: 4, kind: input, shape index: {}]   ;;  %s4724_s5 = inlined_call_operand.vmem [shape: f32[96,4], index: 5, kind: input, shape index: {}]   ;;  %s4725_s6 = inlined_call_operand.hbm [shape: f32[2,96,4096], index: 6, kind: output, shape index: {}]  }
   0x1   :  { %13 = vsyncpa [#allocation3 + $0x1], 0 }
   0x2   :  { %14 = vsyncpa [#allocation6], 0 }
   0x3   :  { %15 = vsyncpa [#allocation9], 0 }
   0x4   :  { %16 = vsyncpa [#allocation4], 0 }
   0x5   :  { %18 = vsyncpa [#allocation4 + $0x1], 0  ;;  %s2824_s21 = smov 0   ;;  %s2826_s22 = smov 0  }
   0x6   :  { %s2828_s23 = smov 0   ;;  %s2830_s24 = smov 0  }
   0x7 LB: > { %s2845_s25 = sadd.s32 4294967295, %s2777_s24   ;;  %s2110_s26 = sadd.s32 4294967294, %s2777_s24   ;;  %s2777_s24 = sphi %s2830_s24, %s4749_s24   ;;  %s2773_s23 = sphi %s2828_s23, %s4748_s23   ;;  %s2769_s22 = sphi %s2826_s22, %s4747_s22   ;;  %s2765_s21 = sphi %s2824_s21, %s4746_s21  }
   0x8   : > { %p44_p0 = scmp.ne.s32.totalorder %s2769_s22, %s2765_s21  ;;  %p4726_p1 = scmp.eq.s32.totalorder %s2845_s25, 0 }
   0x9   : > { %p179_p3 = scmp.eq.s32.totalorder %s2110_s26, 1  ;;  %p2111_p5 = scmp.ge.s32.totalorder %s2777_s24, 1 }
   0xa   : > { %p2854_p4 = por %p4726_p1, %p44_p0  ;;  %p186_p7 = scmp.lt.s32.totalorder %s2777_s24, 3 }
   0xb   : > { %p2859_p6 = por %p179_p3, %p44_p0  ;;  %s2779_s30 = smov [#allocation5]  }
   0xc   : > { %s4730_s27 = scalar_select %p2854_p4, 1, 0 }
   0xd   : > { %s4731_s28 = scalar_select %p2859_p6, 1, 0 }
   0xe   : > { %p2864_p8 = pnand %p2111_p5, %p186_p7  ;;  %s199_s7 = sshll.u32 %s2779_s30, 4  ;;  %s200_s7 = int_to_ptr.vmem [resolvable:$true] %s199_s7 }
   0xf   : > { %s2780_s8 = smov [#allocation7]   ;;  %s2781_s11 = smov [#allocation8]  }
  0x10   : > { %s4732_s29 = scalar_select %p2864_p8, 1, 0 }
  0x11   : > { %p2144_p10 = pneg %p2864_p8  ;;  %s213_s9 = sshll.u32 %s2780_s8, 4  ;;  %s214_s9 = int_to_ptr.vmem [resolvable:$true] %s213_s9 }
  0x12   : > { %s224_s12 = sshll.u32 %s2781_s11, 4  ;;  %s2610_s13 = scalar_lea.vmem %s200_s7, 32  ;;  %s2877_s12 = int_to_ptr.vmem [resolvable:$true] %s224_s12 }
  0x13   : > { %p2873_p11 = pnand %p2144_p10, %p4726_p1  ;;  %p2611_p13 = scmp.ne.s32.totalorder %s200_s7, %s2610_s13 }
  0x14   : > { %p2618_p5 = scmp.lt.s32.totalorder %s200_s7, %s200_s7  ;;  %p2619_p7 = scmp.lt.s32.totalorder %s2610_s13, %s2610_s13 }
  0x15   : > { %p2601_p12 = pneg %p2873_p11 }
  0x16   : > { %p2620_p10 = por %p2619_p7, %p2618_p5 }
  0x17   : > { %p2613_p0 = pnand %p2611_p13, %p2601_p12 }
  0x19   : > { %p2614_p3 = pneg %p2613_p0 }
  0x1b   : > { %p2621_p9 = pnand %p2620_p10, %p2614_p3 }
  0x1d   : > { %2624 = shalt.err (!%p2621_p9)
}
  0x1e   : > { %2147 = dma.hbm_to_vmem [thread:$0]  (!%p2873_p11), %s4720_s1, 32, %s200_s7, [#allocation6]  }
  0x1f   : > { %s2636_s16 = scalar_lea.vmem %s214_s9, 32  ;;  %p2644_p13 = scmp.lt.s32.totalorder %s214_s9, %s214_s9 }
  0x20   : > { %p2637_p1 = scmp.ne.s32.totalorder %s214_s9, %s2636_s16  ;;  %p2645_p0 = scmp.lt.s32.totalorder %s2636_s16, %s2636_s16 }
  0x22   : > { %p2639_p2 = pnand %p2637_p1, %p2601_p12  ;;  %p2646_p4 = por %p2645_p0, %p2644_p13 }
  0x24   : > { %p2640_p6 = pneg %p2639_p2 }
  0x26   : > { %p2647_p8 = pnand %p2646_p4, %p2640_p6 }
  0x28   : > { %2650 = shalt.err (!%p2647_p8)
}
  0x29   : > { %2150 = dma.hbm_to_vmem [thread:$0]  (!%p2873_p11), %s4722_s3, 32, %s214_s9, [#allocation6]  }
  0x2a   : > { %s2662_s19 = scalar_lea.vmem %s2877_s12, 16  ;;  %s2669_s20 = scalar_lea.vmem %s2877_s12, 32 }
  0x2b   : > { %p2663_p9 = scmp.ne.s32.totalorder %s2877_s12, %s2662_s19  ;;  %p2670_p4 = scmp.lt.s32.totalorder %s2877_s12, %s2877_s12 }
  0x2c   : > { %p2671_p6 = scmp.lt.s32.totalorder %s2669_s20, %s2662_s19 }
  0x2d   : > { %p2665_p1 = pnand %p2663_p9, %p2601_p12 }
  0x2e   : > { %p2672_p8 = por %p2671_p6, %p2670_p4 }
  0x2f   : > { %p2666_p2 = pneg %p2665_p1 }
  0x31   : > { %p2673_p3 = pnand %p2672_p8, %p2666_p2 }
  0x33   : > { %2676 = shalt.err (!%p2673_p3)
}
  0x34   : > { %2153 = dma.hbm_to_vmem [thread:$0]  (!%p2873_p11), %s4723_s4, 16, %s2877_s12, [#allocation9]  }
  0x35   : > { %s2912_s7 = sadd.s32 1, %s2777_s24   ;;  %s31_s9 = sadd.s32 1, %s2773_s23 }
  0x36   : > { %s28_s8 = ssub.s32 %s2777_s24, %s2912_s7  ;;  %p38_p5 = scmp.ne.s32.totalorder %s2773_s23, %s2769_s22 }
  0x37   : > { %p29_p12 = scmp.eq.s32.totalorder %s28_s8, 0  ;;  %p39_p7 = scmp.eq.s32.totalorder %s2777_s24, 0 }
  0x38   : > { %p2165_p10 = scmp.lt.s32.totalorder %s2777_s24, 2  ;;  %p4734_p0 = scmp.eq.s32.totalorder %s2845_s25, 1 }
  0x39   : > { %s2922_s10 = scalar_select %p29_p12, %s2773_s23, %s31_s9  }
  0x3a   : > { %p40_p13 = por %p39_p7, %p38_p5  ;;  %p2926_p9 = por %p4734_p0, %p38_p5 }
  0x3b   : > { %s238_s13 = sand.u32 1, %s2773_s23   ;;  %s2125_s14 = smul.u32 49152, %s2777_s24 }
  0x3c   : > { %s4735_s11 = scalar_select %p2926_p9, 1, 0 }
  0x3d   : > { %s2124_s12 = smul.u32 3072, %s238_s13  ;;  %s2935_s17 = scalar_lea.hbm %s4719_s0, %s2125_s14 }
  0x3e   : > { %p2937_p11 = pnand %p2165_p10, %p40_p13  ;;  %s2943_s26 = scalar_lea.sflag [#allocation3], %s238_s13 }
  0x3f   : > { %s242_s19 = scalar_lea.vmem [#allocation2], %s2124_s12  ;;  %s2677_s30 = scalar_lea.hbm %s2935_s17, 49152 }
  0x40   : > { %s249_s20 = sshll.u32 %s242_s19, 4  ;;  %p2678_p1 = scmp.ne.s32.totalorder %s2935_s17, %s2677_s30  ;;  %s2941_s20 = int_to_ptr.vmem [resolvable:$true] %s249_s20 }
  0x41   : > { %p2679_p2 = pneg %p2937_p11  ;;  %s2682_s14 = scalar_lea.hbm %s4719_s0, 98304 }
  0x42   : > { %p2683_p8 = scmp.lt.s32.totalorder %s2935_s17, %s4719_s0  ;;  %p2684_p3 = scmp.lt.s32.totalorder %s2682_s14, %s2677_s30 }
  0x43   : > { %p2680_p4 = pnand %p2679_p2, %p2678_p1 }
  0x44   : > { %p2685_p12 = por %p2684_p3, %p2683_p8 }
  0x45   : > { %p2681_p6 = pneg %p2680_p4 }
  0x47   : > { %p2686_p5 = pnand %p2685_p12, %p2681_p6 }
  0x49   : > { %2689 = shalt.err (!%p2686_p5)
}
  0x4a   : > { %s2690_s13 = scalar_lea.vmem %s2941_s20, 49152  ;;  %s2782_s12 = smov [#allocation2]  }
  0x4b   : > { %p2691_p7 = scmp.ne.s32.totalorder %s2941_s20, %s2690_s13  ;;  %s2695_s19 = sshll.u32 %s2782_s12, 4  ;;  %s2696_s19 = int_to_ptr.vmem [resolvable:$false] %s2695_s19 }
  0x4c   : > { %s2697_s8 = scalar_lea.vmem %s2696_s19, 98304  ;;  %p2698_p0 = scmp.lt.s32.totalorder %s2941_s20, %s2696_s19 }
  0x4d   : > { %p2693_p10 = pnand %p2691_p7, %p2679_p2  ;;  %p2699_p1 = scmp.lt.s32.totalorder %s2697_s8, %s2690_s13 }
  0x4f   : > { %p2694_p13 = pneg %p2693_p10  ;;  %p2700_p4 = por %p2699_p1, %p2698_p0 }
  0x51   : > { %p2701_p9 = pnand %p2700_p4, %p2694_p13 }
  0x53   : > { %2704 = shalt.err (!%p2701_p9)
}
  0x54   : > { %s2783_s30 = smov 4096   ;;  %s2784_s9 = smov 256  }
  0x55   : > { %2157 = dma.hbm_to_vmem [thread:$0]  (!%p2937_p11), %s2935_s17, 49152, %s2941_s20, %s2943_s26, %s2783_s30, %s2783_s30, %s2784_s9  }
  0x56   : > { %p4737_p2 = scmp.ne.s32.totalorder %s4732_s29, 0 }
  0x57   : > { %s2967_s14 = sand.u32 (!%p4737_p2), 1, %s2769_s22   ;;  %p4738_p9 = scmp.ne.s32.totalorder (!%p4737_p2), %s4730_s27, 0 }
  0x58   : > { %261 = sbr.rel (%p4737_p2) target bundleno = 1094 (0x446), region = 44  ;;  %s264_s16 = scalar_lea.sflag (!%p4737_p2), [#allocation3], %s2967_s14 }
  0x59   : > { %s2126_s15 = smul.u32 (!%p4737_p2), 3072, %s2967_s14 }
  0x5b   : > { %s2973_s13 = scalar_lea.vmem (!%p4737_p2), [#allocation2], %s2126_s15 }
  0x5d   : > { %2748 = dma.done.wait (%p4738_p9), %s264_s16, 49152  }
  0x5e   : > { %2750 = vsyncadd (%p4738_p9), %s264_s16, 4294918144  ;;  %p4739_p11 = scmp.eq.s32.totalorder %s2845_s25, 0 }
  0x60   : > { %2752 = dma.done.wait (%p4739_p11), [#allocation6], 64   ;;  %p4740_p6 = pmov %p4739_p11 }
  0x62   : > { %2754 = vsyncadd (%p4740_p6), [#allocation6], 4294967232  ;;  %p4741_p8 = pmov %p4740_p6 }
  0x63   : > { %p4742_p3 = pmov %p4740_p6 }
  0x64   : > { %2756 = dma.done.wait (%p4741_p8), [#allocation9], 16  }
  0x65   : > { %2758 = vsyncadd (%p4742_p3), [#allocation9], 4294967280  ;;  %v308_v0 = vld [vmem:[%s2973_s13] sm:$0xff]  ;;  %v309_v1 = vld [vmem:[%s2973_s13 + $0x8] sm:$0xff]  ;;  %vm1112_vm0 = vcmask 31744   ;;  %vm1145_vm1 = vcmask 25600  }
  0x66   : > { %v310_v2 = vld [vmem:[%s2973_s13 + $0x10] sm:$0xff]  ;;  %v692_v3 = vadd.f32 %v309_v1, %v308_v0  ;;  %v311_v4 = vld [vmem:[%s2973_s13 + $0x18] sm:$0xff]  ;;  %v312_v6 = vld [vmem:[%s2973_s13 + $0x20] sm:$0xff]  ;;  %s3513_s17 = scalar_lea.vmem [#allocation10], %s2126_s15  ;;  %s2127_s15 = smul.u32 49152, %s2845_s25 }
  0x67   : > { %v313_v8 = vld [vmem:[%s2973_s13 + $0x28] sm:$0xff]  ;;  %v314_v10 = vld [vmem:[%s2973_s13 + $0x30] sm:$0xff]  ;;  %v315_v12 = vld [vmem:[%s2973_s13 + $0x38] sm:$0xff]  ;;  %s2008_s18 = sshll.u32 %s3513_s17, 4  ;;  %s1995_s25 = scalar_lea.sflag [#allocation4], %s2967_s14  ;;  %s4656_s18 = int_to_ptr.vmem [resolvable:$true] %s2008_s18 }
  0x68   : > { %v693_v5 = vadd.f32 %v692_v3, %v310_v2  ;;  %v372_v13 = vld [vmem:[%s2973_s13 + $0x200] sm:$0xff]  ;;  %v373_v15 = vld [vmem:[%s2973_s13 + $0x208] sm:$0xff]  ;;  %v374_v16 = vld [vmem:[%s2973_s13 + $0x210] sm:$0xff]  ;;  %s4652_s12 = scalar_lea.hbm %s4725_s6, %s2127_s15  ;;  %s2705_s19 = scalar_lea.vmem %s4656_s18, 49152 }
  0x69   : > { %v316_v17 = vld [vmem:[%s2973_s13 + $0x40] sm:$0xff]  ;;  %v758_v18 = vadd.f32 %v373_v15, %v372_v13  ;;  %v375_v20 = vld [vmem:[%s2973_s13 + $0x218] sm:$0xff]  ;;  %v317_v21 = vld [vmem:[%s2973_s13 + $0x48] sm:$0xff]  ;;  %p2706_p12 = scmp.ne.s32.totalorder %s4656_s18, %s2705_s19  ;;  %p4743_p5 = scmp.ne.s32.totalorder %s4735_s11, 0 }
  0x6a   : > { %v694_v7 = vadd.f32 %v693_v5, %v311_v4  ;;  %v376_v24 = vld [vmem:[%s2973_s13 + $0x220] sm:$0xff]  ;;  %v318_v25 = vld [vmem:[%s2973_s13 + $0x50] sm:$0xff]  ;;  %v377_v28 = vld [vmem:[%s2973_s13 + $0x228] sm:$0xff] }
  0x6b   : > { %v759_v22 = vadd.f32 %v758_v18, %v374_v16  ;;  %v319_v29 = vld [vmem:[%s2973_s13 + $0x58] sm:$0xff]  ;;  %v378_v32 = vld [vmem:[%s2973_s13 + $0x230] sm:$0xff]  ;;  %v320_v33 = vld [vmem:[%s2973_s13 + $0x60] sm:$0xff]  ;;  %p2707_p7 = pnand %p2706_p12, %p4743_p5 }
  0x6c   : > { %v695_v9 = vadd.f32 %v694_v7, %v312_v6  ;;  %v379_v36 = vld [vmem:[%s2973_s13 + $0x238] sm:$0xff]  ;;  %v340_v37 = vld [vmem:[%s2973_s13 + $0x100] sm:$0xff]  ;;  %v341_v38 = vld [vmem:[%s2973_s13 + $0x108] sm:$0xff] }
  0x6d   : > { %v760_v26 = vadd.f32 %v759_v22, %v375_v20  ;;  %v321_v39 = vld [vmem:[%s2973_s13 + $0x68] sm:$0xff]  ;;  %v342_v41 = vld [vmem:[%s2973_s13 + $0x110] sm:$0xff]  ;;  %v725_v42 = vadd.f32 %v341_v38, %v340_v37  ;;  %v380_v44 = vld [vmem:[%s2973_s13 + $0x240] sm:$0xff]  ;;  %p2708_p10 = pneg %p2707_p7 }
  0x6e   : > { %v696_v11 = vadd.f32 %v695_v9, %v313_v8  ;;  %v343_v45 = vld [vmem:[%s2973_s13 + $0x118] sm:$0xff]  ;;  %v322_v46 = vld [vmem:[%s2973_s13 + $0x70] sm:$0xff]  ;;  %v381_v50 = vld [vmem:[%s2973_s13 + $0x248] sm:$0xff] }
  0x6f   : > { %v761_v30 = vadd.f32 %v760_v26, %v376_v24  ;;  %v726_v48 = vadd.f32 %v725_v42, %v342_v41  ;;  %v344_v51 = vld [vmem:[%s2973_s13 + $0x120] sm:$0xff]  ;;  %v323_v52 = vld [vmem:[%s2973_s13 + $0x78] sm:$0xff]  ;;  %v382_v56 = vld [vmem:[%s2973_s13 + $0x250] sm:$0xff] }
  0x70   : > { %v697_v14 = vadd.f32 %v696_v11, %v314_v10  ;;  %v345_v57 = vld [vmem:[%s2973_s13 + $0x128] sm:$0xff]  ;;  %v324_v58 = vld [vmem:[%s2973_s13 + $0x80] sm:$0xff]  ;;  %v383_v62 = vld [vmem:[%s2973_s13 + $0x258] sm:$0xff] }
  0x71   : > { %v762_v34 = vadd.f32 %v761_v30, %v377_v28  ;;  %v727_v54 = vadd.f32 %v726_v48, %v343_v45  ;;  %v346_v63 = vld [vmem:[%s2973_s13 + $0x130] sm:$0xff]  ;;  %v325_v0 = vld [vmem:[%s2973_s13 + $0x88] sm:$0xff]  ;;  %v384_v5 = vld [vmem:[%s2973_s13 + $0x260] sm:$0xff] }
  0x72   : > { %v698_v19 = vadd.f32 %v697_v14, %v315_v12  ;;  %v326_v3 = vld [vmem:[%s2973_s13 + $0x90] sm:$0xff]  ;;  %v347_v6 = vld [vmem:[%s2973_s13 + $0x138] sm:$0xff]  ;;  %v404_v9 = vld [vmem:[%s2973_s13 + $0x300] sm:$0xff] }
  0x73   : > { %v763_v40 = vadd.f32 %v762_v34, %v378_v32  ;;  %v728_v60 = vadd.f32 %v727_v54, %v344_v51  ;;  %v405_v10 = vld [vmem:[%s2973_s13 + $0x308] sm:$0xff]  ;;  %v406_v11 = vld [vmem:[%s2973_s13 + $0x310] sm:$0xff]  ;;  %v348_v14 = vld [vmem:[%s2973_s13 + $0x140] sm:$0xff] }
  0x74   : > { %v699_v23 = vadd.f32 %v698_v19, %v316_v17  ;;  %v385_v13 = vld [vmem:[%s2973_s13 + $0x268] sm:$0xff]  ;;  %v791_v15 = vadd.f32 %v405_v10, %v404_v9  ;;  %v327_v16 = vld [vmem:[%s2973_s13 + $0x98] sm:$0xff]  ;;  %v328_v24 = vld [vmem:[%s2973_s13 + $0xa0] sm:$0xff] }
  0x75   : > { %v764_v47 = vadd.f32 %v763_v40, %v379_v36  ;;  %v729_v2 = vadd.f32 %v728_v60, %v345_v57  ;;  %v407_v19 = vld [vmem:[%s2973_s13 + $0x318] sm:$0xff]  ;;  %v349_v22 = vld [vmem:[%s2973_s13 + $0x148] sm:$0xff]  ;;  %v350_v30 = vld [vmem:[%s2973_s13 + $0x150] sm:$0xff] }
  0x76   : > { %v700_v27 = vadd.f32 %v699_v23, %v317_v21  ;;  %v386_v21 = vld [vmem:[%s2973_s13 + $0x270] sm:$0xff]  ;;  %v792_v23 = vadd.f32 %v791_v15, %v406_v11  ;;  %v329_v32 = vld [vmem:[%s2973_s13 + $0xa8] sm:$0xff]  ;;  %v388_v37 = vld [vmem:[%s2973_s13 + $0x280] sm:$0xff] }
  0x77   : > { %v765_v53 = vadd.f32 %v764_v47, %v380_v44  ;;  %v730_v8 = vadd.f32 %v729_v2, %v346_v63  ;;  %v351_v38 = vld [vmem:[%s2973_s13 + $0x158] sm:$0xff]  ;;  %v330_v40 = vld [vmem:[%s2973_s13 + $0xb0] sm:$0xff]  ;;  %v352_v47 = vld [vmem:[%s2973_s13 + $0x160] sm:$0xff] }
  0x78   : > { %v701_v31 = vadd.f32 %v700_v27, %v318_v25  ;;  %v408_v27 = vld [vmem:[%s2973_s13 + $0x320] sm:$0xff]  ;;  %v331_v44 = vld [vmem:[%s2973_s13 + $0xb8] sm:$0xff]  ;;  %v437_v57 = vld [vmem:[%s2973_s13 + $0x408] sm:$0xff] }
  0x79   : > { %v766_v59 = vadd.f32 %v765_v53, %v381_v50  ;;  %v731_v18 = vadd.f32 %v730_v8, %v347_v6  ;;  %v436_v53 = vld [vmem:[%s2973_s13 + $0x400] sm:$0xff]  ;;  %v354_v2 = vld [vmem:[%s2973_s13 + $0x170] sm:$0xff]  ;;  %v413_v8 = vld [vmem:[%s2973_s13 + $0x348] sm:$0xff] }
  0x7a   : > { %v702_v35 = vadd.f32 %v701_v31, %v319_v29  ;;  %v387_v29 = vld [vmem:[%s2973_s13 + $0x278] sm:$0xff]  ;;  %v793_v31 = vadd.f32 %v792_v23, %v407_v19  ;;  %v824_v63 = vadd.f32 %v437_v57, %v436_v53  ;;  %v392_v11 = vld [vmem:[%s2973_s13 + $0x2a0] sm:$0xff]  ;;  %v334_v15 = vld [vmem:[%s2973_s13 + $0xd0] sm:$0xff] }
  0x7b   : > { %v767_v1 = vadd.f32 %v766_v59, %v382_v56  ;;  %v732_v26 = vadd.f32 %v731_v18, %v348_v14  ;;  %v332_v59 = vld [vmem:[%s2973_s13 + $0xc0] sm:$0xff]  ;;  %v414_v18 = vld [vmem:[%s2973_s13 + $0x350] sm:$0xff] }
  0x7c   : > { %v703_v43 = vadd.f32 %v702_v35, %v320_v33  ;;  %v409_v35 = vld [vmem:[%s2973_s13 + $0x328] sm:$0xff]  ;;  %v440_v14 = vld [vmem:[%s2973_s13 + $0x420] sm:$0xff]  ;;  %v470_v53 = vld [vmem:[%s2973_s13 + $0x510] sm:$0xff] }
  0x7d   : > { %v768_v7 = vadd.f32 %v767_v1, %v383_v62  ;;  %v733_v34 = vadd.f32 %v732_v26, %v349_v22  ;;  %v412_v62 = vld [vmem:[%s2973_s13 + $0x340] sm:$0xff]  ;;  %v391_v1 = vld [vmem:[%s2973_s13 + $0x298] sm:$0xff] }
  0x7e   : > { %v704_v49 = vadd.f32 %v703_v43, %v321_v39  ;;  %v794_v39 = vadd.f32 %v793_v31, %v408_v27  ;;  %v410_v43 = vld [vmem:[%s2973_s13 + $0x330] sm:$0xff]  ;;  %v356_v22 = vld [vmem:[%s2973_s13 + $0x180] sm:$0xff] }
  0x7f   : > { %v769_v17 = vadd.f32 %v768_v7, %v384_v5  ;;  %v734_v42 = vadd.f32 %v733_v34, %v350_v30  ;;  %v333_v5 = vld [vmem:[%s2973_s13 + $0xc8] sm:$0xff]  ;;  %v336_v26 = vld [vmem:[%s2973_s13 + $0xe0] sm:$0xff] }
  0x80   : > { %v705_v55 = vadd.f32 %v704_v49, %v322_v46  ;;  %v389_v46 = vld [vmem:[%s2973_s13 + $0x288] sm:$0xff]  ;;  %v795_v48 = vadd.f32 %v794_v39, %v409_v35  ;;  %v390_v49 = vld [vmem:[%s2973_s13 + $0x290] sm:$0xff] }
  0x81   : > { %v770_v25 = vadd.f32 %v769_v17, %v385_v13  ;;  %v735_v51 = vadd.f32 %v734_v42, %v351_v38  ;;  %v442_v35 = vld [vmem:[%s2973_s13 + $0x430] sm:$0xff] }
  0x82   : > { %v706_v61 = vadd.f32 %v705_v55, %v323_v52  ;;  %v411_v52 = vld [vmem:[%s2973_s13 + $0x338] sm:$0xff]  ;;  %v353_v55 = vld [vmem:[%s2973_s13 + $0x168] sm:$0xff]  ;;  %v796_v56 = vadd.f32 %v795_v48, %v410_v43  ;;  %v358_v39 = vld [vmem:[%s2973_s13 + $0x190] sm:$0xff] }
  0x83   : > { %v771_v33 = vadd.f32 %v770_v25, %v386_v21  ;;  %v393_v21 = vld [vmem:[%s2973_s13 + $0x2a8] sm:$0xff]  ;;  %v335_v25 = vld [vmem:[%s2973_s13 + $0xd8] sm:$0xff]  ;;  %v396_v48 = vld [vmem:[%s2973_s13 + $0x2c0] sm:$0xff] }
  0x84   : > { %v707_v4 = vadd.f32 %v706_v61, %v324_v58  ;;  %v438_v58 = vld [vmem:[%s2973_s13 + $0x410] sm:$0xff]  ;;  %v736_v61 = vadd.f32 %v735_v51, %v352_v47  ;;  %v469_v47 = vld [vmem:[%s2973_s13 + $0x508] sm:$0xff] }
  0x85   : > { %v772_v41 = vadd.f32 %v771_v33, %v387_v29  ;;  %v825_v9 = vadd.f32 %v824_v63, %v438_v58  ;;  %v415_v29 = vld [vmem:[%s2973_s13 + $0x358] sm:$0xff]  ;;  %v357_v33 = vld [vmem:[%s2973_s13 + $0x188] sm:$0xff]  ;;  %v444_v58 = vld [vmem:[%s2973_s13 + $0x440] sm:$0xff] }
  0x86   : > { %v708_v12 = vadd.f32 %v707_v4, %v325_v0  ;;  %v439_v4 = vld [vmem:[%s2973_s13 + $0x418] sm:$0xff]  ;;  %v737_v7 = vadd.f32 %v736_v61, %v353_v55  ;;  %v417_v51 = vld [vmem:[%s2973_s13 + $0x368] sm:$0xff] }
  0x87   : > { %v773_v50 = vadd.f32 %v772_v41, %v388_v37  ;;  %v826_v19 = vadd.f32 %v825_v9, %v439_v4  ;;  %v395_v37 = vld [vmem:[%s2973_s13 + $0x2b8] sm:$0xff]  ;;  %v416_v41 = vld [vmem:[%s2973_s13 + $0x360] sm:$0xff]  ;;  %v397_v61 = vld [vmem:[%s2973_s13 + $0x2c8] sm:$0xff] }
  0x88   : > { %v709_v20 = vadd.f32 %v708_v12, %v326_v3  ;;  %v797_v3 = vadd.f32 %v796_v56, %v411_v52  ;;  %v355_v12 = vld [vmem:[%s2973_s13 + $0x178] sm:$0xff]  ;;  %v738_v17 = vadd.f32 %v737_v7, %v354_v2  ;;  %v360_v4 = vld [vmem:[%s2973_s13 + $0x1a0] sm:$0xff]  ;;  %v398_v9 = vld [vmem:[%s2973_s13 + $0x2d0] sm:$0xff] }
  0x89   : > { %v774_v60 = vadd.f32 %v773_v50, %v389_v46  ;;  %v827_v30 = vadd.f32 %v826_v19, %v440_v14  ;;  %v468_v46 = vld [vmem:[%s2973_s13 + $0x500] sm:$0xff]  ;;  %v359_v56 = vld [vmem:[%s2973_s13 + $0x198] sm:$0xff]  ;;  %v473_v19 = vld [vmem:[%s2973_s13 + $0x528] sm:$0xff] }
  0x8a   : > { %v710_v28 = vadd.f32 %v709_v20, %v327_v16  ;;  %v798_v13 = vadd.f32 %v797_v3, %v412_v62  ;;  %v472_v7 = vld [vmem:[%s2973_s13 + $0x520] sm:$0xff] }
  0x8b   : > { %v775_v6 = vadd.f32 %v774_v60, %v390_v49  ;;  %v338_v60 = vld [vmem:[%s2973_s13 + $0xf0] sm:$0xff] }
  0x8c   : > { %v711_v36 = vadd.f32 %v710_v28, %v328_v24  ;;  %v799_v23 = vadd.f32 %v798_v13, %v413_v8  ;;  %v441_v24 = vld [vmem:[%s2973_s13 + $0x428] sm:$0xff]  ;;  %v739_v28 = vadd.f32 %v738_v17, %v355_v12  ;;  %v339_v8 = vld [vmem:[%s2973_s13 + $0xf8] sm:$0xff] }
  0x8d   : > { %v776_v16 = vadd.f32 %v775_v6, %v391_v1  ;;  %v828_v42 = vadd.f32 %v827_v30, %v441_v24  ;;  %v445_v6 = vld [vmem:[%s2973_s13 + $0x448] sm:$0xff]  ;;  %v419_v12 = vld [vmem:[%s2973_s13 + $0x378] sm:$0xff]  ;;  %v474_v30 = vld [vmem:[%s2973_s13 + $0x530] sm:$0xff] }
  0x8e   : > { %v712_v45 = vadd.f32 %v711_v36, %v329_v32  ;;  %v394_v32 = vld [vmem:[%s2973_s13 + $0x2b0] sm:$0xff]  ;;  %v800_v34 = vadd.f32 %v799_v23, %v414_v18  ;;  %v337_v36 = vld [vmem:[%s2973_s13 + $0xe8] sm:$0xff]  ;;  %v420_v23 = vld [vmem:[%s2973_s13 + $0x380] sm:$0xff] }
  0x8f   : > { %v777_v27 = vadd.f32 %v776_v16, %v392_v11  ;;  %v829_v52 = vadd.f32 %v828_v42, %v442_v35  ;;  %v361_v16 = vld [vmem:[%s2973_s13 + $0x1a8] sm:$0xff]  ;;  %v446_v18 = vld [vmem:[%s2973_s13 + $0x450] sm:$0xff]  ;;  %v475_v42 = vld [vmem:[%s2973_s13 + $0x538] sm:$0xff] }
  0x90   : > { %v713_v54 = vadd.f32 %v712_v45, %v330_v40  ;;  %v740_v40 = vadd.f32 %v739_v28, %v356_v22  ;;  %v443_v45 = vld [vmem:[%s2973_s13 + $0x438] sm:$0xff]  ;;  %v421_v35 = vld [vmem:[%s2973_s13 + $0x388] sm:$0xff] }
  0x91   : > { %v778_v38 = vadd.f32 %v777_v27, %v393_v21  ;;  %v830_v1 = vadd.f32 %v829_v52, %v443_v45  ;;  %v362_v27 = vld [vmem:[%s2973_s13 + $0x1b0] sm:$0xff]  ;;  %v449_v52 = vld [vmem:[%s2973_s13 + $0x468] sm:$0xff] }
  0x92   : > { %v714_v0 = vadd.f32 %v713_v54, %v331_v44  ;;  %v801_v44 = vadd.f32 %v800_v34, %v415_v29  ;;  %v741_v50 = vadd.f32 %v740_v40, %v357_v33  ;;  %v857_v54 = vadd.f32 %v469_v47, %v468_v46  ;;  %v447_v29 = vld [vmem:[%s2973_s13 + $0x458] sm:$0xff]  ;;  %v500_v47 = vld [vmem:[%s2973_s13 + $0x600] sm:$0xff] }
  0x93   : > { %v779_v49 = vadd.f32 %v778_v38, %v394_v32  ;;  %v831_v13 = vadd.f32 %v830_v1, %v444_v58  ;;  %v363_v33 = vld [vmem:[%s2973_s13 + $0x1b8] sm:$0xff]  ;;  %v401_v38 = vld [vmem:[%s2973_s13 + $0x2e8] sm:$0xff] }
  0x94   : > { %v715_v10 = vadd.f32 %v714_v0, %v332_v59  ;;  %v802_v57 = vadd.f32 %v801_v44, %v416_v41  ;;  %v471_v59 = vld [vmem:[%s2973_s13 + $0x518] sm:$0xff]  ;;  %v742_v63 = vadd.f32 %v741_v50, %v358_v39  ;;  %v418_v0 = vld [vmem:[%s2973_s13 + $0x370] sm:$0xff]  ;;  %v858_v2 = vadd.f32 %v857_v54, %v470_v53  ;;  %v448_v41 = vld [vmem:[%s2973_s13 + $0x460] sm:$0xff] }
  0x95   : > { %v780_v62 = vadd.f32 %v779_v49, %v395_v37  ;;  %v832_v24 = vadd.f32 %v831_v13, %v445_v6  ;;  %v422_v39 = vld [vmem:[%s2973_s13 + $0x390] sm:$0xff]  ;;  %v364_v50 = vld [vmem:[%s2973_s13 + $0x1c0] sm:$0xff]  ;;  %v423_v58 = vld [vmem:[%s2973_s13 + $0x398] sm:$0xff] }
  0x96   : > { %v716_v20 = vadd.f32 %v715_v10, %v333_v5  ;;  %v803_v5 = vadd.f32 %v802_v57, %v417_v51  ;;  %v743_v11 = vadd.f32 %v742_v63, %v359_v56  ;;  %v859_v14 = vadd.f32 %v858_v2, %v471_v59  ;;  %v502_v49 = vld [vmem:[%s2973_s13 + $0x610] sm:$0xff]  ;;  %v476_v53 = vld [vmem:[%s2973_s13 + $0x540] sm:$0xff]  ;;  %v477_v1 = vld [vmem:[%s2973_s13 + $0x548] sm:$0xff] }
  0x97   : > { %v781_v10 = vadd.f32 %v780_v62, %v396_v48  ;;  %v501_v48 = vld [vmem:[%s2973_s13 + $0x608] sm:$0xff]  ;;  %v424_v6 = vld [vmem:[%s2973_s13 + $0x3a0] sm:$0xff]  ;;  %v478_v13 = vld [vmem:[%s2973_s13 + $0x550] sm:$0xff] }
  0x98   : > { %v717_v31 = vadd.f32 %v716_v20, %v334_v15  ;;  %v804_v17 = vadd.f32 %v803_v5, %v418_v0  ;;  %v399_v20 = vld [vmem:[%s2973_s13 + $0x2d8] sm:$0xff]  ;;  %v744_v22 = vadd.f32 %v743_v11, %v360_v4  ;;  %v890_v54 = vadd.f32 %v501_v48, %v500_v47  ;;  %v365_v62 = vld [vmem:[%s2973_s13 + $0x1c8] sm:$0xff]  ;;  %v450_v0 = vld [vmem:[%s2973_s13 + $0x470] sm:$0xff] }
  0x99   : > { %v782_v21 = vadd.f32 %v781_v10, %v397_v61  ;;  %v503_v61 = vld [vmem:[%s2973_s13 + $0x618] sm:$0xff]  ;;  %v366_v10 = vld [vmem:[%s2973_s13 + $0x1d0] sm:$0xff]  ;;  %v533_v48 = vld [vmem:[%s2973_s13 + $0x708] sm:$0xff] }
  0x9a   : > { %v718_v43 = vadd.f32 %v717_v31, %v335_v25  ;;  %v860_v25 = vadd.f32 %v859_v14, %v472_v7  ;;  %v805_v28 = vadd.f32 %v804_v17, %v419_v12  ;;  %v400_v31 = vld [vmem:[%s2973_s13 + $0x2e0] sm:$0xff]  ;;  %v745_v34 = vadd.f32 %v744_v22, %v361_v16  ;;  %v451_v12 = vld [vmem:[%s2973_s13 + $0x478] sm:$0xff]  ;;  %v425_v17 = vld [vmem:[%s2973_s13 + $0x3a8] sm:$0xff] }
  0x9b   : > { %v783_v32 = vadd.f32 %v782_v21, %v398_v9  ;;  %v891_v2 = vadd.f32 %v890_v54, %v502_v49  ;;  %v504_v9 = vld [vmem:[%s2973_s13 + $0x620] sm:$0xff]  ;;  %v367_v21 = vld [vmem:[%s2973_s13 + $0x1d8] sm:$0xff]  ;;  %v534_v49 = vld [vmem:[%s2973_s13 + $0x710] sm:$0xff] }
  0x9c   : > { %v719_v55 = vadd.f32 %v718_v43, %v336_v26  ;;  %v861_v37 = vadd.f32 %v860_v25, %v473_v19  ;;  %v806_v40 = vadd.f32 %v805_v28, %v420_v23  ;;  %v746_v44 = vadd.f32 %v745_v34, %v362_v27  ;;  %v452_v23 = vld [vmem:[%s2973_s13 + $0x480] sm:$0xff]  ;;  %v427_v34 = vld [vmem:[%s2973_s13 + $0x3b8] sm:$0xff] }
  0x9d   : > { %v784_v43 = vadd.f32 %v783_v32, %v399_v20  ;;  %v892_v14 = vadd.f32 %v891_v2, %v503_v61  ;;  %v505_v20 = vld [vmem:[%s2973_s13 + $0x628] sm:$0xff]  ;;  %v368_v27 = vld [vmem:[%s2973_s13 + $0x1e0] sm:$0xff]  ;;  %v506_v32 = vld [vmem:[%s2973_s13 + $0x630] sm:$0xff] }
  0x9e   : > { %v720_v3 = vadd.f32 %v719_v55, %v337_v36  ;;  %v833_v36 = vadd.f32 %v832_v24, %v446_v18  ;;  %v862_v46 = vadd.f32 %v861_v37, %v474_v30  ;;  %v807_v51 = vadd.f32 %v806_v40, %v421_v35  ;;  %v402_v55 = vld [vmem:[%s2973_s13 + $0x2f0] sm:$0xff]  ;;  %v479_v24 = vld [vmem:[%s2973_s13 + $0x558] sm:$0xff]  ;;  %v480_v37 = vld [vmem:[%s2973_s13 + $0x560] sm:$0xff] }
  0x9f   : > { %v785_v56 = vadd.f32 %v784_v43, %v400_v31  ;;  %v747_v57 = vadd.f32 %v746_v44, %v363_v33  ;;  %v893_v25 = vadd.f32 %v892_v14, %v504_v9  ;;  %v369_v33 = vld [vmem:[%s2973_s13 + $0x1e8] sm:$0xff]  ;;  %v454_v40 = vld [vmem:[%s2973_s13 + $0x490] sm:$0xff]  ;;  %v507_v43 = vld [vmem:[%s2973_s13 + $0x638] sm:$0xff] }
  0xa0   : > { %v721_v15 = vadd.f32 %v720_v3, %v338_v60  ;;  %v834_v45 = vadd.f32 %v833_v36, %v447_v29  ;;  %v863_v60 = vadd.f32 %v862_v46, %v475_v42  ;;  %v808_v63 = vadd.f32 %v807_v51, %v422_v39  ;;  %v403_v3 = vld [vmem:[%s2973_s13 + $0x2f8] sm:$0xff]  ;;  %v426_v29 = vld [vmem:[%s2973_s13 + $0x3b0] sm:$0xff]  ;;  %v453_v36 = vld [vmem:[%s2973_s13 + $0x488] sm:$0xff] }
  0xa1   : > { %v786_v4 = vadd.f32 %v785_v56, %v401_v38  ;;  %v748_v5 = vadd.f32 %v747_v57, %v364_v50  ;;  %v894_v38 = vadd.f32 %v893_v25, %v505_v20  ;;  %v532_v44 = vld [vmem:[%s2973_s13 + $0x700] sm:$0xff]  ;;  %v481_v46 = vld [vmem:[%s2973_s13 + $0x568] sm:$0xff]  ;;  %v370_v50 = vld [vmem:[%s2973_s13 + $0x1f0] sm:$0xff] }
  0xa2   : > { %v722_v26 = vadd.f32 %v721_v15, %v339_v8  ;;  %v835_v59 = vadd.f32 %v834_v45, %v448_v41  ;;  %v864_v8 = vadd.f32 %v863_v60, %v476_v53  ;;  %v809_v11 = vadd.f32 %v808_v63, %v423_v58  ;;  %v455_v58 = vld [vmem:[%s2973_s13 + $0x498] sm:$0xff]  ;;  %v536_v9 = vld [vmem:[%s2973_s13 + $0x720] sm:$0xff]  ;;  %v510_v14 = vld [vmem:[%s2973_s13 + $0x650] sm:$0xff] }
  0xa3   : > { %v787_v15 = vadd.f32 %v786_v4, %v402_v55  ;;  %v749_v16 = vadd.f32 %v748_v5, %v365_v62  ;;  %v895_v47 = vadd.f32 %v894_v38, %v506_v32  ;;  %v508_v55 = vld [vmem:[%s2973_s13 + $0x640] sm:$0xff]  ;;  %v923_v56 = vadd.f32 %v533_v48, %v532_v44  ;;  %v535_v61 = vld [vmem:[%s2973_s13 + $0x718] sm:$0xff]  ;;  %v537_v20 = vld [vmem:[%s2973_s13 + $0x728] sm:$0xff] }
  0xa4   : > { %723 = vadd.xlane.f32.xlu0 %v722_v26  ;;  %v836_v7 = vadd.f32 %v835_v59, %v449_v52  ;;  %v865_v19 = vadd.f32 %v864_v8, %v477_v1  ;;  %v810_v22 = vadd.f32 %v809_v11, %v424_v6  ;;  %v428_v52 = vld [vmem:[%s2973_s13 + $0x3c0] sm:$0xff]  ;;  %v482_v59 = vld [vmem:[%s2973_s13 + $0x570] sm:$0xff]  ;;  %v371_v62 = vld [vmem:[%s2973_s13 + $0x1f8] sm:$0xff] }
  0xa5   : > { %v788_v26 = vadd.f32 %v787_v15, %v403_v3  ;;  %v750_v28 = vadd.f32 %v749_v16, %v366_v10  ;;  %v896_v60 = vadd.f32 %v895_v47, %v507_v43  ;;  %v509_v3 = vld [vmem:[%s2973_s13 + $0x648] sm:$0xff]  ;;  %v924_v4 = vadd.f32 %v923_v56, %v534_v49  ;;  %v456_v6 = vld [vmem:[%s2973_s13 + $0x4a0] sm:$0xff]  ;;  %v430_v11 = vld [vmem:[%s2973_s13 + $0x3d0] sm:$0xff] }
  0xa6   : > { %v837_v18 = vadd.f32 %v836_v7, %v450_v0  ;;  %v866_v31 = vadd.f32 %v865_v19, %v478_v13  ;;  %v811_v35 = vadd.f32 %v810_v22, %v425_v17  ;;  %v429_v0 = vld [vmem:[%s2973_s13 + $0x3c8] sm:$0xff]  ;;  %v483_v7 = vld [vmem:[%s2973_s13 + $0x578] sm:$0xff]  ;;  %v538_v32 = vld [vmem:[%s2973_s13 + $0x730] sm:$0xff] }
  0xa7   : > { %789 = vadd.xlane.f32.xlu1 %v788_v26  ;;  %v751_v39 = vadd.f32 %v750_v28, %v367_v21  ;;  %v897_v8 = vadd.f32 %v896_v60, %v508_v55  ;;  %v925_v15 = vadd.f32 %v924_v4, %v535_v61  ;;  %v457_v17 = vld [vmem:[%s2973_s13 + $0x4a8] sm:$0xff]  ;;  %v431_v22 = vld [vmem:[%s2973_s13 + $0x3d8] sm:$0xff]  ;;  %v512_v38 = vld [vmem:[%s2973_s13 + $0x660] sm:$0xff] }
  0xa8   : > { %v838_v30 = vadd.f32 %v837_v18, %v451_v12  ;;  %v867_v42 = vadd.f32 %v866_v31, %v479_v24  ;;  %v812_v45 = vadd.f32 %v811_v35, %v426_v29  ;;  %v484_v18 = vld [vmem:[%s2973_s13 + $0x580] sm:$0xff]  ;;  %v511_v26 = vld [vmem:[%s2973_s13 + $0x658] sm:$0xff]  ;;  %v458_v29 = vld [vmem:[%s2973_s13 + $0x4b0] sm:$0xff] }
  0xa9   : > { %v752_v51 = vadd.f32 %v751_v39, %v368_v27  ;;  %v898_v19 = vadd.f32 %v897_v8, %v509_v3  ;;  %v926_v27 = vadd.f32 %v925_v15, %v536_v9  ;;  %v564_v43 = vld [vmem:[%s2973_s13 + $0x800] sm:$0xff]  ;;  %v565_v44 = vld [vmem:[%s2973_s13 + $0x808] sm:$0xff]  ;;  %v567_v56 = vld [vmem:[%s2973_s13 + $0x818] sm:$0xff] }
  0xaa   : > { %v839_v41 = vadd.f32 %v838_v30, %v452_v23  ;;  %v868_v54 = vadd.f32 %v867_v42, %v480_v37  ;;  %v813_v57 = vadd.f32 %v812_v45, %v427_v34  ;;  %v432_v23 = vld [vmem:[%s2973_s13 + $0x3e0] sm:$0xff]  ;;  %v485_v30 = vld [vmem:[%s2973_s13 + $0x588] sm:$0xff]  ;;  %v459_v34 = vld [vmem:[%s2973_s13 + $0x4b8] sm:$0xff] }
  0xab   : > { %v753_v63 = vadd.f32 %v752_v51, %v369_v33  ;;  %v899_v31 = vadd.f32 %v898_v19, %v510_v14  ;;  %v433_v33 = vld [vmem:[%s2973_s13 + $0x3e8] sm:$0xff]  ;;  %v927_v39 = vadd.f32 %v926_v27, %v537_v20  ;;  %v539_v42 = vld [vmem:[%s2973_s13 + $0x738] sm:$0xff]  ;;  %v460_v45 = vld [vmem:[%s2973_s13 + $0x4c0] sm:$0xff]  ;;  %v956_v51 = vadd.f32 %v565_v44, %v564_v43 }
  0xac   : > { %v840_v53 = vadd.f32 %v839_v41, %v453_v36  ;;  %v869_v2 = vadd.f32 %v868_v54, %v481_v46  ;;  %v814_v5 = vadd.f32 %v813_v57, %v428_v52  ;;  %v486_v36 = vld [vmem:[%s2973_s13 + $0x590] sm:$0xff]  ;;  %v513_v48 = vld [vmem:[%s2973_s13 + $0x668] sm:$0xff]  ;;  %v540_v55 = vld [vmem:[%s2973_s13 + $0x740] sm:$0xff] }
  0xad   : > { %v754_v10 = vadd.f32 %v753_v63, %v370_v50  ;;  %v900_v41 = vadd.f32 %v899_v31, %v511_v26  ;;  %v928_v49 = vadd.f32 %v927_v39, %v538_v32  ;;  %v566_v50 = vld [vmem:[%s2973_s13 + $0x810] sm:$0xff]  ;;  %v541_v3 = vld [vmem:[%s2973_s13 + $0x748] sm:$0xff]  ;;  %v568_v4 = vld [vmem:[%s2973_s13 + $0x820] sm:$0xff] }
  0xae   : > { %v841_v1 = vadd.f32 %v840_v53, %v454_v40  ;;  %v870_v13 = vadd.f32 %v869_v2, %v482_v59  ;;  %v815_v16 = vadd.f32 %v814_v5, %v429_v0  ;;  %v487_v53 = vld [vmem:[%s2973_s13 + $0x598] sm:$0xff]  ;;  %v434_v57 = vld [vmem:[%s2973_s13 + $0x3f0] sm:$0xff]  ;;  %v957_v63 = vadd.f32 %v956_v51, %v566_v50  ;;  %v516_v20 = vld [vmem:[%s2973_s13 + $0x680] sm:$0xff] }
  0xaf   : > { %v755_v21 = vadd.f32 %v754_v10, %v371_v62  ;;  %v901_v54 = vadd.f32 %v900_v41, %v512_v38  ;;  %v514_v61 = vld [vmem:[%s2973_s13 + $0x670] sm:$0xff]  ;;  %v929_v62 = vadd.f32 %v928_v49, %v539_v42  ;;  %v435_v5 = vld [vmem:[%s2973_s13 + $0x3f8] sm:$0xff]  ;;  %v517_v32 = vld [vmem:[%s2973_s13 + $0x688] sm:$0xff] }
  0xb0   : > { %v842_v12 = vadd.f32 %v841_v1, %v455_v58  ;;  %v871_v25 = vadd.f32 %v870_v13, %v483_v7  ;;  %v816_v28 = vadd.f32 %v815_v16, %v430_v11  ;;  %v461_v58 = vld [vmem:[%s2973_s13 + $0x4c8] sm:$0xff]  ;;  %v488_v1 = vld [vmem:[%s2973_s13 + $0x5a0] sm:$0xff]  ;;  %v515_v9 = vld [vmem:[%s2973_s13 + $0x678] sm:$0xff]  ;;  %v958_v11 = vadd.f32 %v957_v63, %v567_v56 }
  0xb1   : > { %756 = vadd.xlane.f32.xlu0 %v755_v21  ;;  %v902_v2 = vadd.f32 %v901_v54, %v513_v48  ;;  %v930_v10 = vadd.f32 %v929_v62, %v540_v55  ;;  %v489_v13 = vld [vmem:[%s2973_s13 + $0x5a8] sm:$0xff]  ;;  %v542_v15 = vld [vmem:[%s2973_s13 + $0x750] sm:$0xff]  ;;  %v543_v26 = vld [vmem:[%s2973_s13 + $0x758] sm:$0xff] }
  0xb2   : > { %v843_v24 = vadd.f32 %v842_v12, %v456_v6  ;;  %v872_v37 = vadd.f32 %v871_v25, %v484_v18  ;;  %v817_v40 = vadd.f32 %v816_v28, %v431_v22  ;;  %v462_v6 = vld [vmem:[%s2973_s13 + $0x4d0] sm:$0xff]  ;;  %v569_v16 = vld [vmem:[%s2973_s13 + $0x828] sm:$0xff]  ;;  %v959_v22 = vadd.f32 %v958_v11, %v568_v4  ;;  %v464_v28 = vld [vmem:[%s2973_s13 + $0x4e0] sm:$0xff] }
  0xb3   : > { %v903_v14 = vadd.f32 %v902_v2, %v514_v61  ;;  %v931_v21 = vadd.f32 %v930_v10, %v541_v3  ;;  %v570_v27 = vld [vmem:[%s2973_s13 + $0x830] sm:$0xff]  ;;  %v544_v38 = vld [vmem:[%s2973_s13 + $0x760] sm:$0xff]  ;;  %v571_v39 = vld [vmem:[%s2973_s13 + $0x838] sm:$0xff] }
  0xb4   : > { %v844_v35 = vadd.f32 %v843_v24, %v457_v17  ;;  %v873_v47 = vadd.f32 %v872_v37, %v485_v30  ;;  %v818_v52 = vadd.f32 %v817_v40, %v432_v23  ;;  %v463_v17 = vld [vmem:[%s2973_s13 + $0x4d8] sm:$0xff]  ;;  %v490_v24 = vld [vmem:[%s2973_s13 + $0x5b0] sm:$0xff]  ;;  %v596_v44 = vld [vmem:[%s2973_s13 + $0x900] sm:$0xff] }
  0xb5   : > { %v904_v25 = vadd.f32 %v903_v14, %v515_v9  ;;  %v491_v30 = vld [vmem:[%s2973_s13 + $0x5b8] sm:$0xff]  ;;  %v545_v49 = vld [vmem:[%s2973_s13 + $0x768] sm:$0xff]  ;;  %v572_v50 = vld [vmem:[%s2973_s13 + $0x840] sm:$0xff] }
  0xb6   : > { %v845_v46 = vadd.f32 %v844_v35, %v458_v29  ;;  %v874_v60 = vadd.f32 %v873_v47, %v486_v36  ;;  %v819_v0 = vadd.f32 %v818_v52, %v433_v33  ;;  %v932_v33 = vadd.f32 %v931_v21, %v542_v15  ;;  %v465_v35 = vld [vmem:[%s2973_s13 + $0x4e8] sm:$0xff]  ;;  %v518_v36 = vld [vmem:[%s2973_s13 + $0x690] sm:$0xff]  ;;  %v492_v47 = vld [vmem:[%s2973_s13 + $0x5c0] sm:$0xff] }
  0xb7   : > { %v905_v37 = vadd.f32 %v904_v25, %v516_v20  ;;  %v466_v52 = vld [vmem:[%s2973_s13 + $0x4f0] sm:$0xff]  ;;  %v519_v55 = vld [vmem:[%s2973_s13 + $0x698] sm:$0xff]  ;;  %v573_v62 = vld [vmem:[%s2973_s13 + $0x848] sm:$0xff] }
  0xb8   : > { %v846_v59 = vadd.f32 %v845_v46, %v459_v34  ;;  %v875_v8 = vadd.f32 %v874_v60, %v487_v53  ;;  %v820_v12 = vadd.f32 %v819_v0, %v434_v57  ;;  %v960_v34 = vadd.f32 %v959_v22, %v569_v16  ;;  %v598_v46 = vld [vmem:[%s2973_s13 + $0x910] sm:$0xff]  ;;  %v3222_v0 = vld [vmem:[%s2973_s13 + $0x4f8] sm:$0xff]  ;;  %v520_v3 = vld [vmem:[%s2973_s13 + $0x6a0] sm:$0xff] }
  0xb9   : > { %v933_v42 = vadd.f32 %v932_v33, %v543_v26  ;;  %v906_v48 = vadd.f32 %v905_v37, %v517_v32  ;;  %v546_v61 = vld [vmem:[%s2973_s13 + $0x770] sm:$0xff]  ;;  %v547_v9 = vld [vmem:[%s2973_s13 + $0x778] sm:$0xff]  ;;  %v521_v14 = vld [vmem:[%s2973_s13 + $0x6a8] sm:$0xff] }
  0xba   : > { %v847_v7 = vadd.f32 %v846_v59, %v460_v45  ;;  %v876_v19 = vadd.f32 %v875_v8, %v488_v1  ;;  %v821_v23 = vadd.f32 %v820_v12, %v435_v5  ;;  %v961_v43 = vadd.f32 %v960_v34, %v570_v27  ;;  %v597_v45 = vld [vmem:[%s2973_s13 + $0x908] sm:$0xff]  ;;  %v574_v10 = vld [vmem:[%s2973_s13 + $0x850] sm:$0xff]  ;;  %v548_v20 = vld [vmem:[%s2973_s13 + $0x780] sm:$0xff] }
  0xbb   : > { %v989_v51 = vadd.f32 %v597_v45, %v596_v44  ;;  %v934_v56 = vadd.f32 %v933_v42, %v544_v38  ;;  %v493_v59 = vld [vmem:[%s2973_s13 + $0x5c8] sm:$0xff]  ;;  %v907_v60 = vadd.f32 %v906_v48, %v518_v36  ;;  %v575_v21 = vld [vmem:[%s2973_s13 + $0x858] sm:$0xff]  ;;  %v522_v26 = vld [vmem:[%s2973_s13 + $0x6b0] sm:$0xff] }
  0xbc   : > { %v848_v18 = vadd.f32 %v847_v7, %v461_v58  ;;  %v877_v31 = vadd.f32 %v876_v19, %v489_v13  ;;  %822 = vadd.xlane.f32.xlu1 %v821_v23  ;;  %v962_v57 = vadd.f32 %v961_v43, %v571_v39  ;;  %v599_v58 = vld [vmem:[%s2973_s13 + $0x918] sm:$0xff]  ;;  %v494_v7 = vld [vmem:[%s2973_s13 + $0x5d0] sm:$0xff]  ;;  %v549_v33 = vld [vmem:[%s2973_s13 + $0x788] sm:$0xff] }
  0xbd   : > { %v990_v63 = vadd.f32 %v989_v51, %v598_v46  ;;  %v935_v4 = vadd.f32 %v934_v56, %v545_v49  ;;  %v908_v8 = vadd.f32 %v907_v60, %v519_v55  ;;  %v576_v34 = vld [vmem:[%s2973_s13 + $0x860] sm:$0xff]  ;;  %v550_v37 = vld [vmem:[%s2973_s13 + $0x790] sm:$0xff]  ;;  %v577_v43 = vld [vmem:[%s2973_s13 + $0x868] sm:$0xff] }
  0xbe   : > { %v849_v29 = vadd.f32 %v848_v18, %v462_v6  ;;  %v878_v41 = vadd.f32 %v877_v31, %v490_v24  ;;  %v963_v5 = vadd.f32 %v962_v57, %v572_v50  ;;  %v600_v6 = vld [vmem:[%s2973_s13 + $0x920] sm:$0xff]  ;;  %v495_v18 = vld [vmem:[%s2973_s13 + $0x5d8] sm:$0xff]  ;;  %v629_v45 = vld [vmem:[%s2973_s13 + $0xa08] sm:$0xff] }
  0xbf   : > { %v991_v11 = vadd.f32 %v990_v63, %v599_v58  ;;  %v936_v15 = vadd.f32 %v935_v4, %v546_v61  ;;  %v909_v19 = vadd.f32 %v908_v8, %v520_v3  ;;  %v496_v24 = vld [vmem:[%s2973_s13 + $0x5e0] sm:$0xff]  ;;  %v523_v31 = vld [vmem:[%s2973_s13 + $0x6b8] sm:$0xff]  ;;  %v630_v46 = vld [vmem:[%s2973_s13 + $0xa10] sm:$0xff] }
  0xc0   : > { %v850_v40 = vadd.f32 %v849_v29, %v463_v17  ;;  %v879_v54 = vadd.f32 %v878_v41, %v491_v30  ;;  %v964_v16 = vadd.f32 %v963_v5, %v573_v62  ;;  %v601_v17 = vld [vmem:[%s2973_s13 + $0x928] sm:$0xff]  ;;  %v602_v29 = vld [vmem:[%s2973_s13 + $0x930] sm:$0xff]  ;;  %v628_v41 = vld [vmem:[%s2973_s13 + $0xa00] sm:$0xff] }
  0xc1   : > { %v992_v22 = vadd.f32 %v991_v11, %v600_v6  ;;  %v937_v27 = vadd.f32 %v936_v15, %v547_v9  ;;  %v497_v30 = vld [vmem:[%s2973_s13 + $0x5e8] sm:$0xff]  ;;  %v910_v32 = vadd.f32 %v909_v19, %v521_v14  ;;  %v524_v49 = vld [vmem:[%s2973_s13 + $0x6c0] sm:$0xff]  ;;  %v551_v55 = vld [vmem:[%s2973_s13 + $0x798] sm:$0xff] }
  0xc2   : > { %v851_v53 = vadd.f32 %v850_v40, %v464_v28  ;;  %v880_v2 = vadd.f32 %v879_v54, %v492_v47  ;;  %v965_v28 = vadd.f32 %v964_v16, %v574_v10  ;;  %v603_v40 = vld [vmem:[%s2973_s13 + $0x938] sm:$0xff]  ;;  %v498_v47 = vld [vmem:[%s2973_s13 + $0x5f0] sm:$0xff]  ;;  %v525_v61 = vld [vmem:[%s2973_s13 + $0x6c8] sm:$0xff] }
  0xc3   : > { %v938_v38 = vadd.f32 %v937_v27, %v548_v20  ;;  %v911_v42 = vadd.f32 %v910_v32, %v522_v26  ;;  %v578_v56 = vld [vmem:[%s2973_s13 + $0x870] sm:$0xff]  ;;  %v631_v58 = vld [vmem:[%s2973_s13 + $0xa18] sm:$0xff]  ;;  %v552_v4 = vld [vmem:[%s2973_s13 + $0x7a0] sm:$0xff] }
  0xc4   : > { %v852_v1 = vadd.f32 %v851_v53, %v465_v35  ;;  %v881_v13 = vadd.f32 %v880_v2, %v493_v59  ;;  %v993_v35 = vadd.f32 %v992_v22, %v601_v17  ;;  %v966_v39 = vadd.f32 %v965_v28, %v575_v21  ;;  %v499_v59 = vld [vmem:[%s2973_s13 + $0x5f8] sm:$0xff]  ;;  %v526_v9 = vld [vmem:[%s2973_s13 + $0x6d0] sm:$0xff]  ;;  %v553_v15 = vld [vmem:[%s2973_s13 + $0x7a8] sm:$0xff] }
  0xc5   : > { %v939_v50 = vadd.f32 %v938_v38, %v549_v33  ;;  %v1022_v53 = vadd.f32 %v629_v45, %v628_v41  ;;  %v912_v54 = vadd.f32 %v911_v42, %v523_v31  ;;  %v579_v5 = vld [vmem:[%s2973_s13 + $0x878] sm:$0xff]  ;;  %v580_v16 = vld [vmem:[%s2973_s13 + $0x880] sm:$0xff]  ;;  %v554_v27 = vld [vmem:[%s2973_s13 + $0x7b0] sm:$0xff] }
  0xc6   : > { %v853_v12 = vadd.f32 %v852_v1, %v466_v52  ;;  %v882_v25 = vadd.f32 %v881_v13, %v494_v7  ;;  %v994_v44 = vadd.f32 %v993_v35, %v602_v29  ;;  %v967_v51 = vadd.f32 %v966_v39, %v576_v34  ;;  %v604_v52 = vld [vmem:[%s2973_s13 + $0x940] sm:$0xff]  ;;  %v605_v1 = vld [vmem:[%s2973_s13 + $0x948] sm:$0xff]  ;;  %v527_v20 = vld [vmem:[%s2973_s13 + $0x6d8] sm:$0xff] }
  0xc7   : > { %v940_v62 = vadd.f32 %v939_v50, %v550_v37  ;;  %v1023_v2 = vadd.f32 %v1022_v53, %v630_v46  ;;  %v913_v3 = vadd.f32 %v912_v54, %v524_v49  ;;  %v632_v7 = vld [vmem:[%s2973_s13 + $0xa20] sm:$0xff]  ;;  %v581_v28 = vld [vmem:[%s2973_s13 + $0x888] sm:$0xff]  ;;  %v555_v32 = vld [vmem:[%s2973_s13 + $0x7b8] sm:$0xff] }
  0xc8   : > { %v854_v23 = vadd.f32 %v853_v12, %v3222_v0  ;;  %v883_v36 = vadd.f32 %v882_v25, %v495_v18  ;;  %v995_v57 = vadd.f32 %v994_v44, %v603_v40  ;;  %v968_v63 = vadd.f32 %v967_v51, %v577_v43  ;;  %v606_v12 = vld [vmem:[%s2973_s13 + $0x950] sm:$0xff]  ;;  %v633_v18 = vld [vmem:[%s2973_s13 + $0xa28] sm:$0xff]  ;;  %v528_v21 = vld [vmem:[%s2973_s13 + $0x6e0] sm:$0xff] }
  0xc9   : > { %v941_v10 = vadd.f32 %v940_v62, %v551_v55  ;;  %v1024_v13 = vadd.f32 %v1023_v2, %v631_v58  ;;  %v914_v14 = vadd.f32 %v913_v3, %v525_v61  ;;  %v529_v31 = vld [vmem:[%s2973_s13 + $0x6e8] sm:$0xff]  ;;  %v582_v34 = vld [vmem:[%s2973_s13 + $0x890] sm:$0xff]  ;;  %v635_v40 = vld [vmem:[%s2973_s13 + $0xa38] sm:$0xff] }
  0xca   : > { %855 = vadd.xlane.f32.xlu0 %v854_v23  ;;  %v884_v48 = vadd.f32 %v883_v36, %v496_v24  ;;  %v996_v6 = vadd.f32 %v995_v57, %v604_v52  ;;  %v969_v11 = vadd.f32 %v968_v63, %v578_v56  ;;  %v607_v24 = vld [vmem:[%s2973_s13 + $0x958] sm:$0xff]  ;;  %v608_v36 = vld [vmem:[%s2973_s13 + $0x960] sm:$0xff]  ;;  %v661_v42 = vld [vmem:[%s2973_s13 + $0xb08] sm:$0xff] }
  0xcb   : > { %v942_v22 = vadd.f32 %v941_v10, %v552_v4  ;;  %v1025_v25 = vadd.f32 %v1024_v13, %v632_v7  ;;  %v915_v26 = vadd.f32 %v914_v14, %v526_v9  ;;  %v660_v41 = vld [vmem:[%s2973_s13 + $0xb00] sm:$0xff]  ;;  %v609_v46 = vld [vmem:[%s2973_s13 + $0x968] sm:$0xff]  ;;  %v583_v51 = vld [vmem:[%s2973_s13 + $0x898] sm:$0xff] }
  0xcc   : > { %v885_v60 = vadd.f32 %v884_v48, %v497_v30  ;;  %v997_v17 = vadd.f32 %v996_v6, %v605_v1  ;;  %v970_v23 = vadd.f32 %v969_v11, %v579_v5  ;;  %v634_v30 = vld [vmem:[%s2973_s13 + $0xa30] sm:$0xff]  ;;  %v556_v43 = vld [vmem:[%s2973_s13 + $0x7c0] sm:$0xff]  ;;  %v1055_v49 = vadd.f32 %v661_v42, %v660_v41  ;;  %v663_v54 = vld [vmem:[%s2973_s13 + $0xb18] sm:$0xff] }
  0xcd   : > { %v943_v33 = vadd.f32 %v942_v22, %v553_v15  ;;  %v1026_v37 = vadd.f32 %v1025_v25, %v633_v18  ;;  %v916_v38 = vadd.f32 %v915_v26, %v527_v20  ;;  %v662_v48 = vld [vmem:[%s2973_s13 + $0xb10] sm:$0xff]  ;;  %v636_v53 = vld [vmem:[%s2973_s13 + $0xa40] sm:$0xff]  ;;  %v557_v56 = vld [vmem:[%s2973_s13 + $0x7c8] sm:$0xff] }
  0xce   : > { %v886_v8 = vadd.f32 %v885_v60, %v498_v47  ;;  %v998_v29 = vadd.f32 %v997_v17, %v606_v12  ;;  %v971_v35 = vadd.f32 %v970_v23, %v580_v16  ;;  %v530_v55 = vld [vmem:[%s2973_s13 + $0x6f0] sm:$0xff]  ;;  %v1056_v61 = vadd.f32 %v1055_v49, %v662_v48  ;;  %v584_v63 = vld [vmem:[%s2973_s13 + $0x8a0] sm:$0xff]  ;;  %v637_v2 = vld [vmem:[%s2973_s13 + $0xa48] sm:$0xff] }
  0xcf   : > { %v944_v44 = vadd.f32 %v943_v33, %v554_v27  ;;  %v1027_v47 = vadd.f32 %v1026_v37, %v634_v30  ;;  %v917_v50 = vadd.f32 %v916_v38, %v528_v21  ;;  %v664_v3 = vld [vmem:[%s2973_s13 + $0xb20] sm:$0xff]  ;;  %v531_v4 = vld [vmem:[%s2973_s13 + $0x6f8] sm:$0xff]  ;;  %v558_v5 = vld [vmem:[%s2973_s13 + $0x7d0] sm:$0xff] }
  0xd0   : > { %v887_v19 = vadd.f32 %v886_v8, %v499_v59  ;;  %v999_v39 = vadd.f32 %v998_v29, %v607_v24  ;;  %v972_v45 = vadd.f32 %v971_v35, %v581_v28  ;;  %v610_v59 = vld [vmem:[%s2973_s13 + $0x970] sm:$0xff]  ;;  %v611_v8 = vld [vmem:[%s2973_s13 + $0x978] sm:$0xff]  ;;  %v1057_v10 = vadd.f32 %v1056_v61, %v663_v54  ;;  %v585_v12 = vld [vmem:[%s2973_s13 + $0x8a8] sm:$0xff] }
  0xd1   : > { %v945_v57 = vadd.f32 %v944_v44, %v555_v32  ;;  %v1028_v60 = vadd.f32 %v1027_v47, %v635_v40  ;;  %v918_v62 = vadd.f32 %v917_v50, %v529_v31  ;;  %v638_v14 = vld [vmem:[%s2973_s13 + $0xa50] sm:$0xff]  ;;  %v665_v15 = vld [vmem:[%s2973_s13 + $0xb28] sm:$0xff]  ;;  %v559_v16 = vld [vmem:[%s2973_s13 + $0x7d8] sm:$0xff] }
  0xd2   : > { %888 = vadd.xlane.f32.xlu1 %v887_v19  ;;  %v1000_v52 = vadd.f32 %v999_v39, %v608_v36  ;;  %v973_v58 = vadd.f32 %v972_v45, %v582_v34  ;;  %v612_v19 = vld [vmem:[%s2973_s13 + $0x980] sm:$0xff]  ;;  %v1058_v21 = vadd.f32 %v1057_v10, %v664_v3  ;;  %v586_v23 = vld [vmem:[%s2973_s13 + $0x8b0] sm:$0xff]  ;;  %v639_v25 = vld [vmem:[%s2973_s13 + $0xa58] sm:$0xff] }
  0xd3   : > { %v946_v6 = vadd.f32 %v945_v57, %v556_v43  ;;  %v1029_v9 = vadd.f32 %v1028_v60, %v636_v53  ;;  %v919_v11 = vadd.f32 %v918_v62, %v530_v55  ;;  %v666_v26 = vld [vmem:[%s2973_s13 + $0xb30] sm:$0xff]  ;;  %v560_v27 = vld [vmem:[%s2973_s13 + $0x7e0] sm:$0xff]  ;;  %v613_v30 = vld [vmem:[%s2973_s13 + $0x988] sm:$0xff] }
  0xd4   : > { %v1001_v1 = vadd.f32 %v1000_v52, %v609_v46  ;;  %v974_v7 = vadd.f32 %v973_v58, %v583_v51  ;;  %v1059_v32 = vadd.f32 %v1058_v21, %v665_v15  ;;  %v587_v33 = vld [vmem:[%s2973_s13 + $0x8b8] sm:$0xff]  ;;  %v640_v35 = vld [vmem:[%s2973_s13 + $0xa60] sm:$0xff]  ;;  %v561_v37 = vld [vmem:[%s2973_s13 + $0x7e8] sm:$0xff] }
  0xd5   : > { %v947_v17 = vadd.f32 %v946_v6, %v557_v56  ;;  %v1030_v20 = vadd.f32 %v1029_v9, %v637_v2  ;;  %v920_v22 = vadd.f32 %v919_v11, %v531_v4  ;;  %v667_v36 = vld [vmem:[%s2973_s13 + $0xb38] sm:$0xff]  ;;  %v614_v40 = vld [vmem:[%s2973_s13 + $0x990] sm:$0xff]  ;;  %v588_v43 = vld [vmem:[%s2973_s13 + $0x8c0] sm:$0xff] }
  0xd6   : > { %v1002_v13 = vadd.f32 %v1001_v1, %v610_v59  ;;  %v975_v18 = vadd.f32 %v974_v7, %v584_v63  ;;  %v1060_v42 = vadd.f32 %v1059_v32, %v666_v26  ;;  %v641_v45 = vld [vmem:[%s2973_s13 + $0xa68] sm:$0xff]  ;;  %v668_v46 = vld [vmem:[%s2973_s13 + $0xb40] sm:$0xff]  ;;  %v562_v47 = vld [vmem:[%s2973_s13 + $0x7f0] sm:$0xff] }
  0xd7   : > { %v948_v28 = vadd.f32 %v947_v17, %v558_v5  ;;  %v1031_v31 = vadd.f32 %v1030_v20, %v638_v14  ;;  %921 = vadd.xlane.f32.xlu0 %v920_v22  ;;  %v615_v50 = vld [vmem:[%s2973_s13 + $0x998] sm:$0xff]  ;;  %v589_v53 = vld [vmem:[%s2973_s13 + $0x8c8] sm:$0xff]  ;;  %v642_v55 = vld [vmem:[%s2973_s13 + $0xa70] sm:$0xff] }
  0xd8   : > { %v1003_v24 = vadd.f32 %v1002_v13, %v611_v8  ;;  %v976_v29 = vadd.f32 %v975_v18, %v585_v12  ;;  %v1061_v52 = vadd.f32 %v1060_v42, %v667_v36  ;;  %v669_v56 = vld [vmem:[%s2973_s13 + $0xb48] sm:$0xff]  ;;  %v563_v57 = vld [vmem:[%s2973_s13 + $0x7f8] sm:$0xff]  ;;  %v616_v60 = vld [vmem:[%s2973_s13 + $0x9a0] sm:$0xff] }
  0xd9   : > { %v949_v38 = vadd.f32 %v948_v28, %v559_v16  ;;  %v1032_v41 = vadd.f32 %v1031_v31, %v639_v25  ;;  %v590_v63 = vld [vmem:[%s2973_s13 + $0x8d0] sm:$0xff]  ;;  %v643_v2 = vld [vmem:[%s2973_s13 + $0xa78] sm:$0xff]  ;;  %v617_v6 = vld [vmem:[%s2973_s13 + $0x9a8] sm:$0xff] }
  0xda   : > { %v1004_v34 = vadd.f32 %v1003_v24, %v612_v19  ;;  %v977_v39 = vadd.f32 %v976_v29, %v586_v23  ;;  %v1062_v62 = vadd.f32 %v1061_v52, %v668_v46  ;;  %v670_v3 = vld [vmem:[%s2973_s13 + $0xb50] sm:$0xff]  ;;  %v591_v9 = vld [vmem:[%s2973_s13 + $0x8d8] sm:$0xff]  ;;  %v644_v11 = vld [vmem:[%s2973_s13 + $0xa80] sm:$0xff] }
  0xdb   : > { %v950_v48 = vadd.f32 %v949_v38, %v560_v27  ;;  %v1033_v51 = vadd.f32 %v1032_v41, %v640_v35  ;;  %v671_v12 = vld [vmem:[%s2973_s13 + $0xb58] sm:$0xff]  ;;  %v618_v15 = vld [vmem:[%s2973_s13 + $0x9b0] sm:$0xff]  ;;  %v592_v18 = vld [vmem:[%s2973_s13 + $0x8e0] sm:$0xff] }
  0xdc   : > { %v1005_v44 = vadd.f32 %v1004_v34, %v613_v30  ;;  %v978_v49 = vadd.f32 %v977_v39, %v587_v33  ;;  %v1063_v8 = vadd.f32 %v1062_v62, %v669_v56  ;;  %v645_v20 = vld [vmem:[%s2973_s13 + $0xa88] sm:$0xff]  ;;  %v672_v21 = vld [vmem:[%s2973_s13 + $0xb60] sm:$0xff]  ;;  %v619_v23 = vld [vmem:[%s2973_s13 + $0x9b8] sm:$0xff] }
  0xdd   : > { %v951_v58 = vadd.f32 %v950_v48, %v561_v37  ;;  %v1034_v61 = vadd.f32 %v1033_v51, %v641_v45  ;;  %v593_v26 = vld [vmem:[%s2973_s13 + $0x8e8] sm:$0xff]  ;;  %v646_v28 = vld [vmem:[%s2973_s13 + $0xa90] sm:$0xff]  ;;  %v620_v31 = vld [vmem:[%s2973_s13 + $0x9c0] sm:$0xff] }
  0xde   : > { %v1006_v54 = vadd.f32 %v1005_v44, %v614_v40  ;;  %v979_v59 = vadd.f32 %v978_v49, %v588_v43  ;;  %v1064_v17 = vadd.f32 %v1063_v8, %v670_v3  ;;  %v673_v29 = vld [vmem:[%s2973_s13 + $0xb68] sm:$0xff]  ;;  %v594_v34 = vld [vmem:[%s2973_s13 + $0x8f0] sm:$0xff]  ;;  %v647_v36 = vld [vmem:[%s2973_s13 + $0xa98] sm:$0xff] }
  0xdf   : > { %v952_v4 = vadd.f32 %v951_v58, %v562_v47  ;;  %v1035_v7 = vadd.f32 %v1034_v61, %v642_v55  ;;  %v674_v37 = vld [vmem:[%s2973_s13 + $0xb70] sm:$0xff]  ;;  %v621_v39 = vld [vmem:[%s2973_s13 + $0x9c8] sm:$0xff]  ;;  %v595_v42 = vld [vmem:[%s2973_s13 + $0x8f8] sm:$0xff] }
  0xe0   : > { %v1007_v1 = vadd.f32 %v1006_v54, %v615_v50  ;;  %v980_v5 = vadd.f32 %v979_v59, %v589_v53  ;;  %v1065_v25 = vadd.f32 %v1064_v17, %v671_v12  ;;  %v648_v44 = vld [vmem:[%s2973_s13 + $0xaa0] sm:$0xff]  ;;  %v675_v45 = vld [vmem:[%s2973_s13 + $0xb78] sm:$0xff]  ;;  %v622_v47 = vld [vmem:[%s2973_s13 + $0x9d0] sm:$0xff] }
  0xe1   : > { %v953_v13 = vadd.f32 %v952_v4, %v563_v57  ;;  %v1036_v16 = vadd.f32 %v1035_v7, %v643_v2  ;;  %v649_v51 = vld [vmem:[%s2973_s13 + $0xaa8] sm:$0xff]  ;;  %v676_v52 = vld [vmem:[%s2973_s13 + $0xb80] sm:$0xff]  ;;  %v623_v54 = vld [vmem:[%s2973_s13 + $0x9d8] sm:$0xff] }
  0xe2   : > { %v1008_v10 = vadd.f32 %v1007_v1, %v616_v60  ;;  %v981_v14 = vadd.f32 %v980_v5, %v590_v63  ;;  %v1066_v33 = vadd.f32 %v1065_v25, %v672_v21  ;;  %v650_v58 = vld [vmem:[%s2973_s13 + $0xab0] sm:$0xff]  ;;  %v677_v59 = vld [vmem:[%s2973_s13 + $0xb88] sm:$0xff]  ;;  %v624_v60 = vld [vmem:[%s2973_s13 + $0x9e0] sm:$0xff] }
  0xe3   : > { %954 = vadd.xlane.f32.xlu1 %v953_v13  ;;  %v1037_v24 = vadd.f32 %v1036_v16, %v644_v11  ;;  %v651_v1 = vld [vmem:[%s2973_s13 + $0xab8] sm:$0xff]  ;;  %v678_v2 = vld [vmem:[%s2973_s13 + $0xb90] sm:$0xff]  ;;  %v625_v3 = vld [vmem:[%s2973_s13 + $0x9e8] sm:$0xff] }
  0xe4   : > { %v1009_v19 = vadd.f32 %v1008_v10, %v617_v6  ;;  %v982_v22 = vadd.f32 %v981_v14, %v591_v9  ;;  %v1067_v41 = vadd.f32 %v1066_v33, %v673_v29  ;;  %v652_v7 = vld [vmem:[%s2973_s13 + $0xac0] sm:$0xff]  ;;  %v679_v8 = vld [vmem:[%s2973_s13 + $0xb98] sm:$0xff]  ;;  %v626_v9 = vld [vmem:[%s2973_s13 + $0x9f0] sm:$0xff] }
  0xe5   : > { %v1038_v32 = vadd.f32 %v1037_v24, %v645_v20  ;;  %v653_v13 = vld [vmem:[%s2973_s13 + $0xac8] sm:$0xff]  ;;  %v680_v14 = vld [vmem:[%s2973_s13 + $0xba0] sm:$0xff]  ;;  %v655_v24 = vld [vmem:[%s2973_s13 + $0xad8] sm:$0xff] }
  0xe6   : > { %v1010_v27 = vadd.f32 %v1009_v19, %v618_v15  ;;  %v983_v30 = vadd.f32 %v982_v22, %v592_v18  ;;  %v1068_v49 = vadd.f32 %v1067_v41, %v674_v37  ;;  %v627_v15 = vld [vmem:[%s2973_s13 + $0x9f8] sm:$0xff]  ;;  %v654_v19 = vld [vmem:[%s2973_s13 + $0xad0] sm:$0xff]  ;;  %v681_v20 = vld [vmem:[%s2973_s13 + $0xba8] sm:$0xff] }
  0xe7   : > { %v1039_v40 = vadd.f32 %v1038_v32, %v646_v28  ;;  %v682_v25 = vld [vmem:[%s2973_s13 + $0xbb0] sm:$0xff]  ;;  %v656_v28 = vld [vmem:[%s2973_s13 + $0xae0] sm:$0xff]  ;;  %v683_v29 = vld [vmem:[%s2973_s13 + $0xbb8] sm:$0xff] }
  0xe8   : > { %v1011_v35 = vadd.f32 %v1010_v27, %v619_v23  ;;  %v984_v38 = vadd.f32 %v983_v30, %v593_v26  ;;  %v1069_v56 = vadd.f32 %v1068_v49, %v675_v45  ;;  %v657_v32 = vld [vmem:[%s2973_s13 + $0xae8] sm:$0xff]  ;;  %v684_v33 = vld [vmem:[%s2973_s13 + $0xbc0] sm:$0xff]  ;;  %v686_v41 = vld [vmem:[%s2973_s13 + $0xbd0] sm:$0xff] }
  0xe9   : > { %v1040_v48 = vadd.f32 %v1039_v40, %v647_v36  ;;  %v658_v36 = vld [vmem:[%s2973_s13 + $0xaf0] sm:$0xff]  ;;  %v685_v37 = vld [vmem:[%s2973_s13 + $0xbc8] sm:$0xff]  ;;  %v659_v40 = vld [vmem:[%s2973_s13 + $0xaf8] sm:$0xff] }
  0xea   : > { %v1012_v43 = vadd.f32 %v1011_v35, %v620_v31  ;;  %v985_v46 = vadd.f32 %v984_v38, %v594_v34  ;;  %v1070_v62 = vadd.f32 %v1069_v56, %v676_v52  ;;  %v689_v49 = vld [vmem:[%s2973_s13 + $0xbe8] sm:$0xff] }
  0xeb   : > { %v1041_v55 = vadd.f32 %v1040_v48, %v648_v44  ;;  %v687_v44 = vld [vmem:[%s2973_s13 + $0xbd8] sm:$0xff] }
  0xec   : > { %v1013_v50 = vadd.f32 %v1012_v43, %v621_v39  ;;  %v986_v53 = vadd.f32 %v985_v46, %v595_v42  ;;  %v1071_v5 = vadd.f32 %v1070_v62, %v677_v59  ;;  %v3382_v59 = vld [vmem:[%s4724_s5] sm:$0xff] }
  0xed   : > { %v1042_v61 = vadd.f32 %v1041_v55, %v649_v51  ;;  %v690_v51 = vld [vmem:[%s2973_s13 + $0xbf0] sm:$0xff] }
  0xee   : > { %v1014_v57 = vadd.f32 %v1013_v50, %v622_v47  ;;  %987 = vadd.xlane.f32.xlu0 %v986_v53  ;;  %v1072_v11 = vadd.f32 %v1071_v5, %v678_v2  ;;  %v688_v47 = vld [vmem:[%s2973_s13 + $0xbe0] sm:$0xff]  ;;  %v691_v53 = vld [vmem:[%s2973_s13 + $0xbf8] sm:$0xff] }
  0xef   : > { %v1043_v4 = vadd.f32 %v1042_v61, %v650_v58  ;;  %v3395_v2 = vld [vmem:[%s4724_s5 + $0x18] sm:$0xff] }
  0xf0   : > { %v1015_v63 = vadd.f32 %v1014_v57, %v623_v54  ;;  %v1073_v17 = vadd.f32 %v1072_v11, %v679_v8  ;;  %v3377_v57 = vld [vmem:[%s4724_s5 + $0x8] sm:$0xff]  ;;  %v3403_v8 = vld [vmem:[%s4724_s5 + $0x20] sm:$0xff] }
  0xf1   : > { %v1044_v10 = vadd.f32 %v1043_v4, %v651_v1 }
  0xf2   : > { %v1016_v6 = vadd.f32 %v1015_v63, %v624_v60  ;;  %v1074_v22 = vadd.f32 %v1073_v17, %v680_v14  ;;  %v3389_v63 = vld [vmem:[%s4724_s5 + $0x10] sm:$0xff]  ;;  %v3411_v14 = vld [vmem:[%s4724_s5 + $0x28] sm:$0xff] }
  0xf3   : > { %v1045_v16 = vadd.f32 %v1044_v10, %v652_v7 }
  0xf4   : > { %v1017_v12 = vadd.f32 %v1016_v6, %v625_v3  ;;  %v1075_v27 = vadd.f32 %v1074_v22, %v681_v20 }
  0xf5   : > { %v1046_v21 = vadd.f32 %v1045_v16, %v653_v13 }
  0xf6   : > { %v1018_v18 = vadd.f32 %v1017_v12, %v626_v9  ;;  %v1076_v31 = vadd.f32 %v1075_v27, %v682_v25 }
  0xf7   : > { %v1047_v26 = vadd.f32 %v1046_v21, %v654_v19  ;;  %v3418_v19 = vld [vmem:[%s4724_s5 + $0x30] sm:$0xff] }
  0xf8   : > { %v1019_v23 = vadd.f32 %v1018_v18, %v627_v15  ;;  %v1077_v35 = vadd.f32 %v1076_v31, %v683_v29  ;;  %v3432_v29 = vld [vmem:[%s4724_s5 + $0x40] sm:$0xff] }
  0xf9   : > { %v1048_v30 = vadd.f32 %v1047_v26, %v655_v24  ;;  %v3425_v24 = vld [vmem:[%s4724_s5 + $0x38] sm:$0xff] }
  0xfa   : > { %1020 = vadd.xlane.f32.xlu1 %v1019_v23  ;;  %v1078_v39 = vadd.f32 %v1077_v35, %v684_v33 }
  0xfb   : > { %v1049_v34 = vadd.f32 %v1048_v30, %v656_v28 }
  0xfc   : > { %v1079_v43 = vadd.f32 %v1078_v39, %v685_v37  ;;  %v3446_v39 = vld [vmem:[%s4724_s5 + $0x50] sm:$0xff] }
  0xfd   : > { %v1050_v38 = vadd.f32 %v1049_v34, %v657_v32  ;;  %v3439_v34 = vld [vmem:[%s4724_s5 + $0x48] sm:$0xff] }
  0xfe   : > { %v1080_v46 = vadd.f32 %v1079_v43, %v686_v41 }
  0xff   : > { %v1051_v42 = vadd.f32 %v1050_v38, %v658_v36 }
 0x100   : > { %v1081_v48 = vadd.f32 %v1080_v46, %v687_v44  ;;  %v3454_v46 = vld [vmem:[%s4724_s5 + $0x58] sm:$0xff] }
 0x101   : > { %v1052_v45 = vadd.f32 %v1051_v42, %v659_v40 }
 0x102   : > { %v1082_v50 = vadd.f32 %v1081_v48, %v688_v47 }
 0x103   : > { %1053 = vadd.xlane.f32.xlu0 %v1052_v45 }
 0x104   : > { %v1083_v52 = vadd.f32 %v1082_v50, %v689_v49 }
 0x106   : > { %v1084_v54 = vadd.f32 %v1083_v52, %v690_v51 }
 0x108   : > { %v1085_v55 = vadd.f32 %v1084_v54, %v691_v53 }
 0x10a   : > { %1086 = vadd.xlane.f32.xlu1 %v1085_v55 }
 0x12d   : > { %v724_v56 = vpop.xlane.xlu0 %723 }
 0x12e   : > { %v1100_v62 = vmul.f32 %v3382_v59, %v724_v56 }
 0x130   : > { %v790_v60 = vpop.xlane.xlu1 %789  ;;  %v1113_v4 = vsel %vm1112_vm0, %v1100_v62, 0.0 }
 0x131   : > { %v1102_v5 = vmul.f32 %v3389_v63, %v790_v60  ;;  %v1143_v60 = vld [vmem:[#allocation5] sm:$0x3] }
 0x133   : > { %v1116_v10 = vsel %vm1112_vm0, %v1102_v5, 0.0 }
 0x13a   : > { %v757_v58 = vpop.xlane.xlu0 %756 }
 0x13b   : > { %v1101_v61 = vmul.f32 %v3377_v57, %v757_v58 }
 0x13d   : > { %v1114_v1 = vsel %vm1112_vm0, %v1101_v61, 0.0 }
 0x13e   : > { %v1115_v6 = vadd.f32 %v1114_v1, %v1113_v4  ;;  %v1149_v4 = vld [vmem:[%s4721_s2] sm:$0x3] }
 0x140   : > { %v1117_v11 = vadd.f32 %v1116_v10, %v1115_v6 }
 0x145   : > { %v823_v3 = vpop.xlane.xlu1 %822 }
 0x146   : > { %v1103_v7 = vmul.f32 %v3395_v2, %v823_v3  ;;  %v2785_v3 = vmov 0  }
 0x147   : > { %2210 = vset.pattern.permute.xlu1 %v2785_v3  ;;  %2211 = vset.pattern.permute.xlu0 %v2785_v3  ;;  %v2222_v3 = vld [vmem:[%s2973_s13 + $0x430] sm:$0xff] }
 0x148   : > { %v1118_v12 = vsel %vm1112_vm0, %v1103_v7, 0.0 }
 0x149   : > { %v1119_v16 = vadd.f32 %v1118_v12, %v1117_v11 }
 0x153   : > { %v856_v9 = vpop.xlane.xlu0 %855 }
 0x154   : > { %v1104_v13 = vmul.f32 %v3403_v8, %v856_v9  ;;  %v1152_v9 = vld [vmem:[#allocation7] sm:$0x3] }
 0x156   : > { %v1120_v17 = vsel %vm1112_vm0, %v1104_v13, 0.0 }
 0x157   : > { %v1121_v21 = vadd.f32 %v1120_v17, %v1119_v16 }
 0x15b   : > { %v889_v15 = vpop.xlane.xlu1 %888 }
 0x15c   : > { %v1105_v18 = vmul.f32 %v3411_v14, %v889_v15 }
 0x15e   : > { %v1122_v22 = vsel %vm1112_vm0, %v1105_v18, 0.0 }
 0x15f   : > { %v1123_v26 = vadd.f32 %v1122_v22, %v1121_v21 }
 0x160   : > { %v922_v20 = vpop.xlane.xlu0 %921 }
 0x161   : > { %v1106_v23 = vmul.f32 %v3418_v19, %v922_v20  ;;  %v1166_v20 = vld [vmem:[#allocation8] sm:$0x1] }
 0x163   : > { %v1124_v27 = vsel %vm1112_vm0, %v1106_v23, 0.0 }
 0x164   : > { %v1125_v31 = vadd.f32 %v1124_v27, %v1123_v26 }
 0x16c   : > { %v955_v25 = vpop.xlane.xlu1 %954 }
 0x16d   : > { %v1107_v28 = vmul.f32 %v3425_v24, %v955_v25 }
 0x16f   : > { %v1126_v32 = vsel %vm1112_vm0, %v1107_v28, 0.0  ;;  %v1174_v28 = vlaneseq }
 0x170   : > { %v1127_v36 = vadd.f32 %v1126_v32, %v1125_v31 }
 0x177   : > { %v988_v30 = vpop.xlane.xlu0 %987 }
 0x178   : > { %v1108_v33 = vmul.f32 %v3432_v29, %v988_v30  ;;  %v1175_v30 = vshrl.u32 %v1174_v28, 7 }
 0x17a   : > { %v1128_v37 = vsel %vm1112_vm0, %v1108_v33, 0.0  ;;  %v1176_v31 = vsub.s32 0, %v1175_v30  ;;  %v2233_v30 = vld [vmem:[%s2973_s13 + $0x488] sm:$0xff] }
 0x17b   : > { %v1129_v41 = vadd.f32 %v1128_v37, %v1127_v36 }
 0x183   : > { %v1021_v35 = vpop.xlane.xlu1 %1020 }
 0x184   : > { %v1109_v38 = vmul.f32 %v3439_v34, %v1021_v35 }
 0x186   : > { %v1130_v42 = vsel %vm1112_vm0, %v1109_v38, 0.0 }
 0x187   : > { %v1131_v44 = vadd.f32 %v1130_v42, %v1129_v41 }
 0x18c   : > { %v1054_v40 = vpop.xlane.xlu0 %1053 }
 0x18d   : > { %v1110_v43 = vmul.f32 %v3446_v39, %v1054_v40 }
 0x18f   : > { %v1132_v45 = vsel %vm1112_vm0, %v1110_v43, 0.0 }
 0x190   : > { %v1133_v47 = vadd.f32 %v1132_v45, %v1131_v44 }
 0x193   : > { %v1087_v48 = vpop.xlane.xlu1 %1086 }
 0x194   : > { %v1111_v49 = vmul.f32 %v3454_v46, %v1087_v48 }
 0x196   : > { %v1134_v50 = vsel %vm1112_vm0, %v1111_v49, 0.0 }
 0x197   : > { %v1135_v51 = vadd.f32 %v1134_v50, %v1133_v47 }
 0x199   : > { %v1136_v52 = vrot.slane %v1135_v51, 4 }
 0x19b   : > { %v1137_v53 = vadd.f32 %v1136_v52, %v1135_v51  ;;  %v2216_v52 = vld [vmem:[%s2973_s13 + $0x400] sm:$0xff] }
 0x19d   : > { %v1138_v54 = vrot.slane %v1137_v53, 2 }
 0x19f   : > { %v1139_v55 = vadd.f32 %v1138_v54, %v1137_v53 }
 0x1a1   : > { %v1140_v56 = vrot.slane %v1139_v55, 1 }
 0x1a3   : > { %v1141_v58 = vadd.f32 %v1140_v56, %v1139_v55  ;;  %v2218_v55 = vld [vmem:[%s2973_s13 + $0x410] sm:$0xff]  ;;  %v2219_v56 = vld [vmem:[%s2973_s13 + $0x418] sm:$0xff] }
 0x1a5   : > { %v1142_v61 = vmul.f32 1.0172526e-05, %v1141_v58 }
 0x1a7   : > { %v1144_v62 = vmul.f32 %v1143_v60, %v1142_v61  ;;  %v2220_v60 = vld [vmem:[%s2973_s13 + $0x420] sm:$0xff] }
 0x1a9   : > { %v1146_v1 = vsel %vm1145_vm1, %v1144_v62, 0.0  ;;  %v2221_v62 = vld [vmem:[%s2973_s13 + $0x428] sm:$0xff] }
 0x1aa   : > { %1147 = vadd.xlane.f32.xlu0 %v1146_v1 }
 0x233   : > { %v1148_v5 = vpop.xlane.xlu0 %1147 }
 0x234   : > { %v1150_v6 = vadd.f32 %v1149_v4, %v1148_v5  ;;  %v2223_v5 = vld [vmem:[%s2973_s13 + $0x438] sm:$0xff] }
 0x236   : > { %v1151_v7 = vmax.f32 %v1150_v6, 0.0 }
 0x238   : > { %1155 = vperm.xlu1 %2210, %v1151_v7   ;;  %v2224_v7 = vld [vmem:[%s2973_s13 + $0x440] sm:$0xff] }
 0x2b3   : > { %v1156_v10 = vpop.permute.xlu1 %1155 }
 0x2b4   : > { %v1158_v11 = vmul.f32 %v1156_v10, %v1152_v9  ;;  %v2225_v10 = vld [vmem:[%s2973_s13 + $0x448] sm:$0xff] }
 0x2b6   : > { %v1159_v12 = vsel %vm1145_vm1, %v1158_v11, 0.0 }
 0x2b7   : > { %v1160_v13 = vrot.slane %v1159_v12, 4 }
 0x2b9   : > { %v1161_v15 = vadd.f32 %v1160_v13, %v1159_v12  ;;  %v2226_v12 = vld [vmem:[%s2973_s13 + $0x450] sm:$0xff] }
 0x2bb   : > { %v1162_v16 = vrot.slane %v1161_v15, 2 }
 0x2bd   : > { %v1163_v17 = vadd.f32 %v1162_v16, %v1161_v15  ;;  %v2227_v15 = vld [vmem:[%s2973_s13 + $0x458] sm:$0xff] }
 0x2bf   : > { %v1164_v18 = vrot.slane %v1163_v17, 1 }
 0x2c1   : > { %v1165_v21 = vadd.f32 %v1164_v18, %v1163_v17  ;;  %v2228_v17 = vld [vmem:[%s2973_s13 + $0x460] sm:$0xff] }
 0x2c3   : > { %v1167_v22 = vadd.f32 %v1166_v20, %v1165_v21  ;;  %v2229_v20 = vld [vmem:[%s2973_s13 + $0x468] sm:$0xff] }
 0x2c5   : > { %v1168_v23 = vsub.f32 0.0, %v1167_v22  ;;  %v2230_v22 = vld [vmem:[%s2973_s13 + $0x470] sm:$0xff] }
 0x2c7   : > { %v1169_v25 = vmul.f32 1.442695, %v1168_v23 }
 0x2c9   : > { %2212 = vpow2.f32 %v1169_v25  ;;  %v2231_v25 = vld [vmem:[%s2973_s13 + $0x478] sm:$0xff] }
 0x2d6   : > { %v2213_v26 = vpop.eup %2212 }
 0x2d7   : > { %v1171_v27 = vadd.f32 1.0, %v2213_v26 }
 0x2d9   : > { %2214 = vrcp.f32 %v1171_v27  ;;  %v2232_v27 = vld [vmem:[%s2973_s13 + $0x480] sm:$0xff] }
 0x2e6   : > { %v2215_v32 = vpop.eup %2214 }
 0x2e7   : > { %v1177_v33 = vrot.slane %v2215_v32, %v1176_v31  ;;  %v2234_v32 = vld [vmem:[%s2973_s13 + $0x490] sm:$0xff] }
 0x2e9   : > { %v1182_v35 = vmul.f32 %v1177_v33, %v3403_v8  ;;  %v1178_v36 = vmul.f32 %v1177_v33, %v3382_v59  ;;  %v1179_v40 = vmul.f32 %v1177_v33, %v3377_v57  ;;  %v1180_v42 = vmul.f32 %v1177_v33, %v3389_v63 }
 0x2ea   : > { %v1181_v44 = vmul.f32 %v1177_v33, %v3395_v2  ;;  %v1183_v8 = vmul.f32 %v1177_v33, %v3411_v14  ;;  %v1184_v57 = vmul.f32 %v1177_v33, %v3418_v19  ;;  %v1185_v63 = vmul.f32 %v1177_v33, %v3425_v24 }
 0x2eb   : > { %v1202_v37 = vsel %vm1112_vm0, %v1182_v35, 0.0  ;;  %v1190_v38 = vsel %vm1112_vm0, %v1178_v36, 0.0  ;;  %v1193_v41 = vsel %vm1112_vm0, %v1179_v40, 0.0  ;;  %v1196_v43 = vsel %vm1112_vm0, %v1180_v42, 0.0  ;;  %v2235_v35 = vld [vmem:[%s2973_s13 + $0x498] sm:$0xff]  ;;  %v2237_v40 = vld [vmem:[%s2973_s13 + $0x4a8] sm:$0xff] }
 0x2ec   : > { %1203 = vadd.xlane.f32.xlu1 %v1202_v37  ;;  %1191 = vadd.xlane.f32.xlu0 %v1190_v38  ;;  %v1199_v59 = vsel %vm1112_vm0, %v1181_v44, 0.0  ;;  %v1205_v45 = vsel %vm1112_vm0, %v1183_v8, 0.0  ;;  %v1208_v47 = vsel %vm1112_vm0, %v1184_v57, 0.0  ;;  %v1211_v48 = vsel %vm1112_vm0, %v1185_v63, 0.0  ;;  %v2236_v37 = vld [vmem:[%s2973_s13 + $0x4a0] sm:$0xff]  ;;  %v2238_v42 = vld [vmem:[%s2973_s13 + $0x4b0] sm:$0xff] }
 0x2ed   : > { %v1186_v2 = vmul.f32 %v1177_v33, %v3432_v29  ;;  %v1187_v49 = vmul.f32 %v1177_v33, %v3439_v34  ;;  %v1188_v50 = vmul.f32 %v1177_v33, %v3446_v39  ;;  %v1189_v29 = vmul.f32 %v1177_v33, %v3454_v46  ;;  %v2217_v39 = vld [vmem:[%s2973_s13 + $0x408] sm:$0xff]  ;;  %v2239_v44 = vld [vmem:[%s2973_s13 + $0x4b8] sm:$0xff] }
 0x2ef   : > { %v1214_v14 = vsel %vm1112_vm0, %v1186_v2, 0.0  ;;  %v1217_v19 = vsel %vm1112_vm0, %v1187_v49, 0.0  ;;  %v1220_v24 = vsel %vm1112_vm0, %v1188_v50, 0.0  ;;  %v1223_v51 = vsel %vm1112_vm0, %v1189_v29, 0.0 }
 0x2f0   : > { %1194 = vadd.xlane.f32.xlu0 %v1193_v41 }
 0x2f4   : > { %1197 = vadd.xlane.f32.xlu0 %v1196_v43 }
 0x2f8   : > { %1200 = vadd.xlane.f32.xlu0 %v1199_v59 }
 0x2fc   : > { %1206 = vadd.xlane.f32.xlu0 %v1205_v45  ;;  %v2240_v45 = vld [vmem:[%s2973_s13 + $0x4c0] sm:$0xff] }
 0x300   : > { %1209 = vadd.xlane.f32.xlu0 %v1208_v47  ;;  %v2241_v47 = vld [vmem:[%s2973_s13 + $0x4c8] sm:$0xff] }
 0x304   : > { %1212 = vadd.xlane.f32.xlu0 %v1211_v48  ;;  %v2242_v48 = vld [vmem:[%s2973_s13 + $0x4d0] sm:$0xff] }
 0x308   : > { %1215 = vadd.xlane.f32.xlu0 %v1214_v14  ;;  %v2243_v14 = vld [vmem:[%s2973_s13 + $0x4d8] sm:$0xff] }
 0x30c   : > { %1218 = vadd.xlane.f32.xlu0 %v1217_v19  ;;  %v2244_v19 = vld [vmem:[%s2973_s13 + $0x4e0] sm:$0xff] }
 0x310   : > { %1221 = vadd.xlane.f32.xlu0 %v1220_v24  ;;  %v2245_v24 = vld [vmem:[%s2973_s13 + $0x4e8] sm:$0xff] }
 0x314   : > { %1224 = vadd.xlane.f32.xlu0 %v1223_v51  ;;  %v2246_v51 = vld [vmem:[%s2973_s13 + $0x4f0] sm:$0xff] }
 0x375   : > { %v3485_v34 = vpop.xlane.xlu1 %1203  ;;  %v3555_v8 = vpop.xlane.xlu0 %1191 }
 0x376   : > { %v1354_v53 = vmul.f32 %v2216_v52, %v3485_v34  ;;  %v1355_v54 = vmul.f32 %v2217_v39, %v3485_v34  ;;  %v1356_v46 = vmul.f32 %v2218_v55, %v3485_v34  ;;  %v1357_v58 = vmul.f32 %v2219_v56, %v3485_v34  ;;  %v2247_v39 = vld [vmem:[%s2973_s13] sm:$0xff]  ;;  %v2248_v55 = vld [vmem:[%s2973_s13 + $0x8] sm:$0xff]  ;;  %v2250_v56 = vld [vmem:[%s2973_s13 + $0x18] sm:$0xff] }
 0x377   : > { %v1358_v61 = vmul.f32 %v2220_v60, %v3485_v34  ;;  %v1359_v1 = vmul.f32 %v2221_v62, %v3485_v34  ;;  %v1360_v4 = vmul.f32 %v2222_v3, %v3485_v34  ;;  %v1361_v6 = vmul.f32 %v2223_v5, %v3485_v34  ;;  %v2251_v60 = vld [vmem:[%s2973_s13 + $0x20] sm:$0xff]  ;;  %v2252_v62 = vld [vmem:[%s2973_s13 + $0x28] sm:$0xff]  ;;  %v2253_v3 = vld [vmem:[%s2973_s13 + $0x30] sm:$0xff] }
 0x378   : > { %v1362_v9 = vmul.f32 %v2224_v7, %v3485_v34  ;;  %v1363_v11 = vmul.f32 %v2225_v10, %v3485_v34  ;;  %v1364_v13 = vmul.f32 %v2226_v12, %v3485_v34  ;;  %v1365_v16 = vmul.f32 %v2227_v15, %v3485_v34  ;;  %1738 = vst [vmem:[%s3513_s17 + $0x400] sm:$0xff] %v1354_v53  ;;  %v2254_v5 = vld [vmem:[%s2973_s13 + $0x38] sm:$0xff]  ;;  %v2255_v7 = vld [vmem:[%s2973_s13 + $0x40] sm:$0xff]  ;;  %v2256_v10 = vld [vmem:[%s2973_s13 + $0x48] sm:$0xff] }
 0x379   : > { %1739 = vst [vmem:[%s3513_s17 + $0x408] sm:$0xff] %v1355_v54  ;;  %1740 = vst [vmem:[%s3513_s17 + $0x410] sm:$0xff] %v1356_v46  ;;  %v1366_v18 = vmul.f32 %v2228_v17, %v3485_v34  ;;  %v1367_v21 = vmul.f32 %v2229_v20, %v3485_v34  ;;  %v1368_v23 = vmul.f32 %v2230_v22, %v3485_v34  ;;  %v2257_v12 = vld [vmem:[%s2973_s13 + $0x50] sm:$0xff]  ;;  %v2258_v15 = vld [vmem:[%s2973_s13 + $0x58] sm:$0xff] }
 0x37a   : > { %1741 = vst [vmem:[%s3513_s17 + $0x418] sm:$0xff] %v1357_v58  ;;  %v1369_v26 = vmul.f32 %v2231_v25, %v3485_v34  ;;  %1742 = vst [vmem:[%s3513_s17 + $0x420] sm:$0xff] %v1358_v61  ;;  %v1370_v28 = vmul.f32 %v2232_v27, %v3485_v34  ;;  %v1371_v31 = vmul.f32 %v2233_v30, %v3485_v34  ;;  %v2259_v17 = vld [vmem:[%s2973_s13 + $0x60] sm:$0xff]  ;;  %v2260_v20 = vld [vmem:[%s2973_s13 + $0x68] sm:$0xff] }
 0x37b   : > { %1743 = vst [vmem:[%s3513_s17 + $0x428] sm:$0xff] %v1359_v1  ;;  %1744 = vst [vmem:[%s3513_s17 + $0x430] sm:$0xff] %v1360_v4  ;;  %v1372_v33 = vmul.f32 %v2234_v32, %v3485_v34  ;;  %v1373_v36 = vmul.f32 %v2235_v35, %v3485_v34  ;;  %v1374_v38 = vmul.f32 %v2236_v37, %v3485_v34  ;;  %v2261_v22 = vld [vmem:[%s2973_s13 + $0x70] sm:$0xff]  ;;  %v2262_v25 = vld [vmem:[%s2973_s13 + $0x78] sm:$0xff] }
 0x37c   : > { %1745 = vst [vmem:[%s3513_s17 + $0x438] sm:$0xff] %v1361_v6  ;;  %1746 = vst [vmem:[%s3513_s17 + $0x440] sm:$0xff] %v1362_v9  ;;  %v1375_v41 = vmul.f32 %v2237_v40, %v3485_v34  ;;  %v1376_v43 = vmul.f32 %v2238_v42, %v3485_v34  ;;  %v1377_v59 = vmul.f32 %v2239_v44, %v3485_v34  ;;  %v2263_v27 = vld [vmem:[%s2973_s13 + $0x80] sm:$0xff]  ;;  %v2264_v30 = vld [vmem:[%s2973_s13 + $0x88] sm:$0xff] }
 0x37d   : > { %1747 = vst [vmem:[%s3513_s17 + $0x448] sm:$0xff] %v1363_v11  ;;  %1748 = vst [vmem:[%s3513_s17 + $0x450] sm:$0xff] %v1364_v13  ;;  %v1378_v57 = vmul.f32 %v2240_v45, %v3485_v34  ;;  %v1379_v63 = vmul.f32 %v2241_v47, %v3485_v34  ;;  %v1380_v2 = vmul.f32 %v2242_v48, %v3485_v34  ;;  %v2265_v32 = vld [vmem:[%s2973_s13 + $0x90] sm:$0xff]  ;;  %v2266_v35 = vld [vmem:[%s2973_s13 + $0x98] sm:$0xff]  ;;  %v3653_v45 = vpop.xlane.xlu0 %1194 }
 0x37e   : > { %1749 = vst [vmem:[%s3513_s17 + $0x458] sm:$0xff] %v1365_v16  ;;  %1750 = vst [vmem:[%s3513_s17 + $0x460] sm:$0xff] %v1366_v18  ;;  %v1381_v49 = vmul.f32 %v2243_v14, %v3485_v34  ;;  %v1382_v50 = vmul.f32 %v2244_v19, %v3485_v34  ;;  %v1383_v29 = vmul.f32 %v2245_v24, %v3485_v34  ;;  %v2267_v37 = vld [vmem:[%s2973_s13 + $0xa0] sm:$0xff]  ;;  %v2268_v40 = vld [vmem:[%s2973_s13 + $0xa8] sm:$0xff] }
 0x37f   : > { %1751 = vst [vmem:[%s3513_s17 + $0x468] sm:$0xff] %v1367_v21  ;;  %1752 = vst [vmem:[%s3513_s17 + $0x470] sm:$0xff] %v1368_v23  ;;  %v1384_v52 = vmul.f32 %v2246_v51, %v3485_v34  ;;  %v1385_v53 = vmul.f32 %v3485_v34, %v3222_v0  ;;  %v1226_v54 = vmul.f32 %v2247_v39, %v3555_v8  ;;  %v2249_v34 = vld [vmem:[%s2973_s13 + $0x10] sm:$0xff]  ;;  %v2270_v44 = vld [vmem:[%s2973_s13 + $0xb8] sm:$0xff] }
 0x380   : > { %1753 = vst [vmem:[%s3513_s17 + $0x478] sm:$0xff] %v1369_v26  ;;  %1754 = vst [vmem:[%s3513_s17 + $0x480] sm:$0xff] %v1370_v28  ;;  %v1227_v0 = vmul.f32 %v2248_v55, %v3555_v8  ;;  %v1228_v46 = vmul.f32 %v2249_v34, %v3555_v8  ;;  %v1229_v58 = vmul.f32 %v2250_v56, %v3555_v8  ;;  %v2269_v42 = vld [vmem:[%s2973_s13 + $0xb0] sm:$0xff]  ;;  %v2278_v39 = vld [vmem:[%s2973_s13 + $0xf8] sm:$0xff] }
 0x381   : > { %1755 = vst [vmem:[%s3513_s17 + $0x488] sm:$0xff] %v1371_v31  ;;  %1756 = vst [vmem:[%s3513_s17 + $0x490] sm:$0xff] %v1372_v33  ;;  %v1230_v61 = vmul.f32 %v2251_v60, %v3555_v8  ;;  %v1231_v1 = vmul.f32 %v2252_v62, %v3555_v8  ;;  %v1232_v4 = vmul.f32 %v2253_v3, %v3555_v8  ;;  %v2279_v55 = vld [vmem:[%s2973_s13 + $0x100] sm:$0xff]  ;;  %v2280_v34 = vld [vmem:[%s2973_s13 + $0x108] sm:$0xff] }
 0x382   : > { %1757 = vst [vmem:[%s3513_s17 + $0x498] sm:$0xff] %v1373_v36  ;;  %1758 = vst [vmem:[%s3513_s17 + $0x4a0] sm:$0xff] %v1374_v38  ;;  %v1233_v6 = vmul.f32 %v2254_v5, %v3555_v8  ;;  %v1234_v9 = vmul.f32 %v2255_v7, %v3555_v8  ;;  %v1235_v11 = vmul.f32 %v2256_v10, %v3555_v8 }
 0x383   : > { %1759 = vst [vmem:[%s3513_s17 + $0x4a8] sm:$0xff] %v1375_v41  ;;  %1760 = vst [vmem:[%s3513_s17 + $0x4b0] sm:$0xff] %v1376_v43  ;;  %v1236_v13 = vmul.f32 %v2257_v12, %v3555_v8  ;;  %v1237_v16 = vmul.f32 %v2258_v15, %v3555_v8  ;;  %v1238_v18 = vmul.f32 %v2259_v17, %v3555_v8 }
 0x384   : > { %1761 = vst [vmem:[%s3513_s17 + $0x4b8] sm:$0xff] %v1377_v59  ;;  %1762 = vst [vmem:[%s3513_s17 + $0x4c0] sm:$0xff] %v1378_v57  ;;  %v1239_v21 = vmul.f32 %v2260_v20, %v3555_v8  ;;  %v1240_v23 = vmul.f32 %v2261_v22, %v3555_v8  ;;  %v1241_v26 = vmul.f32 %v2262_v25, %v3555_v8  ;;  %v2271_v57 = vld [vmem:[%s2973_s13 + $0xc0] sm:$0xff] }
 0x385   : > { %1763 = vst [vmem:[%s3513_s17 + $0x4c8] sm:$0xff] %v1379_v63  ;;  %1764 = vst [vmem:[%s3513_s17 + $0x4d0] sm:$0xff] %v1380_v2  ;;  %v1242_v28 = vmul.f32 %v2263_v27, %v3555_v8  ;;  %v1243_v31 = vmul.f32 %v2264_v30, %v3555_v8  ;;  %v1244_v33 = vmul.f32 %v2265_v32, %v3555_v8  ;;  %v2272_v63 = vld [vmem:[%s2973_s13 + $0xc8] sm:$0xff]  ;;  %v2273_v2 = vld [vmem:[%s2973_s13 + $0xd0] sm:$0xff] }
 0x386   : > { %1765 = vst [vmem:[%s3513_s17 + $0x4d8] sm:$0xff] %v1381_v49  ;;  %1766 = vst [vmem:[%s3513_s17 + $0x4e0] sm:$0xff] %v1382_v50  ;;  %v1245_v36 = vmul.f32 %v2266_v35, %v3555_v8  ;;  %v1246_v38 = vmul.f32 %v2267_v37, %v3555_v8  ;;  %v1247_v41 = vmul.f32 %v2268_v40, %v3555_v8  ;;  %v2274_v49 = vld [vmem:[%s2973_s13 + $0xd8] sm:$0xff]  ;;  %v2275_v50 = vld [vmem:[%s2973_s13 + $0xe0] sm:$0xff] }
 0x387   : > { %1767 = vst [vmem:[%s3513_s17 + $0x4e8] sm:$0xff] %v1383_v29  ;;  %1768 = vst [vmem:[%s3513_s17 + $0x4f0] sm:$0xff] %v1384_v52  ;;  %v1248_v43 = vmul.f32 %v2269_v42, %v3555_v8  ;;  %v1249_v59 = vmul.f32 %v2270_v44, %v3555_v8  ;;  %v1250_v47 = vmul.f32 %v2271_v57, %v3555_v8  ;;  %v2276_v29 = vld [vmem:[%s2973_s13 + $0xe8] sm:$0xff]  ;;  %v2277_v52 = vld [vmem:[%s2973_s13 + $0xf0] sm:$0xff] }
 0x388   : > { %1769 = vst [vmem:[%s3513_s17 + $0x4f8] sm:$0xff] %v1385_v53  ;;  %1610 = vst [vmem:[%s3513_s17] sm:$0xff] %v1226_v54  ;;  %v1251_v48 = vmul.f32 %v2272_v63, %v3555_v8  ;;  %v1252_v14 = vmul.f32 %v2273_v2, %v3555_v8  ;;  %v1253_v19 = vmul.f32 %v2274_v49, %v3555_v8  ;;  %v2303_v63 = vld [vmem:[%s2973_s13 + $0x1c0] sm:$0xff]  ;;  %v2304_v2 = vld [vmem:[%s2973_s13 + $0x1c8] sm:$0xff] }
 0x389   : > { %1611 = vst [vmem:[%s3513_s17 + $0x8] sm:$0xff] %v1227_v0  ;;  %1612 = vst [vmem:[%s3513_s17 + $0x10] sm:$0xff] %v1228_v46  ;;  %v1254_v24 = vmul.f32 %v2275_v50, %v3555_v8  ;;  %v1255_v51 = vmul.f32 %v2276_v29, %v3555_v8  ;;  %v1256_v53 = vmul.f32 %v2277_v52, %v3555_v8  ;;  %v2281_v46 = vld [vmem:[%s2973_s13 + $0x110] sm:$0xff]  ;;  %v2306_v50 = vld [vmem:[%s2973_s13 + $0x1d8] sm:$0xff] }
 0x38a   : > { %1613 = vst [vmem:[%s3513_s17 + $0x18] sm:$0xff] %v1229_v58  ;;  %1614 = vst [vmem:[%s3513_s17 + $0x20] sm:$0xff] %v1230_v61  ;;  %v1257_v54 = vmul.f32 %v2278_v39, %v3555_v8  ;;  %v1258_v0 = vmul.f32 %v2279_v55, %v3653_v45  ;;  %v1259_v8 = vmul.f32 %v2280_v34, %v3653_v45  ;;  %v2282_v58 = vld [vmem:[%s2973_s13 + $0x118] sm:$0xff]  ;;  %v2283_v61 = vld [vmem:[%s2973_s13 + $0x120] sm:$0xff] }
 0x38b   : > { %1615 = vst [vmem:[%s3513_s17 + $0x28] sm:$0xff] %v1231_v1  ;;  %1616 = vst [vmem:[%s3513_s17 + $0x30] sm:$0xff] %v1232_v4  ;;  %v1260_v56 = vmul.f32 %v2281_v46, %v3653_v45  ;;  %v1261_v60 = vmul.f32 %v2282_v58, %v3653_v45  ;;  %v1262_v62 = vmul.f32 %v2283_v61, %v3653_v45  ;;  %v2284_v1 = vld [vmem:[%s2973_s13 + $0x128] sm:$0xff]  ;;  %v2285_v4 = vld [vmem:[%s2973_s13 + $0x130] sm:$0xff] }
 0x38c   : > { %1617 = vst [vmem:[%s3513_s17 + $0x38] sm:$0xff] %v1233_v6  ;;  %1618 = vst [vmem:[%s3513_s17 + $0x40] sm:$0xff] %v1234_v9  ;;  %v1263_v3 = vmul.f32 %v2284_v1, %v3653_v45  ;;  %v1264_v5 = vmul.f32 %v2285_v4, %v3653_v45  ;;  %v2286_v6 = vld [vmem:[%s2973_s13 + $0x138] sm:$0xff]  ;;  %v2287_v9 = vld [vmem:[%s2973_s13 + $0x140] sm:$0xff] }
 0x38d   : > { %1619 = vst [vmem:[%s3513_s17 + $0x48] sm:$0xff] %v1235_v11  ;;  %1620 = vst [vmem:[%s3513_s17 + $0x50] sm:$0xff] %v1236_v13  ;;  %v1265_v7 = vmul.f32 %v2286_v6, %v3653_v45  ;;  %v1266_v10 = vmul.f32 %v2287_v9, %v3653_v45  ;;  %v2288_v11 = vld [vmem:[%s2973_s13 + $0x148] sm:$0xff]  ;;  %v2289_v13 = vld [vmem:[%s2973_s13 + $0x150] sm:$0xff] }
 0x38e   : > { %1621 = vst [vmem:[%s3513_s17 + $0x58] sm:$0xff] %v1237_v16  ;;  %1622 = vst [vmem:[%s3513_s17 + $0x60] sm:$0xff] %v1238_v18  ;;  %v1267_v12 = vmul.f32 %v2288_v11, %v3653_v45  ;;  %v1268_v15 = vmul.f32 %v2289_v13, %v3653_v45  ;;  %v2290_v16 = vld [vmem:[%s2973_s13 + $0x158] sm:$0xff]  ;;  %v2291_v18 = vld [vmem:[%s2973_s13 + $0x160] sm:$0xff] }
 0x38f   : > { %1623 = vst [vmem:[%s3513_s17 + $0x68] sm:$0xff] %v1239_v21  ;;  %1624 = vst [vmem:[%s3513_s17 + $0x70] sm:$0xff] %v1240_v23  ;;  %v1269_v17 = vmul.f32 %v2290_v16, %v3653_v45  ;;  %v1270_v20 = vmul.f32 %v2291_v18, %v3653_v45  ;;  %v2292_v21 = vld [vmem:[%s2973_s13 + $0x168] sm:$0xff]  ;;  %v2293_v23 = vld [vmem:[%s2973_s13 + $0x170] sm:$0xff] }
 0x390   : > { %1625 = vst [vmem:[%s3513_s17 + $0x78] sm:$0xff] %v1241_v26  ;;  %1626 = vst [vmem:[%s3513_s17 + $0x80] sm:$0xff] %v1242_v28  ;;  %v1271_v22 = vmul.f32 %v2292_v21, %v3653_v45  ;;  %v1272_v25 = vmul.f32 %v2293_v23, %v3653_v45  ;;  %v2294_v26 = vld [vmem:[%s2973_s13 + $0x178] sm:$0xff]  ;;  %v2295_v28 = vld [vmem:[%s2973_s13 + $0x180] sm:$0xff] }
 0x391   : > { %1627 = vst [vmem:[%s3513_s17 + $0x88] sm:$0xff] %v1243_v31  ;;  %1628 = vst [vmem:[%s3513_s17 + $0x90] sm:$0xff] %v1244_v33  ;;  %v1273_v27 = vmul.f32 %v2294_v26, %v3653_v45  ;;  %v1274_v30 = vmul.f32 %v2295_v28, %v3653_v45  ;;  %v2296_v31 = vld [vmem:[%s2973_s13 + $0x188] sm:$0xff]  ;;  %v2297_v33 = vld [vmem:[%s2973_s13 + $0x190] sm:$0xff] }
 0x392   : > { %1629 = vst [vmem:[%s3513_s17 + $0x98] sm:$0xff] %v1245_v36  ;;  %1630 = vst [vmem:[%s3513_s17 + $0xa0] sm:$0xff] %v1246_v38  ;;  %v1275_v32 = vmul.f32 %v2296_v31, %v3653_v45  ;;  %v1276_v35 = vmul.f32 %v2297_v33, %v3653_v45  ;;  %v2298_v36 = vld [vmem:[%s2973_s13 + $0x198] sm:$0xff]  ;;  %v2299_v38 = vld [vmem:[%s2973_s13 + $0x1a0] sm:$0xff] }
 0x393   : > { %1631 = vst [vmem:[%s3513_s17 + $0xa8] sm:$0xff] %v1247_v41  ;;  %1632 = vst [vmem:[%s3513_s17 + $0xb0] sm:$0xff] %v1248_v43  ;;  %v1277_v37 = vmul.f32 %v2298_v36, %v3653_v45  ;;  %v1278_v40 = vmul.f32 %v2299_v38, %v3653_v45  ;;  %v2300_v41 = vld [vmem:[%s2973_s13 + $0x1a8] sm:$0xff]  ;;  %v2301_v43 = vld [vmem:[%s2973_s13 + $0x1b0] sm:$0xff] }
 0x394   : > { %1633 = vst [vmem:[%s3513_s17 + $0xb8] sm:$0xff] %v1249_v59  ;;  %1634 = vst [vmem:[%s3513_s17 + $0xc0] sm:$0xff] %v1250_v47  ;;  %v1279_v42 = vmul.f32 %v2300_v41, %v3653_v45  ;;  %v1280_v44 = vmul.f32 %v2301_v43, %v3653_v45  ;;  %v2302_v59 = vld [vmem:[%s2973_s13 + $0x1b8] sm:$0xff]  ;;  %v3751_v47 = vpop.xlane.xlu0 %1197  ;;  %v2305_v49 = vld [vmem:[%s2973_s13 + $0x1d0] sm:$0xff] }
 0x395   : > { %1635 = vst [vmem:[%s3513_s17 + $0xc8] sm:$0xff] %v1251_v48  ;;  %1636 = vst [vmem:[%s3513_s17 + $0xd0] sm:$0xff] %v1252_v14  ;;  %v1281_v57 = vmul.f32 %v2302_v59, %v3653_v45  ;;  %v1282_v48 = vmul.f32 %v2303_v63, %v3653_v45  ;;  %v1283_v14 = vmul.f32 %v2304_v2, %v3653_v45  ;;  %v2307_v29 = vld [vmem:[%s2973_s13 + $0x1e0] sm:$0xff]  ;;  %v2308_v52 = vld [vmem:[%s2973_s13 + $0x1e8] sm:$0xff] }
 0x396   : > { %1637 = vst [vmem:[%s3513_s17 + $0xd8] sm:$0xff] %v1253_v19  ;;  %1638 = vst [vmem:[%s3513_s17 + $0xe0] sm:$0xff] %v1254_v24  ;;  %v1284_v19 = vmul.f32 %v2305_v49, %v3653_v45  ;;  %v1285_v24 = vmul.f32 %v2306_v50, %v3653_v45  ;;  %v2309_v39 = vld [vmem:[%s2973_s13 + $0x1f0] sm:$0xff]  ;;  %v2310_v55 = vld [vmem:[%s2973_s13 + $0x1f8] sm:$0xff] }
 0x397   : > { %1639 = vst [vmem:[%s3513_s17 + $0xe8] sm:$0xff] %v1255_v51  ;;  %1640 = vst [vmem:[%s3513_s17 + $0xf0] sm:$0xff] %v1256_v53  ;;  %v1286_v51 = vmul.f32 %v2307_v29, %v3653_v45  ;;  %v1287_v53 = vmul.f32 %v2308_v52, %v3653_v45  ;;  %v2311_v34 = vld [vmem:[%s2973_s13 + $0x200] sm:$0xff]  ;;  %v2312_v46 = vld [vmem:[%s2973_s13 + $0x208] sm:$0xff] }
 0x398   : > { %1641 = vst [vmem:[%s3513_s17 + $0xf8] sm:$0xff] %v1257_v54  ;;  %1642 = vst [vmem:[%s3513_s17 + $0x100] sm:$0xff] %v1258_v0  ;;  %v1288_v54 = vmul.f32 %v2309_v39, %v3653_v45  ;;  %v1289_v0 = vmul.f32 %v2310_v55, %v3653_v45  ;;  %v1291_v45 = vmul.f32 %v2312_v46, %v3751_v47  ;;  %v2335_v2 = vld [vmem:[%s2973_s13 + $0x2c0] sm:$0xff]  ;;  %v2336_v49 = vld [vmem:[%s2973_s13 + $0x2c8] sm:$0xff] }
 0x399   : > { %1643 = vst [vmem:[%s3513_s17 + $0x108] sm:$0xff] %v1259_v8  ;;  %1644 = vst [vmem:[%s3513_s17 + $0x110] sm:$0xff] %v1260_v56  ;;  %v1290_v8 = vmul.f32 %v2311_v34, %v3751_v47  ;;  %v2313_v56 = vld [vmem:[%s2973_s13 + $0x210] sm:$0xff]  ;;  %v2338_v29 = vld [vmem:[%s2973_s13 + $0x2d8] sm:$0xff] }
 0x39a   : > { %1645 = vst [vmem:[%s3513_s17 + $0x118] sm:$0xff] %v1261_v60  ;;  %1646 = vst [vmem:[%s3513_s17 + $0x120] sm:$0xff] %v1262_v62  ;;  %v1292_v58 = vmul.f32 %v2313_v56, %v3751_v47  ;;  %v2314_v60 = vld [vmem:[%s2973_s13 + $0x218] sm:$0xff]  ;;  %v2315_v62 = vld [vmem:[%s2973_s13 + $0x220] sm:$0xff] }
 0x39b   : > { %1647 = vst [vmem:[%s3513_s17 + $0x128] sm:$0xff] %v1263_v3  ;;  %1648 = vst [vmem:[%s3513_s17 + $0x130] sm:$0xff] %v1264_v5  ;;  %v1293_v61 = vmul.f32 %v2314_v60, %v3751_v47  ;;  %v1294_v1 = vmul.f32 %v2315_v62, %v3751_v47  ;;  %v2316_v3 = vld [vmem:[%s2973_s13 + $0x228] sm:$0xff]  ;;  %v2317_v5 = vld [vmem:[%s2973_s13 + $0x230] sm:$0xff] }
 0x39c   : > { %1649 = vst [vmem:[%s3513_s17 + $0x138] sm:$0xff] %v1265_v7  ;;  %1650 = vst [vmem:[%s3513_s17 + $0x140] sm:$0xff] %v1266_v10  ;;  %v1295_v4 = vmul.f32 %v2316_v3, %v3751_v47  ;;  %v1296_v6 = vmul.f32 %v2317_v5, %v3751_v47  ;;  %v2318_v7 = vld [vmem:[%s2973_s13 + $0x238] sm:$0xff]  ;;  %v2319_v10 = vld [vmem:[%s2973_s13 + $0x240] sm:$0xff] }
 0x39d   : > { %1651 = vst [vmem:[%s3513_s17 + $0x148] sm:$0xff] %v1267_v12  ;;  %1652 = vst [vmem:[%s3513_s17 + $0x150] sm:$0xff] %v1268_v15  ;;  %v1297_v9 = vmul.f32 %v2318_v7, %v3751_v47  ;;  %v1298_v11 = vmul.f32 %v2319_v10, %v3751_v47  ;;  %v2320_v12 = vld [vmem:[%s2973_s13 + $0x248] sm:$0xff]  ;;  %v2321_v15 = vld [vmem:[%s2973_s13 + $0x250] sm:$0xff] }
 0x39e   : > { %1653 = vst [vmem:[%s3513_s17 + $0x158] sm:$0xff] %v1269_v17  ;;  %1654 = vst [vmem:[%s3513_s17 + $0x160] sm:$0xff] %v1270_v20  ;;  %v1299_v13 = vmul.f32 %v2320_v12, %v3751_v47  ;;  %v1300_v16 = vmul.f32 %v2321_v15, %v3751_v47  ;;  %v2322_v17 = vld [vmem:[%s2973_s13 + $0x258] sm:$0xff]  ;;  %v2323_v20 = vld [vmem:[%s2973_s13 + $0x260] sm:$0xff] }
 0x39f   : > { %1655 = vst [vmem:[%s3513_s17 + $0x168] sm:$0xff] %v1271_v22  ;;  %1656 = vst [vmem:[%s3513_s17 + $0x170] sm:$0xff] %v1272_v25  ;;  %v1301_v18 = vmul.f32 %v2322_v17, %v3751_v47  ;;  %v1302_v21 = vmul.f32 %v2323_v20, %v3751_v47  ;;  %v2324_v22 = vld [vmem:[%s2973_s13 + $0x268] sm:$0xff]  ;;  %v2325_v25 = vld [vmem:[%s2973_s13 + $0x270] sm:$0xff] }
 0x3a0   : > { %1657 = vst [vmem:[%s3513_s17 + $0x178] sm:$0xff] %v1273_v27  ;;  %1658 = vst [vmem:[%s3513_s17 + $0x180] sm:$0xff] %v1274_v30  ;;  %v1303_v23 = vmul.f32 %v2324_v22, %v3751_v47  ;;  %v1304_v26 = vmul.f32 %v2325_v25, %v3751_v47  ;;  %v2326_v27 = vld [vmem:[%s2973_s13 + $0x278] sm:$0xff]  ;;  %v2327_v30 = vld [vmem:[%s2973_s13 + $0x280] sm:$0xff] }
 0x3a1   : > { %1659 = vst [vmem:[%s3513_s17 + $0x188] sm:$0xff] %v1275_v32  ;;  %1660 = vst [vmem:[%s3513_s17 + $0x190] sm:$0xff] %v1276_v35  ;;  %v1305_v28 = vmul.f32 %v2326_v27, %v3751_v47  ;;  %v1306_v31 = vmul.f32 %v2327_v30, %v3751_v47  ;;  %v2328_v32 = vld [vmem:[%s2973_s13 + $0x288] sm:$0xff]  ;;  %v2329_v35 = vld [vmem:[%s2973_s13 + $0x290] sm:$0xff] }
 0x3a2   : > { %1661 = vst [vmem:[%s3513_s17 + $0x198] sm:$0xff] %v1277_v37  ;;  %1662 = vst [vmem:[%s3513_s17 + $0x1a0] sm:$0xff] %v1278_v40  ;;  %v1307_v33 = vmul.f32 %v2328_v32, %v3751_v47  ;;  %v1308_v36 = vmul.f32 %v2329_v35, %v3751_v47  ;;  %v2330_v37 = vld [vmem:[%s2973_s13 + $0x298] sm:$0xff]  ;;  %v2331_v40 = vld [vmem:[%s2973_s13 + $0x2a0] sm:$0xff] }
 0x3a3   : > { %1663 = vst [vmem:[%s3513_s17 + $0x1a8] sm:$0xff] %v1279_v42  ;;  %1664 = vst [vmem:[%s3513_s17 + $0x1b0] sm:$0xff] %v1280_v44  ;;  %v1309_v38 = vmul.f32 %v2330_v37, %v3751_v47  ;;  %v1310_v41 = vmul.f32 %v2331_v40, %v3751_v47  ;;  %v2332_v42 = vld [vmem:[%s2973_s13 + $0x2a8] sm:$0xff]  ;;  %v2333_v44 = vld [vmem:[%s2973_s13 + $0x2b0] sm:$0xff] }
 0x3a4   : > { %1665 = vst [vmem:[%s3513_s17 + $0x1b8] sm:$0xff] %v1281_v57  ;;  %1666 = vst [vmem:[%s3513_s17 + $0x1c0] sm:$0xff] %v1282_v48  ;;  %v1311_v43 = vmul.f32 %v2332_v42, %v3751_v47  ;;  %v1312_v59 = vmul.f32 %v2333_v44, %v3751_v47  ;;  %v2334_v57 = vld [vmem:[%s2973_s13 + $0x2b8] sm:$0xff]  ;;  %v3849_v48 = vpop.xlane.xlu0 %1200  ;;  %v2337_v50 = vld [vmem:[%s2973_s13 + $0x2d0] sm:$0xff] }
 0x3a5   : > { %1667 = vst [vmem:[%s3513_s17 + $0x1c8] sm:$0xff] %v1283_v14  ;;  %1668 = vst [vmem:[%s3513_s17 + $0x1d0] sm:$0xff] %v1284_v19  ;;  %v1313_v63 = vmul.f32 %v2334_v57, %v3751_v47  ;;  %v1314_v14 = vmul.f32 %v2335_v2, %v3751_v47  ;;  %v1315_v19 = vmul.f32 %v2336_v49, %v3751_v47  ;;  %v2339_v52 = vld [vmem:[%s2973_s13 + $0x2e0] sm:$0xff]  ;;  %v2340_v39 = vld [vmem:[%s2973_s13 + $0x2e8] sm:$0xff] }
 0x3a6   : > { %1669 = vst [vmem:[%s3513_s17 + $0x1d8] sm:$0xff] %v1285_v24  ;;  %1670 = vst [vmem:[%s3513_s17 + $0x1e0] sm:$0xff] %v1286_v51  ;;  %v1316_v24 = vmul.f32 %v2337_v50, %v3751_v47  ;;  %v1317_v51 = vmul.f32 %v2338_v29, %v3751_v47  ;;  %v2341_v55 = vld [vmem:[%s2973_s13 + $0x2f0] sm:$0xff]  ;;  %v2342_v34 = vld [vmem:[%s2973_s13 + $0x2f8] sm:$0xff] }
 0x3a7   : > { %1671 = vst [vmem:[%s3513_s17 + $0x1e8] sm:$0xff] %v1287_v53  ;;  %1672 = vst [vmem:[%s3513_s17 + $0x1f0] sm:$0xff] %v1288_v54  ;;  %v1318_v53 = vmul.f32 %v2339_v52, %v3751_v47  ;;  %v1319_v54 = vmul.f32 %v2340_v39, %v3751_v47  ;;  %v2343_v46 = vld [vmem:[%s2973_s13 + $0x300] sm:$0xff]  ;;  %v2344_v56 = vld [vmem:[%s2973_s13 + $0x308] sm:$0xff] }
 0x3a8   : > { %1673 = vst [vmem:[%s3513_s17 + $0x1f8] sm:$0xff] %v1289_v0  ;;  %1674 = vst [vmem:[%s3513_s17 + $0x200] sm:$0xff] %v1290_v8  ;;  %v1320_v0 = vmul.f32 %v2341_v55, %v3751_v47  ;;  %v1321_v8 = vmul.f32 %v2342_v34, %v3751_v47  ;;  %v1323_v47 = vmul.f32 %v2344_v56, %v3849_v48  ;;  %v2367_v49 = vld [vmem:[%s2973_s13 + $0x3c0] sm:$0xff]  ;;  %v2368_v50 = vld [vmem:[%s2973_s13 + $0x3c8] sm:$0xff] }
 0x3a9   : > { %1675 = vst [vmem:[%s3513_s17 + $0x208] sm:$0xff] %v1291_v45  ;;  %1676 = vst [vmem:[%s3513_s17 + $0x210] sm:$0xff] %v1292_v58  ;;  %v1322_v45 = vmul.f32 %v2343_v46, %v3849_v48  ;;  %v2345_v58 = vld [vmem:[%s2973_s13 + $0x310] sm:$0xff]  ;;  %v2370_v52 = vld [vmem:[%s2973_s13 + $0x3d8] sm:$0xff] }
 0x3aa   : > { %1677 = vst [vmem:[%s3513_s17 + $0x218] sm:$0xff] %v1293_v61  ;;  %1678 = vst [vmem:[%s3513_s17 + $0x220] sm:$0xff] %v1294_v1  ;;  %v1324_v60 = vmul.f32 %v2345_v58, %v3849_v48  ;;  %v2346_v61 = vld [vmem:[%s2973_s13 + $0x318] sm:$0xff]  ;;  %v2347_v1 = vld [vmem:[%s2973_s13 + $0x320] sm:$0xff] }
 0x3ab   : > { %1679 = vst [vmem:[%s3513_s17 + $0x228] sm:$0xff] %v1295_v4  ;;  %1680 = vst [vmem:[%s3513_s17 + $0x230] sm:$0xff] %v1296_v6  ;;  %v1325_v62 = vmul.f32 %v2346_v61, %v3849_v48  ;;  %v1326_v3 = vmul.f32 %v2347_v1, %v3849_v48  ;;  %v2348_v4 = vld [vmem:[%s2973_s13 + $0x328] sm:$0xff]  ;;  %v2349_v6 = vld [vmem:[%s2973_s13 + $0x330] sm:$0xff] }
 0x3ac   : > { %1681 = vst [vmem:[%s3513_s17 + $0x238] sm:$0xff] %v1297_v9  ;;  %1682 = vst [vmem:[%s3513_s17 + $0x240] sm:$0xff] %v1298_v11  ;;  %v1327_v5 = vmul.f32 %v2348_v4, %v3849_v48  ;;  %v1328_v7 = vmul.f32 %v2349_v6, %v3849_v48  ;;  %v2350_v9 = vld [vmem:[%s2973_s13 + $0x338] sm:$0xff]  ;;  %v2351_v11 = vld [vmem:[%s2973_s13 + $0x340] sm:$0xff] }
 0x3ad   : > { %1683 = vst [vmem:[%s3513_s17 + $0x248] sm:$0xff] %v1299_v13  ;;  %1684 = vst [vmem:[%s3513_s17 + $0x250] sm:$0xff] %v1300_v16  ;;  %v1329_v10 = vmul.f32 %v2350_v9, %v3849_v48  ;;  %v1330_v12 = vmul.f32 %v2351_v11, %v3849_v48  ;;  %v2352_v13 = vld [vmem:[%s2973_s13 + $0x348] sm:$0xff]  ;;  %v2353_v16 = vld [vmem:[%s2973_s13 + $0x350] sm:$0xff] }
 0x3ae   : > { %1685 = vst [vmem:[%s3513_s17 + $0x258] sm:$0xff] %v1301_v18  ;;  %1686 = vst [vmem:[%s3513_s17 + $0x260] sm:$0xff] %v1302_v21  ;;  %v1331_v15 = vmul.f32 %v2352_v13, %v3849_v48  ;;  %v1332_v17 = vmul.f32 %v2353_v16, %v3849_v48  ;;  %v2354_v18 = vld [vmem:[%s2973_s13 + $0x358] sm:$0xff]  ;;  %v2355_v21 = vld [vmem:[%s2973_s13 + $0x360] sm:$0xff] }
 0x3af   : > { %1687 = vst [vmem:[%s3513_s17 + $0x268] sm:$0xff] %v1303_v23  ;;  %1688 = vst [vmem:[%s3513_s17 + $0x270] sm:$0xff] %v1304_v26  ;;  %v1333_v20 = vmul.f32 %v2354_v18, %v3849_v48  ;;  %v1334_v22 = vmul.f32 %v2355_v21, %v3849_v48  ;;  %v2356_v23 = vld [vmem:[%s2973_s13 + $0x368] sm:$0xff]  ;;  %v2357_v26 = vld [vmem:[%s2973_s13 + $0x370] sm:$0xff] }
 0x3b0   : > { %1689 = vst [vmem:[%s3513_s17 + $0x278] sm:$0xff] %v1305_v28  ;;  %1690 = vst [vmem:[%s3513_s17 + $0x280] sm:$0xff] %v1306_v31  ;;  %v1335_v25 = vmul.f32 %v2356_v23, %v3849_v48  ;;  %v1336_v27 = vmul.f32 %v2357_v26, %v3849_v48  ;;  %v2358_v28 = vld [vmem:[%s2973_s13 + $0x378] sm:$0xff]  ;;  %v2359_v31 = vld [vmem:[%s2973_s13 + $0x380] sm:$0xff] }
 0x3b1   : > { %1691 = vst [vmem:[%s3513_s17 + $0x288] sm:$0xff] %v1307_v33  ;;  %1692 = vst [vmem:[%s3513_s17 + $0x290] sm:$0xff] %v1308_v36  ;;  %v1337_v30 = vmul.f32 %v2358_v28, %v3849_v48  ;;  %v1338_v32 = vmul.f32 %v2359_v31, %v3849_v48  ;;  %v2360_v33 = vld [vmem:[%s2973_s13 + $0x388] sm:$0xff]  ;;  %v2361_v36 = vld [vmem:[%s2973_s13 + $0x390] sm:$0xff] }
 0x3b2   : > { %1693 = vst [vmem:[%s3513_s17 + $0x298] sm:$0xff] %v1309_v38  ;;  %1694 = vst [vmem:[%s3513_s17 + $0x2a0] sm:$0xff] %v1310_v41  ;;  %v1339_v35 = vmul.f32 %v2360_v33, %v3849_v48  ;;  %v1340_v37 = vmul.f32 %v2361_v36, %v3849_v48  ;;  %v2362_v38 = vld [vmem:[%s2973_s13 + $0x398] sm:$0xff]  ;;  %v2363_v41 = vld [vmem:[%s2973_s13 + $0x3a0] sm:$0xff] }
 0x3b3   : > { %1695 = vst [vmem:[%s3513_s17 + $0x2a8] sm:$0xff] %v1311_v43  ;;  %1696 = vst [vmem:[%s3513_s17 + $0x2b0] sm:$0xff] %v1312_v59  ;;  %v1341_v40 = vmul.f32 %v2362_v38, %v3849_v48  ;;  %v1342_v42 = vmul.f32 %v2363_v41, %v3849_v48  ;;  %v2364_v43 = vld [vmem:[%s2973_s13 + $0x3a8] sm:$0xff]  ;;  %v2365_v59 = vld [vmem:[%s2973_s13 + $0x3b0] sm:$0xff] }
 0x3b4   : > { %1697 = vst [vmem:[%s3513_s17 + $0x2b8] sm:$0xff] %v1313_v63  ;;  %1698 = vst [vmem:[%s3513_s17 + $0x2c0] sm:$0xff] %v1314_v14  ;;  %v1343_v44 = vmul.f32 %v2364_v43, %v3849_v48  ;;  %v1344_v57 = vmul.f32 %v2365_v59, %v3849_v48  ;;  %v2366_v63 = vld [vmem:[%s2973_s13 + $0x3b8] sm:$0xff]  ;;  %v3947_v14 = vpop.xlane.xlu0 %1206  ;;  %v2369_v29 = vld [vmem:[%s2973_s13 + $0x3d0] sm:$0xff] }
 0x3b5   : > { %1699 = vst [vmem:[%s3513_s17 + $0x2c8] sm:$0xff] %v1315_v19  ;;  %1700 = vst [vmem:[%s3513_s17 + $0x2d0] sm:$0xff] %v1316_v24  ;;  %v1345_v2 = vmul.f32 %v2366_v63, %v3849_v48  ;;  %v1346_v19 = vmul.f32 %v2367_v49, %v3849_v48  ;;  %v1347_v24 = vmul.f32 %v2368_v50, %v3849_v48  ;;  %v2371_v39 = vld [vmem:[%s2973_s13 + $0x3e0] sm:$0xff]  ;;  %v2372_v55 = vld [vmem:[%s2973_s13 + $0x3e8] sm:$0xff] }
 0x3b6   : > { %1701 = vst [vmem:[%s3513_s17 + $0x2d8] sm:$0xff] %v1317_v51  ;;  %1702 = vst [vmem:[%s3513_s17 + $0x2e0] sm:$0xff] %v1318_v53  ;;  %v1348_v51 = vmul.f32 %v2369_v29, %v3849_v48  ;;  %v1349_v53 = vmul.f32 %v2370_v52, %v3849_v48  ;;  %v2373_v34 = vld [vmem:[%s2973_s13 + $0x3f0] sm:$0xff]  ;;  %v2374_v46 = vld [vmem:[%s2973_s13 + $0x3f8] sm:$0xff] }
 0x3b7   : > { %1703 = vst [vmem:[%s3513_s17 + $0x2e8] sm:$0xff] %v1319_v54  ;;  %1704 = vst [vmem:[%s3513_s17 + $0x2f0] sm:$0xff] %v1320_v0  ;;  %v1350_v54 = vmul.f32 %v2371_v39, %v3849_v48  ;;  %v1351_v0 = vmul.f32 %v2372_v55, %v3849_v48  ;;  %v2375_v56 = vld [vmem:[%s2973_s13 + $0x500] sm:$0xff]  ;;  %v2376_v58 = vld [vmem:[%s2973_s13 + $0x508] sm:$0xff] }
 0x3b8   : > { %1705 = vst [vmem:[%s3513_s17 + $0x2f8] sm:$0xff] %v1321_v8  ;;  %1706 = vst [vmem:[%s3513_s17 + $0x300] sm:$0xff] %v1322_v45  ;;  %v1352_v8 = vmul.f32 %v2373_v34, %v3849_v48  ;;  %v1353_v45 = vmul.f32 %v2374_v46, %v3849_v48  ;;  %v1387_v48 = vmul.f32 %v2376_v58, %v3947_v14  ;;  %v2399_v50 = vld [vmem:[%s2973_s13 + $0x5c0] sm:$0xff]  ;;  %v2400_v29 = vld [vmem:[%s2973_s13 + $0x5c8] sm:$0xff] }
 0x3b9   : > { %1707 = vst [vmem:[%s3513_s17 + $0x308] sm:$0xff] %v1323_v47  ;;  %1708 = vst [vmem:[%s3513_s17 + $0x310] sm:$0xff] %v1324_v60  ;;  %v1386_v47 = vmul.f32 %v2375_v56, %v3947_v14  ;;  %v2377_v60 = vld [vmem:[%s2973_s13 + $0x510] sm:$0xff]  ;;  %v2402_v39 = vld [vmem:[%s2973_s13 + $0x5d8] sm:$0xff] }
 0x3ba   : > { %1709 = vst [vmem:[%s3513_s17 + $0x318] sm:$0xff] %v1325_v62  ;;  %1710 = vst [vmem:[%s3513_s17 + $0x320] sm:$0xff] %v1326_v3  ;;  %v1388_v61 = vmul.f32 %v2377_v60, %v3947_v14  ;;  %v2378_v62 = vld [vmem:[%s2973_s13 + $0x518] sm:$0xff]  ;;  %v2379_v3 = vld [vmem:[%s2973_s13 + $0x520] sm:$0xff] }
 0x3bb   : > { %1711 = vst [vmem:[%s3513_s17 + $0x328] sm:$0xff] %v1327_v5  ;;  %1712 = vst [vmem:[%s3513_s17 + $0x330] sm:$0xff] %v1328_v7  ;;  %v1389_v1 = vmul.f32 %v2378_v62, %v3947_v14  ;;  %v1390_v4 = vmul.f32 %v2379_v3, %v3947_v14  ;;  %v2380_v5 = vld [vmem:[%s2973_s13 + $0x528] sm:$0xff]  ;;  %v2381_v7 = vld [vmem:[%s2973_s13 + $0x530] sm:$0xff] }
 0x3bc   : > { %1713 = vst [vmem:[%s3513_s17 + $0x338] sm:$0xff] %v1329_v10  ;;  %1714 = vst [vmem:[%s3513_s17 + $0x340] sm:$0xff] %v1330_v12  ;;  %v1391_v6 = vmul.f32 %v2380_v5, %v3947_v14  ;;  %v1392_v9 = vmul.f32 %v2381_v7, %v3947_v14  ;;  %v2382_v10 = vld [vmem:[%s2973_s13 + $0x538] sm:$0xff]  ;;  %v2383_v12 = vld [vmem:[%s2973_s13 + $0x540] sm:$0xff] }
 0x3bd   : > { %1715 = vst [vmem:[%s3513_s17 + $0x348] sm:$0xff] %v1331_v15  ;;  %1716 = vst [vmem:[%s3513_s17 + $0x350] sm:$0xff] %v1332_v17  ;;  %v1393_v11 = vmul.f32 %v2382_v10, %v3947_v14  ;;  %v1394_v13 = vmul.f32 %v2383_v12, %v3947_v14  ;;  %v2384_v15 = vld [vmem:[%s2973_s13 + $0x548] sm:$0xff]  ;;  %v2385_v17 = vld [vmem:[%s2973_s13 + $0x550] sm:$0xff] }
 0x3be   : > { %1717 = vst [vmem:[%s3513_s17 + $0x358] sm:$0xff] %v1333_v20  ;;  %1718 = vst [vmem:[%s3513_s17 + $0x360] sm:$0xff] %v1334_v22  ;;  %v1395_v16 = vmul.f32 %v2384_v15, %v3947_v14  ;;  %v1396_v18 = vmul.f32 %v2385_v17, %v3947_v14  ;;  %v2386_v20 = vld [vmem:[%s2973_s13 + $0x558] sm:$0xff]  ;;  %v2387_v22 = vld [vmem:[%s2973_s13 + $0x560] sm:$0xff] }
 0x3bf   : > { %1719 = vst [vmem:[%s3513_s17 + $0x368] sm:$0xff] %v1335_v25  ;;  %1720 = vst [vmem:[%s3513_s17 + $0x370] sm:$0xff] %v1336_v27  ;;  %v1397_v21 = vmul.f32 %v2386_v20, %v3947_v14  ;;  %v1398_v23 = vmul.f32 %v2387_v22, %v3947_v14  ;;  %v2388_v25 = vld [vmem:[%s2973_s13 + $0x568] sm:$0xff]  ;;  %v2389_v27 = vld [vmem:[%s2973_s13 + $0x570] sm:$0xff] }
 0x3c0   : > { %1721 = vst [vmem:[%s3513_s17 + $0x378] sm:$0xff] %v1337_v30  ;;  %1722 = vst [vmem:[%s3513_s17 + $0x380] sm:$0xff] %v1338_v32  ;;  %v1399_v26 = vmul.f32 %v2388_v25, %v3947_v14  ;;  %v1400_v28 = vmul.f32 %v2389_v27, %v3947_v14  ;;  %v2390_v30 = vld [vmem:[%s2973_s13 + $0x578] sm:$0xff]  ;;  %v2391_v32 = vld [vmem:[%s2973_s13 + $0x580] sm:$0xff] }
 0x3c1   : > { %1723 = vst [vmem:[%s3513_s17 + $0x388] sm:$0xff] %v1339_v35  ;;  %1724 = vst [vmem:[%s3513_s17 + $0x390] sm:$0xff] %v1340_v37  ;;  %v1401_v31 = vmul.f32 %v2390_v30, %v3947_v14  ;;  %v1402_v33 = vmul.f32 %v2391_v32, %v3947_v14  ;;  %v2392_v35 = vld [vmem:[%s2973_s13 + $0x588] sm:$0xff]  ;;  %v2393_v37 = vld [vmem:[%s2973_s13 + $0x590] sm:$0xff] }
 0x3c2   : > { %1725 = vst [vmem:[%s3513_s17 + $0x398] sm:$0xff] %v1341_v40  ;;  %1726 = vst [vmem:[%s3513_s17 + $0x3a0] sm:$0xff] %v1342_v42  ;;  %v1403_v36 = vmul.f32 %v2392_v35, %v3947_v14  ;;  %v1404_v38 = vmul.f32 %v2393_v37, %v3947_v14  ;;  %v2394_v40 = vld [vmem:[%s2973_s13 + $0x598] sm:$0xff]  ;;  %v2395_v42 = vld [vmem:[%s2973_s13 + $0x5a0] sm:$0xff] }
 0x3c3   : > { %1727 = vst [vmem:[%s3513_s17 + $0x3a8] sm:$0xff] %v1343_v44  ;;  %1728 = vst [vmem:[%s3513_s17 + $0x3b0] sm:$0xff] %v1344_v57  ;;  %v1405_v41 = vmul.f32 %v2394_v40, %v3947_v14  ;;  %v1406_v43 = vmul.f32 %v2395_v42, %v3947_v14  ;;  %v2396_v44 = vld [vmem:[%s2973_s13 + $0x5a8] sm:$0xff]  ;;  %v2397_v57 = vld [vmem:[%s2973_s13 + $0x5b0] sm:$0xff] }
 0x3c4   : > { %1729 = vst [vmem:[%s3513_s17 + $0x3b8] sm:$0xff] %v1345_v2  ;;  %1730 = vst [vmem:[%s3513_s17 + $0x3c0] sm:$0xff] %v1346_v19  ;;  %v1407_v59 = vmul.f32 %v2396_v44, %v3947_v14  ;;  %v1408_v63 = vmul.f32 %v2397_v57, %v3947_v14  ;;  %v2398_v2 = vld [vmem:[%s2973_s13 + $0x5b8] sm:$0xff]  ;;  %v4045_v19 = vpop.xlane.xlu0 %1209  ;;  %v2401_v52 = vld [vmem:[%s2973_s13 + $0x5d0] sm:$0xff] }
 0x3c5   : > { %1731 = vst [vmem:[%s3513_s17 + $0x3c8] sm:$0xff] %v1347_v24  ;;  %1732 = vst [vmem:[%s3513_s17 + $0x3d0] sm:$0xff] %v1348_v51  ;;  %v1409_v49 = vmul.f32 %v2398_v2, %v3947_v14  ;;  %v1410_v24 = vmul.f32 %v2399_v50, %v3947_v14  ;;  %v1411_v51 = vmul.f32 %v2400_v29, %v3947_v14  ;;  %v2403_v55 = vld [vmem:[%s2973_s13 + $0x5e0] sm:$0xff]  ;;  %v2404_v34 = vld [vmem:[%s2973_s13 + $0x5e8] sm:$0xff] }
 0x3c6   : > { %1733 = vst [vmem:[%s3513_s17 + $0x3d8] sm:$0xff] %v1349_v53  ;;  %1734 = vst [vmem:[%s3513_s17 + $0x3e0] sm:$0xff] %v1350_v54  ;;  %v1412_v53 = vmul.f32 %v2401_v52, %v3947_v14  ;;  %v1413_v54 = vmul.f32 %v2402_v39, %v3947_v14  ;;  %v2405_v46 = vld [vmem:[%s2973_s13 + $0x5f0] sm:$0xff]  ;;  %v2406_v56 = vld [vmem:[%s2973_s13 + $0x5f8] sm:$0xff] }
 0x3c7   : > { %1735 = vst [vmem:[%s3513_s17 + $0x3e8] sm:$0xff] %v1351_v0  ;;  %1736 = vst [vmem:[%s3513_s17 + $0x3f0] sm:$0xff] %v1352_v8  ;;  %v1414_v0 = vmul.f32 %v2403_v55, %v3947_v14  ;;  %v1415_v8 = vmul.f32 %v2404_v34, %v3947_v14  ;;  %v2407_v58 = vld [vmem:[%s2973_s13 + $0x600] sm:$0xff]  ;;  %v2408_v60 = vld [vmem:[%s2973_s13 + $0x608] sm:$0xff] }
 0x3c8   : > { %1737 = vst [vmem:[%s3513_s17 + $0x3f8] sm:$0xff] %v1353_v45  ;;  %1770 = vst [vmem:[%s3513_s17 + $0x500] sm:$0xff] %v1386_v47  ;;  %v1416_v45 = vmul.f32 %v2405_v46, %v3947_v14  ;;  %v1417_v47 = vmul.f32 %v2406_v56, %v3947_v14  ;;  %v1419_v14 = vmul.f32 %v2408_v60, %v4045_v19  ;;  %v2431_v29 = vld [vmem:[%s2973_s13 + $0x6c0] sm:$0xff]  ;;  %v2432_v52 = vld [vmem:[%s2973_s13 + $0x6c8] sm:$0xff] }
 0x3c9   : > { %1771 = vst [vmem:[%s3513_s17 + $0x508] sm:$0xff] %v1387_v48  ;;  %1772 = vst [vmem:[%s3513_s17 + $0x510] sm:$0xff] %v1388_v61  ;;  %v1418_v48 = vmul.f32 %v2407_v58, %v4045_v19  ;;  %v2409_v61 = vld [vmem:[%s2973_s13 + $0x610] sm:$0xff]  ;;  %v2434_v55 = vld [vmem:[%s2973_s13 + $0x6d8] sm:$0xff] }
 0x3ca   : > { %1773 = vst [vmem:[%s3513_s17 + $0x518] sm:$0xff] %v1389_v1  ;;  %1774 = vst [vmem:[%s3513_s17 + $0x520] sm:$0xff] %v1390_v4  ;;  %v1420_v62 = vmul.f32 %v2409_v61, %v4045_v19  ;;  %v2410_v1 = vld [vmem:[%s2973_s13 + $0x618] sm:$0xff]  ;;  %v2411_v4 = vld [vmem:[%s2973_s13 + $0x620] sm:$0xff] }
 0x3cb   : > { %1775 = vst [vmem:[%s3513_s17 + $0x528] sm:$0xff] %v1391_v6  ;;  %1776 = vst [vmem:[%s3513_s17 + $0x530] sm:$0xff] %v1392_v9  ;;  %v1421_v3 = vmul.f32 %v2410_v1, %v4045_v19  ;;  %v1422_v5 = vmul.f32 %v2411_v4, %v4045_v19  ;;  %v2412_v6 = vld [vmem:[%s2973_s13 + $0x628] sm:$0xff]  ;;  %v2413_v9 = vld [vmem:[%s2973_s13 + $0x630] sm:$0xff] }
 0x3cc   : > { %1777 = vst [vmem:[%s3513_s17 + $0x538] sm:$0xff] %v1393_v11  ;;  %1778 = vst [vmem:[%s3513_s17 + $0x540] sm:$0xff] %v1394_v13  ;;  %v1423_v7 = vmul.f32 %v2412_v6, %v4045_v19  ;;  %v1424_v10 = vmul.f32 %v2413_v9, %v4045_v19  ;;  %v2414_v11 = vld [vmem:[%s2973_s13 + $0x638] sm:$0xff]  ;;  %v2415_v13 = vld [vmem:[%s2973_s13 + $0x640] sm:$0xff] }
 0x3cd   : > { %1779 = vst [vmem:[%s3513_s17 + $0x548] sm:$0xff] %v1395_v16  ;;  %1780 = vst [vmem:[%s3513_s17 + $0x550] sm:$0xff] %v1396_v18  ;;  %v1425_v12 = vmul.f32 %v2414_v11, %v4045_v19  ;;  %v1426_v15 = vmul.f32 %v2415_v13, %v4045_v19  ;;  %v2416_v16 = vld [vmem:[%s2973_s13 + $0x648] sm:$0xff]  ;;  %v2417_v18 = vld [vmem:[%s2973_s13 + $0x650] sm:$0xff] }
 0x3ce   : > { %1781 = vst [vmem:[%s3513_s17 + $0x558] sm:$0xff] %v1397_v21  ;;  %1782 = vst [vmem:[%s3513_s17 + $0x560] sm:$0xff] %v1398_v23  ;;  %v1427_v17 = vmul.f32 %v2416_v16, %v4045_v19  ;;  %v1428_v20 = vmul.f32 %v2417_v18, %v4045_v19  ;;  %v2418_v21 = vld [vmem:[%s2973_s13 + $0x658] sm:$0xff]  ;;  %v2419_v23 = vld [vmem:[%s2973_s13 + $0x660] sm:$0xff] }
 0x3cf   : > { %1783 = vst [vmem:[%s3513_s17 + $0x568] sm:$0xff] %v1399_v26  ;;  %1784 = vst [vmem:[%s3513_s17 + $0x570] sm:$0xff] %v1400_v28  ;;  %v1429_v22 = vmul.f32 %v2418_v21, %v4045_v19  ;;  %v1430_v25 = vmul.f32 %v2419_v23, %v4045_v19  ;;  %v2420_v26 = vld [vmem:[%s2973_s13 + $0x668] sm:$0xff]  ;;  %v2421_v28 = vld [vmem:[%s2973_s13 + $0x670] sm:$0xff] }
 0x3d0   : > { %1785 = vst [vmem:[%s3513_s17 + $0x578] sm:$0xff] %v1401_v31  ;;  %1786 = vst [vmem:[%s3513_s17 + $0x580] sm:$0xff] %v1402_v33  ;;  %v1431_v27 = vmul.f32 %v2420_v26, %v4045_v19  ;;  %v1432_v30 = vmul.f32 %v2421_v28, %v4045_v19  ;;  %v2422_v31 = vld [vmem:[%s2973_s13 + $0x678] sm:$0xff]  ;;  %v2423_v33 = vld [vmem:[%s2973_s13 + $0x680] sm:$0xff] }
 0x3d1   : > { %1787 = vst [vmem:[%s3513_s17 + $0x588] sm:$0xff] %v1403_v36  ;;  %1788 = vst [vmem:[%s3513_s17 + $0x590] sm:$0xff] %v1404_v38  ;;  %v1433_v32 = vmul.f32 %v2422_v31, %v4045_v19  ;;  %v1434_v35 = vmul.f32 %v2423_v33, %v4045_v19  ;;  %v2424_v36 = vld [vmem:[%s2973_s13 + $0x688] sm:$0xff]  ;;  %v2425_v38 = vld [vmem:[%s2973_s13 + $0x690] sm:$0xff] }
 0x3d2   : > { %1789 = vst [vmem:[%s3513_s17 + $0x598] sm:$0xff] %v1405_v41  ;;  %1790 = vst [vmem:[%s3513_s17 + $0x5a0] sm:$0xff] %v1406_v43  ;;  %v1435_v37 = vmul.f32 %v2424_v36, %v4045_v19  ;;  %v1436_v40 = vmul.f32 %v2425_v38, %v4045_v19  ;;  %v2426_v41 = vld [vmem:[%s2973_s13 + $0x698] sm:$0xff]  ;;  %v2427_v43 = vld [vmem:[%s2973_s13 + $0x6a0] sm:$0xff] }
 0x3d3   : > { %1791 = vst [vmem:[%s3513_s17 + $0x5a8] sm:$0xff] %v1407_v59  ;;  %1792 = vst [vmem:[%s3513_s17 + $0x5b0] sm:$0xff] %v1408_v63  ;;  %v1437_v42 = vmul.f32 %v2426_v41, %v4045_v19  ;;  %v1438_v44 = vmul.f32 %v2427_v43, %v4045_v19  ;;  %v2428_v59 = vld [vmem:[%s2973_s13 + $0x6a8] sm:$0xff]  ;;  %v2429_v63 = vld [vmem:[%s2973_s13 + $0x6b0] sm:$0xff] }
 0x3d4   : > { %1793 = vst [vmem:[%s3513_s17 + $0x5b8] sm:$0xff] %v1409_v49  ;;  %1794 = vst [vmem:[%s3513_s17 + $0x5c0] sm:$0xff] %v1410_v24  ;;  %v1439_v57 = vmul.f32 %v2428_v59, %v4045_v19  ;;  %v1440_v2 = vmul.f32 %v2429_v63, %v4045_v19  ;;  %v2430_v49 = vld [vmem:[%s2973_s13 + $0x6b8] sm:$0xff]  ;;  %v4143_v24 = vpop.xlane.xlu0 %1212  ;;  %v2433_v39 = vld [vmem:[%s2973_s13 + $0x6d0] sm:$0xff] }
 0x3d5   : > { %1795 = vst [vmem:[%s3513_s17 + $0x5c8] sm:$0xff] %v1411_v51  ;;  %1796 = vst [vmem:[%s3513_s17 + $0x5d0] sm:$0xff] %v1412_v53  ;;  %v1441_v50 = vmul.f32 %v2430_v49, %v4045_v19  ;;  %v1442_v51 = vmul.f32 %v2431_v29, %v4045_v19  ;;  %v1443_v53 = vmul.f32 %v2432_v52, %v4045_v19  ;;  %v2435_v34 = vld [vmem:[%s2973_s13 + $0x6e0] sm:$0xff]  ;;  %v2436_v46 = vld [vmem:[%s2973_s13 + $0x6e8] sm:$0xff] }
 0x3d6   : > { %1797 = vst [vmem:[%s3513_s17 + $0x5d8] sm:$0xff] %v1413_v54  ;;  %1798 = vst [vmem:[%s3513_s17 + $0x5e0] sm:$0xff] %v1414_v0  ;;  %v1444_v54 = vmul.f32 %v2433_v39, %v4045_v19  ;;  %v1445_v0 = vmul.f32 %v2434_v55, %v4045_v19  ;;  %v2437_v56 = vld [vmem:[%s2973_s13 + $0x6f0] sm:$0xff]  ;;  %v2438_v58 = vld [vmem:[%s2973_s13 + $0x6f8] sm:$0xff] }
 0x3d7   : > { %1799 = vst [vmem:[%s3513_s17 + $0x5e8] sm:$0xff] %v1415_v8  ;;  %1800 = vst [vmem:[%s3513_s17 + $0x5f0] sm:$0xff] %v1416_v45  ;;  %v1446_v8 = vmul.f32 %v2435_v34, %v4045_v19  ;;  %v1447_v45 = vmul.f32 %v2436_v46, %v4045_v19  ;;  %v2439_v60 = vld [vmem:[%s2973_s13 + $0x700] sm:$0xff]  ;;  %v2440_v61 = vld [vmem:[%s2973_s13 + $0x708] sm:$0xff] }
 0x3d8   : > { %1801 = vst [vmem:[%s3513_s17 + $0x5f8] sm:$0xff] %v1417_v47  ;;  %1802 = vst [vmem:[%s3513_s17 + $0x600] sm:$0xff] %v1418_v48  ;;  %v1448_v47 = vmul.f32 %v2437_v56, %v4045_v19  ;;  %v1449_v48 = vmul.f32 %v2438_v58, %v4045_v19  ;;  %v1451_v19 = vmul.f32 %v2440_v61, %v4143_v24  ;;  %v2463_v52 = vld [vmem:[%s2973_s13 + $0x7c0] sm:$0xff]  ;;  %v2464_v39 = vld [vmem:[%s2973_s13 + $0x7c8] sm:$0xff] }
 0x3d9   : > { %1803 = vst [vmem:[%s3513_s17 + $0x608] sm:$0xff] %v1419_v14  ;;  %1804 = vst [vmem:[%s3513_s17 + $0x610] sm:$0xff] %v1420_v62  ;;  %v1450_v14 = vmul.f32 %v2439_v60, %v4143_v24  ;;  %v2441_v62 = vld [vmem:[%s2973_s13 + $0x710] sm:$0xff]  ;;  %v2466_v34 = vld [vmem:[%s2973_s13 + $0x7d8] sm:$0xff] }
 0x3da   : > { %1805 = vst [vmem:[%s3513_s17 + $0x618] sm:$0xff] %v1421_v3  ;;  %1806 = vst [vmem:[%s3513_s17 + $0x620] sm:$0xff] %v1422_v5  ;;  %v1452_v1 = vmul.f32 %v2441_v62, %v4143_v24  ;;  %v2442_v3 = vld [vmem:[%s2973_s13 + $0x718] sm:$0xff]  ;;  %v2443_v5 = vld [vmem:[%s2973_s13 + $0x720] sm:$0xff] }
 0x3db   : > { %1807 = vst [vmem:[%s3513_s17 + $0x628] sm:$0xff] %v1423_v7  ;;  %1808 = vst [vmem:[%s3513_s17 + $0x630] sm:$0xff] %v1424_v10  ;;  %v1453_v4 = vmul.f32 %v2442_v3, %v4143_v24  ;;  %v1454_v6 = vmul.f32 %v2443_v5, %v4143_v24  ;;  %v2444_v7 = vld [vmem:[%s2973_s13 + $0x728] sm:$0xff]  ;;  %v2445_v10 = vld [vmem:[%s2973_s13 + $0x730] sm:$0xff] }
 0x3dc   : > { %1809 = vst [vmem:[%s3513_s17 + $0x638] sm:$0xff] %v1425_v12  ;;  %1810 = vst [vmem:[%s3513_s17 + $0x640] sm:$0xff] %v1426_v15  ;;  %v1455_v9 = vmul.f32 %v2444_v7, %v4143_v24  ;;  %v1456_v11 = vmul.f32 %v2445_v10, %v4143_v24  ;;  %v2446_v12 = vld [vmem:[%s2973_s13 + $0x738] sm:$0xff]  ;;  %v2447_v15 = vld [vmem:[%s2973_s13 + $0x740] sm:$0xff] }
 0x3dd   : > { %1811 = vst [vmem:[%s3513_s17 + $0x648] sm:$0xff] %v1427_v17  ;;  %1812 = vst [vmem:[%s3513_s17 + $0x650] sm:$0xff] %v1428_v20  ;;  %v1457_v13 = vmul.f32 %v2446_v12, %v4143_v24  ;;  %v1458_v16 = vmul.f32 %v2447_v15, %v4143_v24  ;;  %v2448_v17 = vld [vmem:[%s2973_s13 + $0x748] sm:$0xff]  ;;  %v2449_v20 = vld [vmem:[%s2973_s13 + $0x750] sm:$0xff] }
 0x3de   : > { %1813 = vst [vmem:[%s3513_s17 + $0x658] sm:$0xff] %v1429_v22  ;;  %1814 = vst [vmem:[%s3513_s17 + $0x660] sm:$0xff] %v1430_v25  ;;  %v1459_v18 = vmul.f32 %v2448_v17, %v4143_v24  ;;  %v1460_v21 = vmul.f32 %v2449_v20, %v4143_v24  ;;  %v2450_v22 = vld [vmem:[%s2973_s13 + $0x758] sm:$0xff]  ;;  %v2451_v25 = vld [vmem:[%s2973_s13 + $0x760] sm:$0xff] }
 0x3df   : > { %1815 = vst [vmem:[%s3513_s17 + $0x668] sm:$0xff] %v1431_v27  ;;  %1816 = vst [vmem:[%s3513_s17 + $0x670] sm:$0xff] %v1432_v30  ;;  %v1461_v23 = vmul.f32 %v2450_v22, %v4143_v24  ;;  %v1462_v26 = vmul.f32 %v2451_v25, %v4143_v24  ;;  %v2452_v27 = vld [vmem:[%s2973_s13 + $0x768] sm:$0xff]  ;;  %v2453_v30 = vld [vmem:[%s2973_s13 + $0x770] sm:$0xff] }
 0x3e0   : > { %1817 = vst [vmem:[%s3513_s17 + $0x678] sm:$0xff] %v1433_v32  ;;  %1818 = vst [vmem:[%s3513_s17 + $0x680] sm:$0xff] %v1434_v35  ;;  %v1463_v28 = vmul.f32 %v2452_v27, %v4143_v24  ;;  %v1464_v31 = vmul.f32 %v2453_v30, %v4143_v24  ;;  %v2454_v32 = vld [vmem:[%s2973_s13 + $0x778] sm:$0xff]  ;;  %v2455_v35 = vld [vmem:[%s2973_s13 + $0x780] sm:$0xff] }
 0x3e1   : > { %1819 = vst [vmem:[%s3513_s17 + $0x688] sm:$0xff] %v1435_v37  ;;  %1820 = vst [vmem:[%s3513_s17 + $0x690] sm:$0xff] %v1436_v40  ;;  %v1465_v33 = vmul.f32 %v2454_v32, %v4143_v24  ;;  %v1466_v36 = vmul.f32 %v2455_v35, %v4143_v24  ;;  %v2456_v37 = vld [vmem:[%s2973_s13 + $0x788] sm:$0xff]  ;;  %v2457_v40 = vld [vmem:[%s2973_s13 + $0x790] sm:$0xff] }
 0x3e2   : > { %1821 = vst [vmem:[%s3513_s17 + $0x698] sm:$0xff] %v1437_v42  ;;  %1822 = vst [vmem:[%s3513_s17 + $0x6a0] sm:$0xff] %v1438_v44  ;;  %v1467_v38 = vmul.f32 %v2456_v37, %v4143_v24  ;;  %v1468_v41 = vmul.f32 %v2457_v40, %v4143_v24  ;;  %v2458_v42 = vld [vmem:[%s2973_s13 + $0x798] sm:$0xff]  ;;  %v2459_v44 = vld [vmem:[%s2973_s13 + $0x7a0] sm:$0xff] }
 0x3e3   : > { %1823 = vst [vmem:[%s3513_s17 + $0x6a8] sm:$0xff] %v1439_v57  ;;  %1824 = vst [vmem:[%s3513_s17 + $0x6b0] sm:$0xff] %v1440_v2  ;;  %v1469_v43 = vmul.f32 %v2458_v42, %v4143_v24  ;;  %v1470_v59 = vmul.f32 %v2459_v44, %v4143_v24  ;;  %v2460_v57 = vld [vmem:[%s2973_s13 + $0x7a8] sm:$0xff]  ;;  %v2461_v2 = vld [vmem:[%s2973_s13 + $0x7b0] sm:$0xff] }
 0x3e4   : > { %1825 = vst [vmem:[%s3513_s17 + $0x6b8] sm:$0xff] %v1441_v50  ;;  %1826 = vst [vmem:[%s3513_s17 + $0x6c0] sm:$0xff] %v1442_v51  ;;  %v1471_v63 = vmul.f32 %v2460_v57, %v4143_v24  ;;  %v1472_v49 = vmul.f32 %v2461_v2, %v4143_v24  ;;  %v2462_v50 = vld [vmem:[%s2973_s13 + $0x7b8] sm:$0xff]  ;;  %v4241_v51 = vpop.xlane.xlu0 %1215  ;;  %v2465_v55 = vld [vmem:[%s2973_s13 + $0x7d0] sm:$0xff] }
 0x3e5   : > { %1827 = vst [vmem:[%s3513_s17 + $0x6c8] sm:$0xff] %v1443_v53  ;;  %1828 = vst [vmem:[%s3513_s17 + $0x6d0] sm:$0xff] %v1444_v54  ;;  %v1473_v29 = vmul.f32 %v2462_v50, %v4143_v24  ;;  %v1474_v53 = vmul.f32 %v2463_v52, %v4143_v24  ;;  %v1475_v54 = vmul.f32 %v2464_v39, %v4143_v24  ;;  %v2467_v46 = vld [vmem:[%s2973_s13 + $0x7e0] sm:$0xff]  ;;  %v2468_v56 = vld [vmem:[%s2973_s13 + $0x7e8] sm:$0xff] }
 0x3e6   : > { %1829 = vst [vmem:[%s3513_s17 + $0x6d8] sm:$0xff] %v1445_v0  ;;  %1830 = vst [vmem:[%s3513_s17 + $0x6e0] sm:$0xff] %v1446_v8  ;;  %v1476_v0 = vmul.f32 %v2465_v55, %v4143_v24  ;;  %v1477_v8 = vmul.f32 %v2466_v34, %v4143_v24  ;;  %v2469_v58 = vld [vmem:[%s2973_s13 + $0x7f0] sm:$0xff]  ;;  %v2470_v60 = vld [vmem:[%s2973_s13 + $0x7f8] sm:$0xff] }
 0x3e7   : > { %1831 = vst [vmem:[%s3513_s17 + $0x6e8] sm:$0xff] %v1447_v45  ;;  %1832 = vst [vmem:[%s3513_s17 + $0x6f0] sm:$0xff] %v1448_v47  ;;  %v1478_v45 = vmul.f32 %v2467_v46, %v4143_v24  ;;  %v1479_v47 = vmul.f32 %v2468_v56, %v4143_v24  ;;  %v2471_v61 = vld [vmem:[%s2973_s13 + $0x800] sm:$0xff]  ;;  %v2472_v62 = vld [vmem:[%s2973_s13 + $0x808] sm:$0xff] }
 0x3e8   : > { %1833 = vst [vmem:[%s3513_s17 + $0x6f8] sm:$0xff] %v1449_v48  ;;  %1834 = vst [vmem:[%s3513_s17 + $0x700] sm:$0xff] %v1450_v14  ;;  %v1480_v48 = vmul.f32 %v2469_v58, %v4143_v24  ;;  %v1481_v14 = vmul.f32 %v2470_v60, %v4143_v24  ;;  %v1483_v24 = vmul.f32 %v2472_v62, %v4241_v51  ;;  %v2495_v39 = vld [vmem:[%s2973_s13 + $0x8c0] sm:$0xff]  ;;  %v2496_v55 = vld [vmem:[%s2973_s13 + $0x8c8] sm:$0xff] }
 0x3e9   : > { %1835 = vst [vmem:[%s3513_s17 + $0x708] sm:$0xff] %v1451_v19  ;;  %1836 = vst [vmem:[%s3513_s17 + $0x710] sm:$0xff] %v1452_v1  ;;  %v1482_v19 = vmul.f32 %v2471_v61, %v4241_v51  ;;  %v2473_v1 = vld [vmem:[%s2973_s13 + $0x810] sm:$0xff]  ;;  %v2498_v46 = vld [vmem:[%s2973_s13 + $0x8d8] sm:$0xff] }
 0x3ea   : > { %1837 = vst [vmem:[%s3513_s17 + $0x718] sm:$0xff] %v1453_v4  ;;  %1838 = vst [vmem:[%s3513_s17 + $0x720] sm:$0xff] %v1454_v6  ;;  %v1484_v3 = vmul.f32 %v2473_v1, %v4241_v51  ;;  %v2474_v4 = vld [vmem:[%s2973_s13 + $0x818] sm:$0xff]  ;;  %v2475_v6 = vld [vmem:[%s2973_s13 + $0x820] sm:$0xff] }
 0x3eb   : > { %1839 = vst [vmem:[%s3513_s17 + $0x728] sm:$0xff] %v1455_v9  ;;  %1840 = vst [vmem:[%s3513_s17 + $0x730] sm:$0xff] %v1456_v11  ;;  %v1485_v5 = vmul.f32 %v2474_v4, %v4241_v51  ;;  %v1486_v7 = vmul.f32 %v2475_v6, %v4241_v51  ;;  %v2476_v9 = vld [vmem:[%s2973_s13 + $0x828] sm:$0xff]  ;;  %v2477_v11 = vld [vmem:[%s2973_s13 + $0x830] sm:$0xff] }
 0x3ec   : > { %1841 = vst [vmem:[%s3513_s17 + $0x738] sm:$0xff] %v1457_v13  ;;  %1842 = vst [vmem:[%s3513_s17 + $0x740] sm:$0xff] %v1458_v16  ;;  %v1487_v10 = vmul.f32 %v2476_v9, %v4241_v51  ;;  %v1488_v12 = vmul.f32 %v2477_v11, %v4241_v51  ;;  %v2478_v13 = vld [vmem:[%s2973_s13 + $0x838] sm:$0xff]  ;;  %v2479_v16 = vld [vmem:[%s2973_s13 + $0x840] sm:$0xff] }
 0x3ed   : > { %1843 = vst [vmem:[%s3513_s17 + $0x748] sm:$0xff] %v1459_v18  ;;  %1844 = vst [vmem:[%s3513_s17 + $0x750] sm:$0xff] %v1460_v21  ;;  %v1489_v15 = vmul.f32 %v2478_v13, %v4241_v51  ;;  %v1490_v17 = vmul.f32 %v2479_v16, %v4241_v51  ;;  %v2480_v18 = vld [vmem:[%s2973_s13 + $0x848] sm:$0xff]  ;;  %v2481_v21 = vld [vmem:[%s2973_s13 + $0x850] sm:$0xff] }
 0x3ee   : > { %1845 = vst [vmem:[%s3513_s17 + $0x758] sm:$0xff] %v1461_v23  ;;  %1846 = vst [vmem:[%s3513_s17 + $0x760] sm:$0xff] %v1462_v26  ;;  %v1491_v20 = vmul.f32 %v2480_v18, %v4241_v51  ;;  %v1492_v22 = vmul.f32 %v2481_v21, %v4241_v51  ;;  %v2482_v23 = vld [vmem:[%s2973_s13 + $0x858] sm:$0xff]  ;;  %v2483_v26 = vld [vmem:[%s2973_s13 + $0x860] sm:$0xff] }
 0x3ef   : > { %1847 = vst [vmem:[%s3513_s17 + $0x768] sm:$0xff] %v1463_v28  ;;  %1848 = vst [vmem:[%s3513_s17 + $0x770] sm:$0xff] %v1464_v31  ;;  %v1493_v25 = vmul.f32 %v2482_v23, %v4241_v51  ;;  %v1494_v27 = vmul.f32 %v2483_v26, %v4241_v51  ;;  %v2484_v28 = vld [vmem:[%s2973_s13 + $0x868] sm:$0xff]  ;;  %v2485_v31 = vld [vmem:[%s2973_s13 + $0x870] sm:$0xff] }
 0x3f0   : > { %1849 = vst [vmem:[%s3513_s17 + $0x778] sm:$0xff] %v1465_v33  ;;  %1850 = vst [vmem:[%s3513_s17 + $0x780] sm:$0xff] %v1466_v36  ;;  %v1495_v30 = vmul.f32 %v2484_v28, %v4241_v51  ;;  %v1496_v32 = vmul.f32 %v2485_v31, %v4241_v51  ;;  %v2486_v33 = vld [vmem:[%s2973_s13 + $0x878] sm:$0xff]  ;;  %v2487_v36 = vld [vmem:[%s2973_s13 + $0x880] sm:$0xff] }
 0x3f1   : > { %1851 = vst [vmem:[%s3513_s17 + $0x788] sm:$0xff] %v1467_v38  ;;  %1852 = vst [vmem:[%s3513_s17 + $0x790] sm:$0xff] %v1468_v41  ;;  %v1497_v35 = vmul.f32 %v2486_v33, %v4241_v51  ;;  %v1498_v37 = vmul.f32 %v2487_v36, %v4241_v51  ;;  %v2488_v38 = vld [vmem:[%s2973_s13 + $0x888] sm:$0xff]  ;;  %v2489_v41 = vld [vmem:[%s2973_s13 + $0x890] sm:$0xff] }
 0x3f2   : > { %1853 = vst [vmem:[%s3513_s17 + $0x798] sm:$0xff] %v1469_v43  ;;  %1854 = vst [vmem:[%s3513_s17 + $0x7a0] sm:$0xff] %v1470_v59  ;;  %v1499_v40 = vmul.f32 %v2488_v38, %v4241_v51  ;;  %v1500_v42 = vmul.f32 %v2489_v41, %v4241_v51  ;;  %v2490_v43 = vld [vmem:[%s2973_s13 + $0x898] sm:$0xff]  ;;  %v2491_v59 = vld [vmem:[%s2973_s13 + $0x8a0] sm:$0xff] }
 0x3f3   : > { %1855 = vst [vmem:[%s3513_s17 + $0x7a8] sm:$0xff] %v1471_v63  ;;  %1856 = vst [vmem:[%s3513_s17 + $0x7b0] sm:$0xff] %v1472_v49  ;;  %v1501_v44 = vmul.f32 %v2490_v43, %v4241_v51  ;;  %v1502_v57 = vmul.f32 %v2491_v59, %v4241_v51  ;;  %v2492_v63 = vld [vmem:[%s2973_s13 + $0x8a8] sm:$0xff]  ;;  %v2493_v49 = vld [vmem:[%s2973_s13 + $0x8b0] sm:$0xff] }
 0x3f4   : > { %1857 = vst [vmem:[%s3513_s17 + $0x7b8] sm:$0xff] %v1473_v29  ;;  %1858 = vst [vmem:[%s3513_s17 + $0x7c0] sm:$0xff] %v1474_v53  ;;  %v1503_v2 = vmul.f32 %v2492_v63, %v4241_v51  ;;  %v1504_v50 = vmul.f32 %v2493_v49, %v4241_v51  ;;  %v2494_v29 = vld [vmem:[%s2973_s13 + $0x8b8] sm:$0xff]  ;;  %v4339_v53 = vpop.xlane.xlu0 %1218  ;;  %v2497_v34 = vld [vmem:[%s2973_s13 + $0x8d0] sm:$0xff] }
 0x3f5   : > { %1859 = vst [vmem:[%s3513_s17 + $0x7c8] sm:$0xff] %v1475_v54  ;;  %1860 = vst [vmem:[%s3513_s17 + $0x7d0] sm:$0xff] %v1476_v0  ;;  %v1505_v52 = vmul.f32 %v2494_v29, %v4241_v51  ;;  %v1506_v54 = vmul.f32 %v2495_v39, %v4241_v51  ;;  %v1507_v0 = vmul.f32 %v2496_v55, %v4241_v51  ;;  %v2499_v56 = vld [vmem:[%s2973_s13 + $0x8e0] sm:$0xff]  ;;  %v2500_v58 = vld [vmem:[%s2973_s13 + $0x8e8] sm:$0xff] }
 0x3f6   : > { %1861 = vst [vmem:[%s3513_s17 + $0x7d8] sm:$0xff] %v1477_v8  ;;  %1862 = vst [vmem:[%s3513_s17 + $0x7e0] sm:$0xff] %v1478_v45  ;;  %v1508_v8 = vmul.f32 %v2497_v34, %v4241_v51  ;;  %v1509_v45 = vmul.f32 %v2498_v46, %v4241_v51  ;;  %v2501_v60 = vld [vmem:[%s2973_s13 + $0x8f0] sm:$0xff]  ;;  %v2502_v61 = vld [vmem:[%s2973_s13 + $0x8f8] sm:$0xff] }
 0x3f7   : > { %1863 = vst [vmem:[%s3513_s17 + $0x7e8] sm:$0xff] %v1479_v47  ;;  %1864 = vst [vmem:[%s3513_s17 + $0x7f0] sm:$0xff] %v1480_v48  ;;  %v1510_v47 = vmul.f32 %v2499_v56, %v4241_v51  ;;  %v1511_v48 = vmul.f32 %v2500_v58, %v4241_v51  ;;  %v2503_v62 = vld [vmem:[%s2973_s13 + $0x900] sm:$0xff]  ;;  %v2504_v1 = vld [vmem:[%s2973_s13 + $0x908] sm:$0xff] }
 0x3f8   : > { %1865 = vst [vmem:[%s3513_s17 + $0x7f8] sm:$0xff] %v1481_v14  ;;  %1866 = vst [vmem:[%s3513_s17 + $0x800] sm:$0xff] %v1482_v19  ;;  %v1512_v14 = vmul.f32 %v2501_v60, %v4241_v51  ;;  %v1513_v19 = vmul.f32 %v2502_v61, %v4241_v51  ;;  %v1515_v51 = vmul.f32 %v2504_v1, %v4339_v53  ;;  %v2527_v55 = vld [vmem:[%s2973_s13 + $0x9c0] sm:$0xff]  ;;  %v2528_v34 = vld [vmem:[%s2973_s13 + $0x9c8] sm:$0xff] }
 0x3f9   : > { %1867 = vst [vmem:[%s3513_s17 + $0x808] sm:$0xff] %v1483_v24  ;;  %1868 = vst [vmem:[%s3513_s17 + $0x810] sm:$0xff] %v1484_v3  ;;  %v1514_v24 = vmul.f32 %v2503_v62, %v4339_v53  ;;  %v2505_v3 = vld [vmem:[%s2973_s13 + $0x910] sm:$0xff]  ;;  %v2530_v56 = vld [vmem:[%s2973_s13 + $0x9d8] sm:$0xff] }
 0x3fa   : > { %1869 = vst [vmem:[%s3513_s17 + $0x818] sm:$0xff] %v1485_v5  ;;  %1870 = vst [vmem:[%s3513_s17 + $0x820] sm:$0xff] %v1486_v7  ;;  %v1516_v4 = vmul.f32 %v2505_v3, %v4339_v53  ;;  %v2506_v5 = vld [vmem:[%s2973_s13 + $0x918] sm:$0xff]  ;;  %v2507_v7 = vld [vmem:[%s2973_s13 + $0x920] sm:$0xff] }
 0x3fb   : > { %1871 = vst [vmem:[%s3513_s17 + $0x828] sm:$0xff] %v1487_v10  ;;  %1872 = vst [vmem:[%s3513_s17 + $0x830] sm:$0xff] %v1488_v12  ;;  %v1517_v6 = vmul.f32 %v2506_v5, %v4339_v53  ;;  %v1518_v9 = vmul.f32 %v2507_v7, %v4339_v53  ;;  %v2508_v10 = vld [vmem:[%s2973_s13 + $0x928] sm:$0xff]  ;;  %v2509_v12 = vld [vmem:[%s2973_s13 + $0x930] sm:$0xff] }
 0x3fc   : > { %1873 = vst [vmem:[%s3513_s17 + $0x838] sm:$0xff] %v1489_v15  ;;  %1874 = vst [vmem:[%s3513_s17 + $0x840] sm:$0xff] %v1490_v17  ;;  %v1519_v11 = vmul.f32 %v2508_v10, %v4339_v53  ;;  %v1520_v13 = vmul.f32 %v2509_v12, %v4339_v53  ;;  %v2510_v15 = vld [vmem:[%s2973_s13 + $0x938] sm:$0xff]  ;;  %v2511_v17 = vld [vmem:[%s2973_s13 + $0x940] sm:$0xff] }
 0x3fd   : > { %1875 = vst [vmem:[%s3513_s17 + $0x848] sm:$0xff] %v1491_v20  ;;  %1876 = vst [vmem:[%s3513_s17 + $0x850] sm:$0xff] %v1492_v22  ;;  %v1521_v16 = vmul.f32 %v2510_v15, %v4339_v53  ;;  %v1522_v18 = vmul.f32 %v2511_v17, %v4339_v53  ;;  %v2512_v20 = vld [vmem:[%s2973_s13 + $0x948] sm:$0xff]  ;;  %v2513_v22 = vld [vmem:[%s2973_s13 + $0x950] sm:$0xff] }
 0x3fe   : > { %1877 = vst [vmem:[%s3513_s17 + $0x858] sm:$0xff] %v1493_v25  ;;  %1878 = vst [vmem:[%s3513_s17 + $0x860] sm:$0xff] %v1494_v27  ;;  %v1523_v21 = vmul.f32 %v2512_v20, %v4339_v53  ;;  %v1524_v23 = vmul.f32 %v2513_v22, %v4339_v53  ;;  %v2514_v25 = vld [vmem:[%s2973_s13 + $0x958] sm:$0xff]  ;;  %v2515_v27 = vld [vmem:[%s2973_s13 + $0x960] sm:$0xff] }
 0x3ff   : > { %1879 = vst [vmem:[%s3513_s17 + $0x868] sm:$0xff] %v1495_v30  ;;  %1880 = vst [vmem:[%s3513_s17 + $0x870] sm:$0xff] %v1496_v32  ;;  %v1525_v26 = vmul.f32 %v2514_v25, %v4339_v53  ;;  %v1526_v28 = vmul.f32 %v2515_v27, %v4339_v53  ;;  %v2516_v30 = vld [vmem:[%s2973_s13 + $0x968] sm:$0xff]  ;;  %v2517_v32 = vld [vmem:[%s2973_s13 + $0x970] sm:$0xff] }
 0x400   : > { %1881 = vst [vmem:[%s3513_s17 + $0x878] sm:$0xff] %v1497_v35  ;;  %1882 = vst [vmem:[%s3513_s17 + $0x880] sm:$0xff] %v1498_v37  ;;  %v1527_v31 = vmul.f32 %v2516_v30, %v4339_v53  ;;  %v1528_v33 = vmul.f32 %v2517_v32, %v4339_v53  ;;  %v2518_v35 = vld [vmem:[%s2973_s13 + $0x978] sm:$0xff]  ;;  %v2519_v37 = vld [vmem:[%s2973_s13 + $0x980] sm:$0xff] }
 0x401   : > { %1883 = vst [vmem:[%s3513_s17 + $0x888] sm:$0xff] %v1499_v40  ;;  %1884 = vst [vmem:[%s3513_s17 + $0x890] sm:$0xff] %v1500_v42  ;;  %v1529_v36 = vmul.f32 %v2518_v35, %v4339_v53  ;;  %v1530_v38 = vmul.f32 %v2519_v37, %v4339_v53  ;;  %v2520_v40 = vld [vmem:[%s2973_s13 + $0x988] sm:$0xff]  ;;  %v2521_v42 = vld [vmem:[%s2973_s13 + $0x990] sm:$0xff] }
 0x402   : > { %1885 = vst [vmem:[%s3513_s17 + $0x898] sm:$0xff] %v1501_v44  ;;  %1886 = vst [vmem:[%s3513_s17 + $0x8a0] sm:$0xff] %v1502_v57  ;;  %v1531_v41 = vmul.f32 %v2520_v40, %v4339_v53  ;;  %v1532_v43 = vmul.f32 %v2521_v42, %v4339_v53  ;;  %v2522_v44 = vld [vmem:[%s2973_s13 + $0x998] sm:$0xff]  ;;  %v2523_v57 = vld [vmem:[%s2973_s13 + $0x9a0] sm:$0xff] }
 0x403   : > { %1887 = vst [vmem:[%s3513_s17 + $0x8a8] sm:$0xff] %v1503_v2  ;;  %1888 = vst [vmem:[%s3513_s17 + $0x8b0] sm:$0xff] %v1504_v50  ;;  %v1533_v59 = vmul.f32 %v2522_v44, %v4339_v53  ;;  %v1534_v63 = vmul.f32 %v2523_v57, %v4339_v53  ;;  %v2524_v2 = vld [vmem:[%s2973_s13 + $0x9a8] sm:$0xff]  ;;  %v2525_v50 = vld [vmem:[%s2973_s13 + $0x9b0] sm:$0xff] }
 0x404   : > { %1889 = vst [vmem:[%s3513_s17 + $0x8b8] sm:$0xff] %v1505_v52  ;;  %1890 = vst [vmem:[%s3513_s17 + $0x8c0] sm:$0xff] %v1506_v54  ;;  %v1535_v49 = vmul.f32 %v2524_v2, %v4339_v53  ;;  %v1536_v29 = vmul.f32 %v2525_v50, %v4339_v53  ;;  %v2526_v52 = vld [vmem:[%s2973_s13 + $0x9b8] sm:$0xff]  ;;  %v4437_v54 = vpop.xlane.xlu0 %1221  ;;  %v2529_v46 = vld [vmem:[%s2973_s13 + $0x9d0] sm:$0xff] }
 0x405   : > { %1891 = vst [vmem:[%s3513_s17 + $0x8c8] sm:$0xff] %v1507_v0  ;;  %1892 = vst [vmem:[%s3513_s17 + $0x8d0] sm:$0xff] %v1508_v8  ;;  %v1537_v39 = vmul.f32 %v2526_v52, %v4339_v53  ;;  %v1538_v0 = vmul.f32 %v2527_v55, %v4339_v53  ;;  %v1539_v8 = vmul.f32 %v2528_v34, %v4339_v53  ;;  %v2531_v58 = vld [vmem:[%s2973_s13 + $0x9e0] sm:$0xff]  ;;  %v2532_v60 = vld [vmem:[%s2973_s13 + $0x9e8] sm:$0xff] }
 0x406   : > { %1893 = vst [vmem:[%s3513_s17 + $0x8d8] sm:$0xff] %v1509_v45  ;;  %1894 = vst [vmem:[%s3513_s17 + $0x8e0] sm:$0xff] %v1510_v47  ;;  %v1540_v45 = vmul.f32 %v2529_v46, %v4339_v53  ;;  %v1541_v47 = vmul.f32 %v2530_v56, %v4339_v53  ;;  %v2533_v61 = vld [vmem:[%s2973_s13 + $0x9f0] sm:$0xff]  ;;  %v2534_v62 = vld [vmem:[%s2973_s13 + $0x9f8] sm:$0xff] }
 0x407   : > { %1895 = vst [vmem:[%s3513_s17 + $0x8e8] sm:$0xff] %v1511_v48  ;;  %1896 = vst [vmem:[%s3513_s17 + $0x8f0] sm:$0xff] %v1512_v14  ;;  %v1542_v48 = vmul.f32 %v2531_v58, %v4339_v53  ;;  %v1543_v14 = vmul.f32 %v2532_v60, %v4339_v53  ;;  %v2535_v1 = vld [vmem:[%s2973_s13 + $0xa00] sm:$0xff]  ;;  %v2536_v3 = vld [vmem:[%s2973_s13 + $0xa08] sm:$0xff] }
 0x408   : > { %1897 = vst [vmem:[%s3513_s17 + $0x8f8] sm:$0xff] %v1513_v19  ;;  %1898 = vst [vmem:[%s3513_s17 + $0x900] sm:$0xff] %v1514_v24  ;;  %v1544_v19 = vmul.f32 %v2533_v61, %v4339_v53  ;;  %v1545_v24 = vmul.f32 %v2534_v62, %v4339_v53  ;;  %v1547_v53 = vmul.f32 %v2536_v3, %v4437_v54  ;;  %v2559_v34 = vld [vmem:[%s2973_s13 + $0xac0] sm:$0xff]  ;;  %v2560_v46 = vld [vmem:[%s2973_s13 + $0xac8] sm:$0xff] }
 0x409   : > { %1899 = vst [vmem:[%s3513_s17 + $0x908] sm:$0xff] %v1515_v51  ;;  %1900 = vst [vmem:[%s3513_s17 + $0x910] sm:$0xff] %v1516_v4  ;;  %v1546_v51 = vmul.f32 %v2535_v1, %v4437_v54  ;;  %v2537_v4 = vld [vmem:[%s2973_s13 + $0xa10] sm:$0xff]  ;;  %v2562_v58 = vld [vmem:[%s2973_s13 + $0xad8] sm:$0xff] }
 0x40a   : > { %1901 = vst [vmem:[%s3513_s17 + $0x918] sm:$0xff] %v1517_v6  ;;  %1902 = vst [vmem:[%s3513_s17 + $0x920] sm:$0xff] %v1518_v9  ;;  %v1548_v5 = vmul.f32 %v2537_v4, %v4437_v54  ;;  %v2538_v6 = vld [vmem:[%s2973_s13 + $0xa18] sm:$0xff]  ;;  %v2539_v9 = vld [vmem:[%s2973_s13 + $0xa20] sm:$0xff] }
 0x40b   : > { %1903 = vst [vmem:[%s3513_s17 + $0x928] sm:$0xff] %v1519_v11  ;;  %1904 = vst [vmem:[%s3513_s17 + $0x930] sm:$0xff] %v1520_v13  ;;  %v1549_v7 = vmul.f32 %v2538_v6, %v4437_v54  ;;  %v1550_v10 = vmul.f32 %v2539_v9, %v4437_v54  ;;  %v2540_v11 = vld [vmem:[%s2973_s13 + $0xa28] sm:$0xff]  ;;  %v2541_v13 = vld [vmem:[%s2973_s13 + $0xa30] sm:$0xff] }
 0x40c   : > { %1905 = vst [vmem:[%s3513_s17 + $0x938] sm:$0xff] %v1521_v16  ;;  %1906 = vst [vmem:[%s3513_s17 + $0x940] sm:$0xff] %v1522_v18  ;;  %v1551_v12 = vmul.f32 %v2540_v11, %v4437_v54  ;;  %v1552_v15 = vmul.f32 %v2541_v13, %v4437_v54  ;;  %v2542_v16 = vld [vmem:[%s2973_s13 + $0xa38] sm:$0xff]  ;;  %v2543_v18 = vld [vmem:[%s2973_s13 + $0xa40] sm:$0xff] }
 0x40d   : > { %1907 = vst [vmem:[%s3513_s17 + $0x948] sm:$0xff] %v1523_v21  ;;  %1908 = vst [vmem:[%s3513_s17 + $0x950] sm:$0xff] %v1524_v23  ;;  %v1553_v17 = vmul.f32 %v2542_v16, %v4437_v54  ;;  %v1554_v20 = vmul.f32 %v2543_v18, %v4437_v54  ;;  %v2544_v21 = vld [vmem:[%s2973_s13 + $0xa48] sm:$0xff]  ;;  %v2545_v23 = vld [vmem:[%s2973_s13 + $0xa50] sm:$0xff] }
 0x40e   : > { %1909 = vst [vmem:[%s3513_s17 + $0x958] sm:$0xff] %v1525_v26  ;;  %1910 = vst [vmem:[%s3513_s17 + $0x960] sm:$0xff] %v1526_v28  ;;  %v1555_v22 = vmul.f32 %v2544_v21, %v4437_v54  ;;  %v1556_v25 = vmul.f32 %v2545_v23, %v4437_v54  ;;  %v2546_v26 = vld [vmem:[%s2973_s13 + $0xa58] sm:$0xff]  ;;  %v2547_v28 = vld [vmem:[%s2973_s13 + $0xa60] sm:$0xff] }
 0x40f   : > { %1911 = vst [vmem:[%s3513_s17 + $0x968] sm:$0xff] %v1527_v31  ;;  %1912 = vst [vmem:[%s3513_s17 + $0x970] sm:$0xff] %v1528_v33  ;;  %v1557_v27 = vmul.f32 %v2546_v26, %v4437_v54  ;;  %v1558_v30 = vmul.f32 %v2547_v28, %v4437_v54  ;;  %v2548_v31 = vld [vmem:[%s2973_s13 + $0xa68] sm:$0xff]  ;;  %v2549_v33 = vld [vmem:[%s2973_s13 + $0xa70] sm:$0xff] }
 0x410   : > { %1913 = vst [vmem:[%s3513_s17 + $0x978] sm:$0xff] %v1529_v36  ;;  %1914 = vst [vmem:[%s3513_s17 + $0x980] sm:$0xff] %v1530_v38  ;;  %v1559_v32 = vmul.f32 %v2548_v31, %v4437_v54  ;;  %v1560_v35 = vmul.f32 %v2549_v33, %v4437_v54  ;;  %v2550_v36 = vld [vmem:[%s2973_s13 + $0xa78] sm:$0xff]  ;;  %v2551_v38 = vld [vmem:[%s2973_s13 + $0xa80] sm:$0xff] }
 0x411   : > { %1915 = vst [vmem:[%s3513_s17 + $0x988] sm:$0xff] %v1531_v41  ;;  %1916 = vst [vmem:[%s3513_s17 + $0x990] sm:$0xff] %v1532_v43  ;;  %v1561_v37 = vmul.f32 %v2550_v36, %v4437_v54  ;;  %v1562_v40 = vmul.f32 %v2551_v38, %v4437_v54  ;;  %v2552_v41 = vld [vmem:[%s2973_s13 + $0xa88] sm:$0xff]  ;;  %v2553_v43 = vld [vmem:[%s2973_s13 + $0xa90] sm:$0xff] }
 0x412   : > { %1917 = vst [vmem:[%s3513_s17 + $0x998] sm:$0xff] %v1533_v59  ;;  %1918 = vst [vmem:[%s3513_s17 + $0x9a0] sm:$0xff] %v1534_v63  ;;  %v1563_v42 = vmul.f32 %v2552_v41, %v4437_v54  ;;  %v1564_v44 = vmul.f32 %v2553_v43, %v4437_v54  ;;  %v2554_v59 = vld [vmem:[%s2973_s13 + $0xa98] sm:$0xff]  ;;  %v2555_v63 = vld [vmem:[%s2973_s13 + $0xaa0] sm:$0xff] }
 0x413   : > { %1919 = vst [vmem:[%s3513_s17 + $0x9a8] sm:$0xff] %v1535_v49  ;;  %1920 = vst [vmem:[%s3513_s17 + $0x9b0] sm:$0xff] %v1536_v29  ;;  %v1565_v57 = vmul.f32 %v2554_v59, %v4437_v54  ;;  %v1566_v2 = vmul.f32 %v2555_v63, %v4437_v54  ;;  %v2556_v49 = vld [vmem:[%s2973_s13 + $0xaa8] sm:$0xff]  ;;  %v2557_v29 = vld [vmem:[%s2973_s13 + $0xab0] sm:$0xff] }
 0x414   : > { %1921 = vst [vmem:[%s3513_s17 + $0x9b8] sm:$0xff] %v1537_v39  ;;  %1922 = vst [vmem:[%s3513_s17 + $0x9c0] sm:$0xff] %v1538_v0  ;;  %v1567_v50 = vmul.f32 %v2556_v49, %v4437_v54  ;;  %v1568_v52 = vmul.f32 %v2557_v29, %v4437_v54  ;;  %v2558_v39 = vld [vmem:[%s2973_s13 + $0xab8] sm:$0xff]  ;;  %v4535_v0 = vpop.xlane.xlu0 %1224  ;;  %v2561_v56 = vld [vmem:[%s2973_s13 + $0xad0] sm:$0xff] }
 0x415   : > { %1923 = vst [vmem:[%s3513_s17 + $0x9c8] sm:$0xff] %v1539_v8  ;;  %1924 = vst [vmem:[%s3513_s17 + $0x9d0] sm:$0xff] %v1540_v45  ;;  %v1569_v55 = vmul.f32 %v2558_v39, %v4437_v54  ;;  %v1570_v8 = vmul.f32 %v2559_v34, %v4437_v54  ;;  %v1571_v45 = vmul.f32 %v2560_v46, %v4437_v54  ;;  %v2563_v60 = vld [vmem:[%s2973_s13 + $0xae0] sm:$0xff]  ;;  %v2564_v61 = vld [vmem:[%s2973_s13 + $0xae8] sm:$0xff] }
 0x416   : > { %1925 = vst [vmem:[%s3513_s17 + $0x9d8] sm:$0xff] %v1541_v47  ;;  %1926 = vst [vmem:[%s3513_s17 + $0x9e0] sm:$0xff] %v1542_v48  ;;  %v1572_v47 = vmul.f32 %v2561_v56, %v4437_v54  ;;  %v1573_v48 = vmul.f32 %v2562_v58, %v4437_v54  ;;  %v2565_v62 = vld [vmem:[%s2973_s13 + $0xaf0] sm:$0xff]  ;;  %v2566_v1 = vld [vmem:[%s2973_s13 + $0xaf8] sm:$0xff] }
 0x417   : > { %1927 = vst [vmem:[%s3513_s17 + $0x9e8] sm:$0xff] %v1543_v14  ;;  %1928 = vst [vmem:[%s3513_s17 + $0x9f0] sm:$0xff] %v1544_v19  ;;  %v1574_v14 = vmul.f32 %v2563_v60, %v4437_v54  ;;  %v1575_v19 = vmul.f32 %v2564_v61, %v4437_v54  ;;  %v2567_v3 = vld [vmem:[%s2973_s13 + $0xb00] sm:$0xff]  ;;  %v2568_v4 = vld [vmem:[%s2973_s13 + $0xb08] sm:$0xff] }
 0x418   : > { %1929 = vst [vmem:[%s3513_s17 + $0x9f8] sm:$0xff] %v1545_v24  ;;  %1930 = vst [vmem:[%s3513_s17 + $0xa00] sm:$0xff] %v1546_v51  ;;  %v1576_v24 = vmul.f32 %v2565_v62, %v4437_v54  ;;  %v1577_v51 = vmul.f32 %v2566_v1, %v4437_v54  ;;  %v1579_v54 = vmul.f32 %v2568_v4, %v4535_v0 }
 0x419   : > { %1931 = vst [vmem:[%s3513_s17 + $0xa08] sm:$0xff] %v1547_v53  ;;  %1932 = vst [vmem:[%s3513_s17 + $0xa10] sm:$0xff] %v1548_v5  ;;  %v1578_v53 = vmul.f32 %v2567_v3, %v4535_v0  ;;  %v2569_v5 = vld [vmem:[%s2973_s13 + $0xb10] sm:$0xff] }
 0x41a   : > { %1933 = vst [vmem:[%s3513_s17 + $0xa18] sm:$0xff] %v1549_v7  ;;  %1934 = vst [vmem:[%s3513_s17 + $0xa20] sm:$0xff] %v1550_v10  ;;  %v1580_v6 = vmul.f32 %v2569_v5, %v4535_v0  ;;  %v2570_v7 = vld [vmem:[%s2973_s13 + $0xb18] sm:$0xff]  ;;  %v2571_v10 = vld [vmem:[%s2973_s13 + $0xb20] sm:$0xff] }
 0x41b   : > { %1935 = vst [vmem:[%s3513_s17 + $0xa28] sm:$0xff] %v1551_v12  ;;  %1936 = vst [vmem:[%s3513_s17 + $0xa30] sm:$0xff] %v1552_v15  ;;  %v1581_v9 = vmul.f32 %v2570_v7, %v4535_v0  ;;  %v1582_v11 = vmul.f32 %v2571_v10, %v4535_v0  ;;  %v2572_v12 = vld [vmem:[%s2973_s13 + $0xb28] sm:$0xff]  ;;  %v2573_v15 = vld [vmem:[%s2973_s13 + $0xb30] sm:$0xff] }
 0x41c   : > { %1937 = vst [vmem:[%s3513_s17 + $0xa38] sm:$0xff] %v1553_v17  ;;  %1938 = vst [vmem:[%s3513_s17 + $0xa40] sm:$0xff] %v1554_v20  ;;  %v1583_v13 = vmul.f32 %v2572_v12, %v4535_v0  ;;  %v1584_v16 = vmul.f32 %v2573_v15, %v4535_v0  ;;  %v2574_v17 = vld [vmem:[%s2973_s13 + $0xb38] sm:$0xff]  ;;  %v2575_v20 = vld [vmem:[%s2973_s13 + $0xb40] sm:$0xff] }
 0x41d   : > { %1939 = vst [vmem:[%s3513_s17 + $0xa48] sm:$0xff] %v1555_v22  ;;  %1940 = vst [vmem:[%s3513_s17 + $0xa50] sm:$0xff] %v1556_v25  ;;  %v1585_v18 = vmul.f32 %v2574_v17, %v4535_v0  ;;  %v1586_v21 = vmul.f32 %v2575_v20, %v4535_v0  ;;  %v2576_v22 = vld [vmem:[%s2973_s13 + $0xb48] sm:$0xff]  ;;  %v2577_v25 = vld [vmem:[%s2973_s13 + $0xb50] sm:$0xff] }
 0x41e   : > { %1941 = vst [vmem:[%s3513_s17 + $0xa58] sm:$0xff] %v1557_v27  ;;  %1942 = vst [vmem:[%s3513_s17 + $0xa60] sm:$0xff] %v1558_v30  ;;  %v1587_v23 = vmul.f32 %v2576_v22, %v4535_v0  ;;  %v1588_v26 = vmul.f32 %v2577_v25, %v4535_v0  ;;  %v2578_v27 = vld [vmem:[%s2973_s13 + $0xb58] sm:$0xff]  ;;  %v2579_v30 = vld [vmem:[%s2973_s13 + $0xb60] sm:$0xff] }
 0x41f   : > { %1943 = vst [vmem:[%s3513_s17 + $0xa68] sm:$0xff] %v1559_v32  ;;  %1944 = vst [vmem:[%s3513_s17 + $0xa70] sm:$0xff] %v1560_v35  ;;  %v1589_v28 = vmul.f32 %v2578_v27, %v4535_v0  ;;  %v1590_v31 = vmul.f32 %v2579_v30, %v4535_v0  ;;  %v2580_v32 = vld [vmem:[%s2973_s13 + $0xb68] sm:$0xff]  ;;  %v2581_v35 = vld [vmem:[%s2973_s13 + $0xb70] sm:$0xff] }
 0x420   : > { %1945 = vst [vmem:[%s3513_s17 + $0xa78] sm:$0xff] %v1561_v37  ;;  %1946 = vst [vmem:[%s3513_s17 + $0xa80] sm:$0xff] %v1562_v40  ;;  %v1591_v33 = vmul.f32 %v2580_v32, %v4535_v0  ;;  %v1592_v36 = vmul.f32 %v2581_v35, %v4535_v0  ;;  %v2582_v37 = vld [vmem:[%s2973_s13 + $0xb78] sm:$0xff]  ;;  %v2583_v40 = vld [vmem:[%s2973_s13 + $0xb80] sm:$0xff] }
 0x421   : > { %1947 = vst [vmem:[%s3513_s17 + $0xa88] sm:$0xff] %v1563_v42  ;;  %1948 = vst [vmem:[%s3513_s17 + $0xa90] sm:$0xff] %v1564_v44  ;;  %v1593_v38 = vmul.f32 %v2582_v37, %v4535_v0  ;;  %v1594_v41 = vmul.f32 %v2583_v40, %v4535_v0  ;;  %v2584_v42 = vld [vmem:[%s2973_s13 + $0xb88] sm:$0xff]  ;;  %v2585_v44 = vld [vmem:[%s2973_s13 + $0xb90] sm:$0xff] }
 0x422   : > { %1949 = vst [vmem:[%s3513_s17 + $0xa98] sm:$0xff] %v1565_v57  ;;  %1950 = vst [vmem:[%s3513_s17 + $0xaa0] sm:$0xff] %v1566_v2  ;;  %v1595_v43 = vmul.f32 %v2584_v42, %v4535_v0  ;;  %v1596_v59 = vmul.f32 %v2585_v44, %v4535_v0  ;;  %v2586_v57 = vld [vmem:[%s2973_s13 + $0xb98] sm:$0xff]  ;;  %v2587_v2 = vld [vmem:[%s2973_s13 + $0xba0] sm:$0xff] }
 0x423   : > { %1951 = vst [vmem:[%s3513_s17 + $0xaa8] sm:$0xff] %v1567_v50  ;;  %1952 = vst [vmem:[%s3513_s17 + $0xab0] sm:$0xff] %v1568_v52  ;;  %v1597_v63 = vmul.f32 %v2586_v57, %v4535_v0  ;;  %v1598_v49 = vmul.f32 %v2587_v2, %v4535_v0  ;;  %v2588_v50 = vld [vmem:[%s2973_s13 + $0xba8] sm:$0xff]  ;;  %v2589_v52 = vld [vmem:[%s2973_s13 + $0xbb0] sm:$0xff] }
 0x424   : > { %1953 = vst [vmem:[%s3513_s17 + $0xab8] sm:$0xff] %v1569_v55  ;;  %1954 = vst [vmem:[%s3513_s17 + $0xac0] sm:$0xff] %v1570_v8  ;;  %v1599_v29 = vmul.f32 %v2588_v50, %v4535_v0  ;;  %v1600_v39 = vmul.f32 %v2589_v52, %v4535_v0  ;;  %v2590_v55 = vld [vmem:[%s2973_s13 + $0xbb8] sm:$0xff]  ;;  %v2591_v8 = vld [vmem:[%s2973_s13 + $0xbc0] sm:$0xff] }
 0x425   : > { %1955 = vst [vmem:[%s3513_s17 + $0xac8] sm:$0xff] %v1571_v45  ;;  %1956 = vst [vmem:[%s3513_s17 + $0xad0] sm:$0xff] %v1572_v47  ;;  %v1601_v34 = vmul.f32 %v2590_v55, %v4535_v0  ;;  %v1602_v46 = vmul.f32 %v2591_v8, %v4535_v0  ;;  %v2592_v45 = vld [vmem:[%s2973_s13 + $0xbc8] sm:$0xff]  ;;  %v2593_v47 = vld [vmem:[%s2973_s13 + $0xbd0] sm:$0xff] }
 0x426   : > { %1957 = vst [vmem:[%s3513_s17 + $0xad8] sm:$0xff] %v1573_v48  ;;  %1958 = vst [vmem:[%s3513_s17 + $0xae0] sm:$0xff] %v1574_v14  ;;  %v1603_v56 = vmul.f32 %v2592_v45, %v4535_v0  ;;  %v1604_v58 = vmul.f32 %v2593_v47, %v4535_v0  ;;  %v2594_v48 = vld [vmem:[%s2973_s13 + $0xbd8] sm:$0xff]  ;;  %v2595_v14 = vld [vmem:[%s2973_s13 + $0xbe0] sm:$0xff] }
 0x427   : > { %1959 = vst [vmem:[%s3513_s17 + $0xae8] sm:$0xff] %v1575_v19  ;;  %1960 = vst [vmem:[%s3513_s17 + $0xaf0] sm:$0xff] %v1576_v24  ;;  %v1605_v60 = vmul.f32 %v2594_v48, %v4535_v0  ;;  %v1606_v61 = vmul.f32 %v2595_v14, %v4535_v0  ;;  %v2596_v19 = vld [vmem:[%s2973_s13 + $0xbe8] sm:$0xff]  ;;  %v2597_v24 = vld [vmem:[%s2973_s13 + $0xbf0] sm:$0xff] }
 0x428   : > { %1961 = vst [vmem:[%s3513_s17 + $0xaf8] sm:$0xff] %v1577_v51  ;;  %1962 = vst [vmem:[%s3513_s17 + $0xb00] sm:$0xff] %v1578_v53  ;;  %v1607_v62 = vmul.f32 %v2596_v19, %v4535_v0  ;;  %v1608_v1 = vmul.f32 %v2597_v24, %v4535_v0  ;;  %v2598_v51 = vld [vmem:[%s2973_s13 + $0xbf8] sm:$0xff]  ;;  %s2786_s13 = smov [#allocation10]  }
 0x429   : > { %1963 = vst [vmem:[%s3513_s17 + $0xb08] sm:$0xff] %v1579_v54  ;;  %1964 = vst [vmem:[%s3513_s17 + $0xb10] sm:$0xff] %v1580_v6  ;;  %v1609_v3 = vmul.f32 %v2598_v51, %v4535_v0  ;;  %s2709_s8 = sshll.u32 %s2786_s13, 4  ;;  %s2710_s8 = int_to_ptr.vmem [resolvable:$false] %s2709_s8 }
 0x42a   : > { %1965 = vst [vmem:[%s3513_s17 + $0xb18] sm:$0xff] %v1581_v9  ;;  %1966 = vst [vmem:[%s3513_s17 + $0xb20] sm:$0xff] %v1582_v11  ;;  %s2711_s30 = scalar_lea.vmem %s2710_s8, 98304  ;;  %p2712_p13 = scmp.lt.s32.totalorder %s4656_s18, %s2710_s8 }
 0x42b   : > { %1967 = vst [vmem:[%s3513_s17 + $0xb28] sm:$0xff] %v1583_v13  ;;  %1968 = vst [vmem:[%s3513_s17 + $0xb30] sm:$0xff] %v1584_v16  ;;  %p2713_p0 = scmp.lt.s32.totalorder %s2711_s30, %s2705_s19 }
 0x42c   : > { %1969 = vst [vmem:[%s3513_s17 + $0xb38] sm:$0xff] %v1585_v18  ;;  %1970 = vst [vmem:[%s3513_s17 + $0xb40] sm:$0xff] %v1586_v21 }
 0x42d   : > { %1971 = vst [vmem:[%s3513_s17 + $0xb48] sm:$0xff] %v1587_v23  ;;  %1972 = vst [vmem:[%s3513_s17 + $0xb50] sm:$0xff] %v1588_v26  ;;  %p2714_p1 = por %p2713_p0, %p2712_p13 }
 0x42e   : > { %1973 = vst [vmem:[%s3513_s17 + $0xb58] sm:$0xff] %v1589_v28  ;;  %1974 = vst [vmem:[%s3513_s17 + $0xb60] sm:$0xff] %v1590_v31 }
 0x42f   : > { %1975 = vst [vmem:[%s3513_s17 + $0xb68] sm:$0xff] %v1591_v33  ;;  %1976 = vst [vmem:[%s3513_s17 + $0xb70] sm:$0xff] %v1592_v36  ;;  %p2715_p4 = pnand %p2714_p1, %p2708_p10 }
 0x430   : > { %1977 = vst [vmem:[%s3513_s17 + $0xb78] sm:$0xff] %v1593_v38  ;;  %1978 = vst [vmem:[%s3513_s17 + $0xb80] sm:$0xff] %v1594_v41 }
 0x431   : > { %1979 = vst [vmem:[%s3513_s17 + $0xb88] sm:$0xff] %v1595_v43  ;;  %1980 = vst [vmem:[%s3513_s17 + $0xb90] sm:$0xff] %v1596_v59 }
 0x432   : > { %1981 = vst [vmem:[%s3513_s17 + $0xb98] sm:$0xff] %v1597_v63  ;;  %1982 = vst [vmem:[%s3513_s17 + $0xba0] sm:$0xff] %v1598_v49 }
 0x433   : > { %1983 = vst [vmem:[%s3513_s17 + $0xba8] sm:$0xff] %v1599_v29  ;;  %1984 = vst [vmem:[%s3513_s17 + $0xbb0] sm:$0xff] %v1600_v39 }
 0x434   : > { %1985 = vst [vmem:[%s3513_s17 + $0xbb8] sm:$0xff] %v1601_v34  ;;  %1986 = vst [vmem:[%s3513_s17 + $0xbc0] sm:$0xff] %v1602_v46 }
 0x435   : > { %1987 = vst [vmem:[%s3513_s17 + $0xbc8] sm:$0xff] %v1603_v56  ;;  %1988 = vst [vmem:[%s3513_s17 + $0xbd0] sm:$0xff] %v1604_v58 }
 0x436   : > { %1989 = vst [vmem:[%s3513_s17 + $0xbd8] sm:$0xff] %v1605_v60  ;;  %1990 = vst [vmem:[%s3513_s17 + $0xbe0] sm:$0xff] %v1606_v61 }
 0x437   : > { %1991 = vst [vmem:[%s3513_s17 + $0xbe8] sm:$0xff] %v1607_v62  ;;  %1992 = vst [vmem:[%s3513_s17 + $0xbf0] sm:$0xff] %v1608_v1 }
 0x438   : > { %1993 = vst [vmem:[%s3513_s17 + $0xbf8] sm:$0xff] %v1609_v3 }
 0x439   : > { %2718 = shalt.err (!%p2715_p4)
}
 0x43a   : > { %s2719_s9 = scalar_lea.hbm %s4652_s12, 49152  ;;  %s2723_s29 = scalar_lea.hbm %s4725_s6, 98304 }
 0x43b   : > { %p2720_p2 = scmp.ne.s32.totalorder %s4652_s12, %s2719_s9  ;;  %p2724_p6 = scmp.lt.s32.totalorder %s4652_s12, %s4725_s6 }
 0x43c   : > { %p2725_p8 = scmp.lt.s32.totalorder %s2723_s29, %s2719_s9 }
 0x43d   : > { %p2721_p9 = pnand %p2720_p2, %p4743_p5 }
 0x43e   : > { %p2726_p3 = por %p2725_p8, %p2724_p6 }
 0x43f   : > { %p2722_p11 = pneg %p2721_p9 }
 0x441   : > { %p2727_p12 = pnand %p2726_p3, %p2722_p11 }
 0x443   : > { %2730 = shalt.err (!%p2727_p12)
}
 0x444   : > { %s2787_s20 = smov 4096   ;;  %s2788_s26 = smov 256  }
 0x445   : > { %2142 = dma.vmem_to_hbm [thread:$0]  (%p4743_p5), %s4656_s18, 49152, %s4652_s12, %s1995_s25, %s2787_s20, %s2787_s20, %s2788_s26  }
 0x446 PF: > { %s2023_s19 = sand.u32 1, %s2765_s21   ;;  %p4744_p7 = scmp.ne.s32.totalorder %s4731_s28, 0 }
 0x447   : > { %p4745_p10 = scmp.ge.s32.totalorder %s2777_s24, 2  ;;  %s2024_s13 = scalar_lea.sflag [#allocation4], %s2023_s19 }
 0x449   : > { %p2159_p13 = pnand %p4745_p10, %p4744_p7 }
 0x44b   : > { %p2160_p0 = pneg %p2159_p13 }
 0x44d   : > { %2760 = dma.done.wait (%p2160_p0), %s2024_s13, 49152  }
 0x44e   : > { %2762 = vsyncadd (%p2160_p0), %s2024_s13, 4294918144  ;;  %p21_p1 = scmp.ge.s32.totalorder %s2912_s7, 4   ;;  %s4746_s21 = smov %s2769_s22 }
 0x44f   : > { %s4747_s22 = smov %s2773_s23  ;;  %s4748_s23 = smov %s2922_s10 }
 0x450   : > { %s4749_s24 = smov %s2912_s7  ;;  %23 = sbr.rel (!%p21_p1) target bundleno = 7 (0x7), region = 101 }
 0x455   :  { %2029 = vsyncpa [#allocation3], 1 }
 0x456   :  { %2031 = vsyncpa [#allocation3 + $0x1], 1 }
 0x457   :  { %2032 = vsyncpa [#allocation6], 1 }
 0x458   :  { %2033 = vsyncpa [#allocation9], 1 }
 0x459   :  { %2034 = vsyncpa [#allocation4], 1 }
 0x45a   :  { %2036 = vsyncpa [#allocation4 + $0x1], 1 }

</bundles_post_ra>
